<compile_context>
chip_gen: v6e
topology: v6e:2x2x1
jax: 0.10.0
libtpu: 0.0.40
codegen_flags: <defaults>
</compile_context>

<pallas_src>
import jax
import jax.numpy as jnp
from jax.experimental import pallas as pl
from jax.experimental.pallas import tpu as pltpu


# ---------------------------------------------------------------------------
# Static layer metadata
# ---------------------------------------------------------------------------
INPUT_SHAPE = 256
LATENT_DIM = 128  # matches default latent_dim of the PyTorch module
DIMS = [INPUT_SHAPE, 1024, 512, 256, 128, 64,      # encoder
        128, 256, 512, 1024, INPUT_SHAPE]          # decoder
NUM_LAYERS = len(DIMS) - 1                         # 10 Linear+ReLU layers

LANE = 128
def _pad_lane(n):
    return max(LANE, ((n + LANE - 1) // LANE) * LANE)

# Pad interior widths (only 64 -> 128 changes); input/output stay INPUT_SHAPE.
PAD_DIMS = [DIMS[0]] + [_pad_lane(d) for d in DIMS[1:-1]] + [DIMS[-1]]

# Group layers by (padded) out_features -> one weight slab per group.
GROUP_OUTS = sorted({PAD_DIMS[l + 1] for l in range(NUM_LAYERS)}, reverse=True)

LAYER_META = []            # (slab_idx, row_off, in_f, out_f, bias_off) per layer
_row_cursor = {o: 0 for o in GROUP_OUTS}
_bias_cursor = 0
for _l in range(NUM_LAYERS):
    _in_f, _out_f = PAD_DIMS[_l], PAD_DIMS[_l + 1]
    _slab = GROUP_OUTS.index(_out_f)
    LAYER_META.append((_slab, _row_cursor[_out_f], _in_f, _out_f, _bias_cursor))
    _row_cursor[_out_f] += _in_f
    _bias_cursor += _out_f
BIAS_TOTAL = _bias_cursor  # 4224 = 33 * 128 (lane aligned)


# ---------------------------------------------------------------------------
# Fused kernel: refs = (x, w_slab_0..3, bias_slab, out)
# ---------------------------------------------------------------------------
def _fused_ae_kernel(x_ref, *refs):
    o_ref = refs[-1]
    b_ref = refs[-2]
    w_slabs = refs[:-2]

    h = x_ref[...].astype(jnp.bfloat16)                    # (TB, in_f) bf16
    for layer in range(NUM_LAYERS):
        slab, row_off, in_f, out_f, b_off = LAYER_META[layer]
        w = w_slabs[slab][row_off:row_off + in_f, :]       # (in_f, out_f) bf16, static view
        b = b_ref[:, b_off:b_off + out_f]                  # (1, out_f) f32, static view
        y = jnp.dot(h, w, preferred_element_type=jnp.float32)
        a = jnp.maximum(y + b, 0.0)                        # bias-add + ReLU in f32
        # Carry bf16 between layers; keep the final activation in f32 for the store.
        h = a.astype(jnp.bfloat16) if layer + 1 < NUM_LAYERS else a
    o_ref[...] = h.astype(o_ref.dtype)


def simple_mlp_ae_pallas(x, packed):
    """Full encode->decode forward as a single fused, batch-tiled Pallas kernel."""
    *w_slabs, bias_slab = packed
    batch = x.shape[0]

    # Batch tile: 256 rows fills the v6e/v7x MXU; fall back for small batches.
    if batch % 256 == 0:
        tb = 256
    elif batch % 128 == 0:
        tb = 128
    else:
        tb = batch
    grid = (batch // tb,)

    x_spec = pl.BlockSpec((tb, INPUT_SHAPE), lambda i: (i, 0))
    out_spec = pl.BlockSpec((tb, INPUT_SHAPE), lambda i: (i, 0))

    def resident(arr):  # whole array, DMA'd once, stays resident across batch tiles
        return pl.BlockSpec(arr.shape, lambda i: (0, 0))

    in_specs = [x_spec] + [resident(w) for w in w_slabs] + [resident(bias_slab)]

    return pl.pallas_call(
        _fused_ae_kernel,
        out_shape=jax.ShapeDtypeStruct((batch, INPUT_SHAPE), jnp.float32),
        grid=grid,
        in_specs=in_specs,
        out_specs=out_spec,
        compiler_params=pltpu.CompilerParams(
            # Batch tiles are independent -> shard across v7x's 2 TensorCores.
            dimension_semantics=("parallel",),
            # ~3.9 MB bf16 weights (x2 buffers) + (TB,1024) activations: fits
            # comfortably under v7x's 64 MiB physical VMEM with headroom.
            vmem_limit_bytes=48 * 1024 * 1024,
        ),
    )(x, *w_slabs, bias_slab)


simple_mlp_ae_forward = jax.jit(simple_mlp_ae_pallas)


# ---------------------------------------------------------------------------
# Parameter construction (PyTorch nn.Linear-style init) and packing
# ---------------------------------------------------------------------------
def _init_linear(key, in_f, out_f):
    # PyTorch default: U(-1/sqrt(fan_in), 1/sqrt(fan_in)) for both W and b.
    kw, kb = jax.random.split(key)
    bound = 1.0 / jnp.sqrt(jnp.float32(in_f))
    w = jax.random.uniform(kw, (in_f, out_f), jnp.float32, -bound, bound)
    b = jax.random.uniform(kb, (out_f,), jnp.float32, -bound, bound)
    return w, b


def make_params(key):
    """Per-layer (W (in_f, out_f) f32, b (out_f,) f32) at the *unpadded* DIMS."""
    params = []
    keys = jax.random.split(key, NUM_LAYERS)
    for k, din, dout in zip(keys, DIMS[:-1], DIMS[1:]):
        params.append(_init_linear(k, din, dout))
    return params


def pack_params(params):
    """Zero-pad narrow dims to 128 lanes, cast weights to bf16, and pack into
    4 row-concatenated weight slabs (grouped by out_features) + 1 f32 bias slab."""
    slab_parts = [[] for _ in GROUP_OUTS]
    bias_parts = []
    for l, (w, b) in enumerate(params):
        in_f, out_f = PAD_DIMS[l], PAD_DIMS[l + 1]
        w_p = jnp.zeros((in_f, out_f), jnp.float32).at[:w.shape[0], :w.shape[1]].set(w)
        b_p = jnp.zeros((out_f,), jnp.float32).at[:b.shape[0]].set(b)
        slab, _, _, _, _ = LAYER_META[l]
        slab_parts[slab].append(w_p.astype(jnp.bfloat16))
        bias_parts.append(b_p)
    w_slabs = tuple(jnp.concatenate(parts, axis=0) for parts in slab_parts)
    bias_slab = jnp.concatenate(bias_parts, axis=0).reshape(1, BIAS_TOTAL)
    return (*w_slabs, bias_slab)


# ---------------------------------------------------------------------------
# Pure-JAX reference on the UNPADDED params with identical numerics
# (bf16 matmul operands, f32 accumulate, f32 bias+ReLU, bf16 carry).
# Also verifies that the lane-padding in the kernel is numerically transparent.
# ---------------------------------------------------------------------------
def simple_mlp_ae_reference(x, params):
    h = x.astype(jnp.bfloat16)
    for idx, (w, b) in enumerate(params):
        y = jnp.dot(h, w.astype(jnp.bfloat16), preferred_element_type=jnp.float32)
        a = jnp.maximum(y + b.reshape(1, -1), 0.0)
        h = a.astype(jnp.bfloat16) if idx + 1 < len(params) else a
    return h


if __name__ == "__main__":
    BATCH = 8   # weight-bandwidth bound at this size; throughput scales with batch.

    key = jax.random.PRNGKey(0)
    kx, kp = jax.random.split(key)

    x = jax.random.normal(kx, (BATCH, INPUT_SHAPE), dtype=jnp.float32)
    params = make_params(kp)
    packed = pack_params(params)

    out = simple_mlp_ae_forward(x, packed)
    out = jax.block_until_ready(out)

    assert out.shape == (BATCH, INPUT_SHAPE)
    assert out.dtype == jnp.float32
    # Final decoder layer has a ReLU in the PyTorch spec => non-negative output.
    assert bool(jnp.all(out >= 0.0))

    ref = simple_mlp_ae_reference(x, params)
    assert bool(jnp.allclose(out, ref, rtol=2e-2, atol=2e-2)), (
        "Pallas output diverges from JAX reference")

    print("KERNEL_OK")
</pallas_src>

<mosaic_0001>
module attributes {stable_mosaic.version = 11 : i64} {
  func.func @_fused_ae_kernel(%arg0: i32, %arg1: memref<8x256xf32, #tpu.memory_space<vmem>>, %arg2: memref<768x1024xbf16, #tpu.memory_space<vmem>>, %arg3: memref<1280x512xbf16, #tpu.memory_space<vmem>>, %arg4: memref<1664x256xbf16, #tpu.memory_space<vmem>>, %arg5: memref<512x128xbf16, #tpu.memory_space<vmem>>, %arg6: memref<1x4224xf32, #tpu.memory_space<vmem>>, %arg7: memref<8x256xf32, #tpu.memory_space<vmem>>) attributes {dimension_semantics = [#tpu.dimension_semantics<parallel>], iteration_bounds = array<i64: 1>, scalar_prefetch = 0 : i64, scratch_operands = 0 : i64, tpu.core_type = #tpu.core_type<tc>, window_params = [{transform_indices = @transform_0, window_bounds = array<i64: 8, 256>}, {pipeline_mode = #tpu.pipeline_mode<synchronous>, transform_indices = @transform_1, window_bounds = array<i64: 768, 1024>}, {pipeline_mode = #tpu.pipeline_mode<synchronous>, transform_indices = @transform_2, window_bounds = array<i64: 1280, 512>}, {pipeline_mode = #tpu.pipeline_mode<synchronous>, transform_indices = @transform_3, window_bounds = array<i64: 1664, 256>}, {pipeline_mode = #tpu.pipeline_mode<synchronous>, transform_indices = @transform_4, window_bounds = array<i64: 512, 128>}, {pipeline_mode = #tpu.pipeline_mode<synchronous>, transform_indices = @transform_5, window_bounds = array<i64: 1, 4224>}, {transform_indices = @transform_6, window_bounds = array<i64: 8, 256>}]} {
    %c0 = arith.constant 0 : index
    %c0_0 = arith.constant 0 : index
    %0 = vector.load %arg1[%c0, %c0_0] : memref<8x256xf32, #tpu.memory_space<vmem>>, vector<8x256xf32>
    %1 = arith.truncf %0 : vector<8x256xf32> to vector<8x256xbf16>
    %c0_1 = arith.constant 0 : index
    %c0_2 = arith.constant 0 : index
    %2 = vector.load %arg2[%c0_1, %c0_2] : memref<768x1024xbf16, #tpu.memory_space<vmem>>, vector<256x1024xbf16>
    %c0_3 = arith.constant 0 : index
    %c0_4 = arith.constant 0 : index
    %3 = vector.load %arg6[%c0_3, %c0_4] : memref<1x4224xf32, #tpu.memory_space<vmem>>, vector<1x1024xf32>
    %cst = arith.constant dense<0.000000e+00> : vector<8x1024xf32>
    %4 = tpu.matmul %1, %2, %cst {dimension_numbers = #tpu.dot_dimension_numbers<[1], [0], [0], [1], [0, 0, 1, 1], [], []>} : vector<8x256xbf16>, vector<256x1024xbf16>, vector<8x1024xf32> -> vector<8x1024xf32>
    %5 = vector.broadcast %3 : vector<1x1024xf32> to vector<8x1024xf32>
    %6 = arith.addf %4, %5 : vector<8x1024xf32>
    %cst_5 = arith.constant 0.000000e+00 : f32
    %7 = vector.broadcast %cst_5 : f32 to vector<8x1024xf32>
    %8 = arith.maximumf %6, %7 : vector<8x1024xf32>
    %9 = arith.truncf %8 : vector<8x1024xf32> to vector<8x1024xbf16>
    %c0_6 = arith.constant 0 : index
    %c0_7 = arith.constant 0 : index
    %10 = vector.load %arg3[%c0_6, %c0_7] : memref<1280x512xbf16, #tpu.memory_space<vmem>>, vector<1024x512xbf16>
    %c0_8 = arith.constant 0 : index
    %c1024 = arith.constant 1024 : index
    %11 = vector.load %arg6[%c0_8, %c1024] : memref<1x4224xf32, #tpu.memory_space<vmem>>, vector<1x512xf32>
    %cst_9 = arith.constant dense<0.000000e+00> : vector<8x512xf32>
    %12 = tpu.matmul %9, %10, %cst_9 {dimension_numbers = #tpu.dot_dimension_numbers<[1], [0], [0], [1], [0, 0, 1, 1], [], []>} : vector<8x1024xbf16>, vector<1024x512xbf16>, vector<8x512xf32> -> vector<8x512xf32>
    %13 = vector.broadcast %11 : vector<1x512xf32> to vector<8x512xf32>
    %14 = arith.addf %12, %13 : vector<8x512xf32>
    %cst_10 = arith.constant 0.000000e+00 : f32
    %15 = vector.broadcast %cst_10 : f32 to vector<8x512xf32>
    %16 = arith.maximumf %14, %15 : vector<8x512xf32>
    %17 = arith.truncf %16 : vector<8x512xf32> to vector<8x512xbf16>
    %c0_11 = arith.constant 0 : index
    %c0_12 = arith.constant 0 : index
    %18 = vector.load %arg4[%c0_11, %c0_12] : memref<1664x256xbf16, #tpu.memory_space<vmem>>, vector<512x256xbf16>
    %c0_13 = arith.constant 0 : index
    %c1536 = arith.constant 1536 : index
    %19 = vector.load %arg6[%c0_13, %c1536] : memref<1x4224xf32, #tpu.memory_space<vmem>>, vector<1x256xf32>
    %cst_14 = arith.constant dense<0.000000e+00> : vector<8x256xf32>
    %20 = tpu.matmul %17, %18, %cst_14 {dimension_numbers = #tpu.dot_dimension_numbers<[1], [0], [0], [1], [0, 0, 1, 1], [], []>} : vector<8x512xbf16>, vector<512x256xbf16>, vector<8x256xf32> -> vector<8x256xf32>
    %21 = vector.broadcast %19 : vector<1x256xf32> to vector<8x256xf32>
    %22 = arith.addf %20, %21 : vector<8x256xf32>
    %cst_15 = arith.constant 0.000000e+00 : f32
    %23 = vector.broadcast %cst_15 : f32 to vector<8x256xf32>
    %24 = arith.maximumf %22, %23 : vector<8x256xf32>
    %25 = arith.truncf %24 : vector<8x256xf32> to vector<8x256xbf16>
    %c0_16 = arith.constant 0 : index
    %c0_17 = arith.constant 0 : index
    %26 = vector.load %arg5[%c0_16, %c0_17] : memref<512x128xbf16, #tpu.memory_space<vmem>>, vector<256x128xbf16>
    %c0_18 = arith.constant 0 : index
    %c1792 = arith.constant 1792 : index
    %27 = vector.load %arg6[%c0_18, %c1792] : memref<1x4224xf32, #tpu.memory_space<vmem>>, vector<1x128xf32>
    %cst_19 = arith.constant dense<0.000000e+00> : vector<8x128xf32>
    %28 = tpu.matmul %25, %26, %cst_19 {dimension_numbers = #tpu.dot_dimension_numbers<[1], [0], [0], [1], [0, 0, 1, 1], [], []>} : vector<8x256xbf16>, vector<256x128xbf16>, vector<8x128xf32> -> vector<8x128xf32>
    %29 = vector.broadcast %27 : vector<1x128xf32> to vector<8x128xf32>
    %30 = arith.addf %28, %29 : vector<8x128xf32>
    %cst_20 = arith.constant 0.000000e+00 : f32
    %31 = vector.broadcast %cst_20 : f32 to vector<8x128xf32>
    %32 = arith.maximumf %30, %31 : vector<8x128xf32>
    %33 = arith.truncf %32 : vector<8x128xf32> to vector<8x128xbf16>
    %c256 = arith.constant 256 : index
    %c0_21 = arith.constant 0 : index
    %34 = vector.load %arg5[%c256, %c0_21] : memref<512x128xbf16, #tpu.memory_space<vmem>>, vector<128x128xbf16>
    %c0_22 = arith.constant 0 : index
    %c1920 = arith.constant 1920 : index
    %35 = vector.load %arg6[%c0_22, %c1920] : memref<1x4224xf32, #tpu.memory_space<vmem>>, vector<1x128xf32>
    %cst_23 = arith.constant dense<0.000000e+00> : vector<8x128xf32>
    %36 = tpu.matmul %33, %34, %cst_23 {dimension_numbers = #tpu.dot_dimension_numbers<[1], [0], [0], [1], [0, 0, 1, 1], [], []>} : vector<8x128xbf16>, vector<128x128xbf16>, vector<8x128xf32> -> vector<8x128xf32>
    %37 = vector.broadcast %35 : vector<1x128xf32> to vector<8x128xf32>
    %38 = arith.addf %36, %37 : vector<8x128xf32>
    %cst_24 = arith.constant 0.000000e+00 : f32
    %39 = vector.broadcast %cst_24 : f32 to vector<8x128xf32>
    %40 = arith.maximumf %38, %39 : vector<8x128xf32>
    %41 = arith.truncf %40 : vector<8x128xf32> to vector<8x128xbf16>
    %c384 = arith.constant 384 : index
    %c0_25 = arith.constant 0 : index
    %42 = vector.load %arg5[%c384, %c0_25] : memref<512x128xbf16, #tpu.memory_space<vmem>>, vector<128x128xbf16>
    %c0_26 = arith.constant 0 : index
    %c2048 = arith.constant 2048 : index
    %43 = vector.load %arg6[%c0_26, %c2048] : memref<1x4224xf32, #tpu.memory_space<vmem>>, vector<1x128xf32>
    %cst_27 = arith.constant dense<0.000000e+00> : vector<8x128xf32>
    %44 = tpu.matmul %41, %42, %cst_27 {dimension_numbers = #tpu.dot_dimension_numbers<[1], [0], [0], [1], [0, 0, 1, 1], [], []>} : vector<8x128xbf16>, vector<128x128xbf16>, vector<8x128xf32> -> vector<8x128xf32>
    %45 = vector.broadcast %43 : vector<1x128xf32> to vector<8x128xf32>
    %46 = arith.addf %44, %45 : vector<8x128xf32>
    %cst_28 = arith.constant 0.000000e+00 : f32
    %47 = vector.broadcast %cst_28 : f32 to vector<8x128xf32>
    %48 = arith.maximumf %46, %47 : vector<8x128xf32>
    %49 = arith.truncf %48 : vector<8x128xf32> to vector<8x128xbf16>
    %c512 = arith.constant 512 : index
    %c0_29 = arith.constant 0 : index
    %50 = vector.load %arg4[%c512, %c0_29] : memref<1664x256xbf16, #tpu.memory_space<vmem>>, vector<128x256xbf16>
    %c0_30 = arith.constant 0 : index
    %c2176 = arith.constant 2176 : index
    %51 = vector.load %arg6[%c0_30, %c2176] : memref<1x4224xf32, #tpu.memory_space<vmem>>, vector<1x256xf32>
    %cst_31 = arith.constant dense<0.000000e+00> : vector<8x256xf32>
    %52 = tpu.matmul %49, %50, %cst_31 {dimension_numbers = #tpu.dot_dimension_numbers<[1], [0], [0], [1], [0, 0, 1, 1], [], []>} : vector<8x128xbf16>, vector<128x256xbf16>, vector<8x256xf32> -> vector<8x256xf32>
    %53 = vector.broadcast %51 : vector<1x256xf32> to vector<8x256xf32>
    %54 = arith.addf %52, %53 : vector<8x256xf32>
    %cst_32 = arith.constant 0.000000e+00 : f32
    %55 = vector.broadcast %cst_32 : f32 to vector<8x256xf32>
    %56 = arith.maximumf %54, %55 : vector<8x256xf32>
    %57 = arith.truncf %56 : vector<8x256xf32> to vector<8x256xbf16>
    %c1024_33 = arith.constant 1024 : index
    %c0_34 = arith.constant 0 : index
    %58 = vector.load %arg3[%c1024_33, %c0_34] : memref<1280x512xbf16, #tpu.memory_space<vmem>>, vector<256x512xbf16>
    %c0_35 = arith.constant 0 : index
    %c2432 = arith.constant 2432 : index
    %59 = vector.load %arg6[%c0_35, %c2432] : memref<1x4224xf32, #tpu.memory_space<vmem>>, vector<1x512xf32>
    %cst_36 = arith.constant dense<0.000000e+00> : vector<8x512xf32>
    %60 = tpu.matmul %57, %58, %cst_36 {dimension_numbers = #tpu.dot_dimension_numbers<[1], [0], [0], [1], [0, 0, 1, 1], [], []>} : vector<8x256xbf16>, vector<256x512xbf16>, vector<8x512xf32> -> vector<8x512xf32>
    %61 = vector.broadcast %59 : vector<1x512xf32> to vector<8x512xf32>
    %62 = arith.addf %60, %61 : vector<8x512xf32>
    %cst_37 = arith.constant 0.000000e+00 : f32
    %63 = vector.broadcast %cst_37 : f32 to vector<8x512xf32>
    %64 = arith.maximumf %62, %63 : vector<8x512xf32>
    %65 = arith.truncf %64 : vector<8x512xf32> to vector<8x512xbf16>
    %c256_38 = arith.constant 256 : index
    %c0_39 = arith.constant 0 : index
    %66 = vector.load %arg2[%c256_38, %c0_39] : memref<768x1024xbf16, #tpu.memory_space<vmem>>, vector<512x1024xbf16>
    %c0_40 = arith.constant 0 : index
    %c2944 = arith.constant 2944 : index
    %67 = vector.load %arg6[%c0_40, %c2944] : memref<1x4224xf32, #tpu.memory_space<vmem>>, vector<1x1024xf32>
    %cst_41 = arith.constant dense<0.000000e+00> : vector<8x1024xf32>
    %68 = tpu.matmul %65, %66, %cst_41 {dimension_numbers = #tpu.dot_dimension_numbers<[1], [0], [0], [1], [0, 0, 1, 1], [], []>} : vector<8x512xbf16>, vector<512x1024xbf16>, vector<8x1024xf32> -> vector<8x1024xf32>
    %69 = vector.broadcast %67 : vector<1x1024xf32> to vector<8x1024xf32>
    %70 = arith.addf %68, %69 : vector<8x1024xf32>
    %cst_42 = arith.constant 0.000000e+00 : f32
    %71 = vector.broadcast %cst_42 : f32 to vector<8x1024xf32>
    %72 = arith.maximumf %70, %71 : vector<8x1024xf32>
    %73 = arith.truncf %72 : vector<8x1024xf32> to vector<8x1024xbf16>
    %c640 = arith.constant 640 : index
    %c0_43 = arith.constant 0 : index
    %74 = vector.load %arg4[%c640, %c0_43] : memref<1664x256xbf16, #tpu.memory_space<vmem>>, vector<1024x256xbf16>
    %c0_44 = arith.constant 0 : index
    %c3968 = arith.constant 3968 : index
    %75 = vector.load %arg6[%c0_44, %c3968] : memref<1x4224xf32, #tpu.memory_space<vmem>>, vector<1x256xf32>
    %cst_45 = arith.constant dense<0.000000e+00> : vector<8x256xf32>
    %76 = tpu.matmul %73, %74, %cst_45 {dimension_numbers = #tpu.dot_dimension_numbers<[1], [0], [0], [1], [0, 0, 1, 1], [], []>} : vector<8x1024xbf16>, vector<1024x256xbf16>, vector<8x256xf32> -> vector<8x256xf32>
    %77 = vector.broadcast %75 : vector<1x256xf32> to vector<8x256xf32>
    %78 = arith.addf %76, %77 : vector<8x256xf32>
    %cst_46 = arith.constant 0.000000e+00 : f32
    %79 = vector.broadcast %cst_46 : f32 to vector<8x256xf32>
    %80 = arith.maximumf %78, %79 : vector<8x256xf32>
    %c0_47 = arith.constant 0 : index
    %c0_48 = arith.constant 0 : index
    %81 = vector.load %arg7[%c0_47, %c0_48] : memref<8x256xf32, #tpu.memory_space<vmem>>, vector<8x256xf32>
    tpu.vector_store %arg7[%c0_47, %c0_48], %80 {strides = array<i32>} : memref<8x256xf32, #tpu.memory_space<vmem>>, vector<8x256xf32>,
    return
  }
  func.func @transform_0(%arg0: i32) -> (i32, i32) {
    %c0_i32 = arith.constant 0 : i32
    %c0_i32_0 = arith.constant 0 : i32
    return %arg0, %c0_i32 : i32, i32
  }
  func.func @transform_1(%arg0: i32) -> (i32, i32) {
    %c0_i32 = arith.constant 0 : i32
    %c0_i32_0 = arith.constant 0 : i32
    %c0_i32_1 = arith.constant 0 : i32
    return %c0_i32, %c0_i32_0 : i32, i32
  }
  func.func @transform_2(%arg0: i32) -> (i32, i32) {
    %c0_i32 = arith.constant 0 : i32
    %c0_i32_0 = arith.constant 0 : i32
    %c0_i32_1 = arith.constant 0 : i32
    return %c0_i32, %c0_i32_0 : i32, i32
  }
  func.func @transform_3(%arg0: i32) -> (i32, i32) {
    %c0_i32 = arith.constant 0 : i32
    %c0_i32_0 = arith.constant 0 : i32
    %c0_i32_1 = arith.constant 0 : i32
    return %c0_i32, %c0_i32_0 : i32, i32
  }
  func.func @transform_4(%arg0: i32) -> (i32, i32) {
    %c0_i32 = arith.constant 0 : i32
    %c0_i32_0 = arith.constant 0 : i32
    %c0_i32_1 = arith.constant 0 : i32
    return %c0_i32, %c0_i32_0 : i32, i32
  }
  func.func @transform_5(%arg0: i32) -> (i32, i32) {
    %c0_i32 = arith.constant 0 : i32
    %c0_i32_0 = arith.constant 0 : i32
    %c0_i32_1 = arith.constant 0 : i32
    return %c0_i32, %c0_i32_0 : i32, i32
  }
  func.func @transform_6(%arg0: i32) -> (i32, i32) {
    %c0_i32 = arith.constant 0 : i32
    %c0_i32_0 = arith.constant 0 : i32
    return %arg0, %c0_i32 : i32, i32
  }
}

</mosaic_0001>

<bundles_post_ra>
// kernel: simple_mlp_ae_pallas.1
= control target key start
LH: loop header
LB: loop body
LE: loop exit
PB: predicated region body
PF: predicated region fallthrough
CT: control target
= control target key end

     0   :  { %11 = vsyncpa [#allocation3], 0  ;;  %s9692_s0 = inlined_call_operand.hbm [shape: f32[8,256], index: 0, kind: input, shape index: {}]   ;;  %s9693_s1 = inlined_call_operand.hbm [shape: bf16[768,1024], index: 1, kind: input, shape index: {}]   ;;  %s9694_s2 = inlined_call_operand.hbm [shape: bf16[1280,512], index: 2, kind: input, shape index: {}]   ;;  %s9695_s3 = inlined_call_operand.hbm [shape: bf16[1664,256], index: 3, kind: input, shape index: {}]   ;;  %s9696_s4 = inlined_call_operand.hbm [shape: bf16[512,128], index: 4, kind: input, shape index: {}]   ;;  %s9697_s5 = inlined_call_operand.hbm [shape: f32[1,4224], index: 5, kind: input, shape index: {}]   ;;  %s9698_s6 = inlined_call_operand.hbm [shape: f32[8,256], index: 6, kind: output, shape index: {}]  }
   0x1   :  { %12 = vsyncpa [#allocation6], 0 }
   0x2   :  { %13 = vsyncpa [#allocation9], 0 }
   0x3   :  { %14 = vsyncpa [#allocation12], 0 }
   0x4   :  { %15 = vsyncpa [#allocation4], 0  ;;  %s9432_s21 = smov [#allocation5]  }
   0x5   :  { %s31_s22 = sshll.u32 %s9432_s21, 4  ;;  %s32_s22 = int_to_ptr.vmem [resolvable:$true] %s31_s22 }
   0x6   :  { %s9290_s23 = scalar_lea.vmem %s32_s22, 49152  ;;  %p9295_p1 = scmp.lt.s32.totalorder %s32_s22, %s32_s22 }
   0x7   :  { %p9291_p0 = scmp.ne.s32.totalorder %s32_s22, %s9290_s23  ;;  %p9296_p2 = scmp.lt.s32.totalorder %s9290_s23, %s9290_s23 }
   0x9   :  { %p9297_p3 = por %p9296_p2, %p9295_p1 }
   0xb   :  { %p9298_p4 = pnand %p9297_p3, %p9291_p0 }
   0xd   :  { %9301 = shalt.err (!%p9298_p4)
}
   0xe   :  { %s9433_s24 = smov 512   ;;  %s9434_s25 = smov 32  }
   0xf   :  { %37 = dma.hbm_to_vmem [thread:$0]  %s9693_s1, 49152, %s32_s22, [#allocation6], %s9433_s24, %s9433_s24, %s9434_s25  }
  0x10   :  { %s9435_s28 = smov [#allocation8]  }
  0x11   :  { %s55_s29 = sshll.u32 %s9435_s28, 4  ;;  %s56_s29 = int_to_ptr.vmem [resolvable:$true] %s55_s29 }
  0x12   :  { %s9310_s30 = scalar_lea.vmem %s56_s29, 26624  ;;  %p9315_p6 = scmp.lt.s32.totalorder %s56_s29, %s56_s29 }
  0x13   :  { %p9311_p5 = scmp.ne.s32.totalorder %s56_s29, %s9310_s30  ;;  %p9316_p7 = scmp.lt.s32.totalorder %s9310_s30, %s9310_s30 }
  0x15   :  { %p9317_p8 = por %p9316_p7, %p9315_p6 }
  0x17   :  { %p9318_p9 = pnand %p9317_p8, %p9311_p5 }
  0x19   :  { %9321 = shalt.err (!%p9318_p9)
}
  0x1a   :  { %s9436_s7 = smov 128   ;;  %s9437_s8 = smov 8  }
  0x1b   :  { %61 = dma.hbm_to_vmem [thread:$0]  %s9695_s3, 26624, %s56_s29, [#allocation9], %s9436_s7, %s9436_s7, %s9437_s8  }
  0x1c   :  { %s9438_s11 = smov [#allocation2]   ;;  %s9439_s13 = smov [#allocation7]  }
  0x1d   :  { %s22_s12 = sshll.u32 %s9438_s11, 4  ;;  %s43_s1 = sshll.u32 %s9439_s13, 4  ;;  %s23_s12 = int_to_ptr.vmem [resolvable:$true] %s22_s12  ;;  %s44_s1 = int_to_ptr.vmem [resolvable:$true] %s43_s1 }
  0x1e   :  { %s9330_s14 = scalar_lea.vmem %s23_s12, 256  ;;  %p9335_p11 = scmp.lt.s32.totalorder %s23_s12, %s23_s12 }
  0x1f   :  { %p9331_p10 = scmp.ne.s32.totalorder %s23_s12, %s9330_s14  ;;  %p9336_p12 = scmp.lt.s32.totalorder %s9330_s14, %s9330_s14 }
  0x21   :  { %p9337_p13 = por %p9336_p12, %p9335_p11 }
  0x23   :  { %p9338_p0 = pnand %p9337_p13, %p9331_p10 }
  0x25   :  { %9341 = shalt.err (!%p9338_p0)
}
  0x26   :  { %25 = dma.hbm_to_vmem [thread:$0]  %s9692_s0, 256, %s23_s12, [#allocation3]  }
  0x27   :  { %s9350_s17 = scalar_lea.vmem %s44_s1, 40960  ;;  %p9355_p2 = scmp.lt.s32.totalorder %s44_s1, %s44_s1 }
  0x28   :  { %p9351_p1 = scmp.ne.s32.totalorder %s44_s1, %s9350_s17  ;;  %p9356_p3 = scmp.lt.s32.totalorder %s9350_s17, %s9350_s17 }
  0x2a   :  { %p9357_p4 = por %p9356_p3, %p9355_p2 }
  0x2c   :  { %p9358_p5 = pnand %p9357_p4, %p9351_p1 }
  0x2e   :  { %9361 = shalt.err (!%p9358_p5)
}
  0x2f   :  { %s9440_s3 = smov 256   ;;  %s9441_s18 = smov 16  }
  0x30   :  { %49 = dma.hbm_to_vmem [thread:$0]  %s9694_s2, 40960, %s44_s1, [#allocation6], %s9440_s3, %s9440_s3, %s9441_s18  }
  0x31   :  { %s9442_s21 = smov [#allocation10]  }
  0x32   :  { %s67_s22 = sshll.u32 %s9442_s21, 4  ;;  %s68_s22 = int_to_ptr.vmem [resolvable:$true] %s67_s22 }
  0x33   :  { %s9370_s23 = scalar_lea.vmem %s68_s22, 4096  ;;  %p9375_p7 = scmp.lt.s32.totalorder %s68_s22, %s68_s22 }
  0x34   :  { %p9371_p6 = scmp.ne.s32.totalorder %s68_s22, %s9370_s23  ;;  %p9376_p8 = scmp.lt.s32.totalorder %s9370_s23, %s9370_s23 }
  0x36   :  { %p9377_p9 = por %p9376_p8, %p9375_p7 }
  0x38   :  { %p9378_p10 = pnand %p9377_p9, %p9371_p6 }
  0x3a   :  { %9381 = shalt.err (!%p9378_p10)
}
  0x3b   :  { %s9443_s0 = smov 64   ;;  %s9444_s24 = smov 4  }
  0x3c   :  { %73 = dma.hbm_to_vmem [thread:$0]  %s9696_s4, 4096, %s68_s22, [#allocation9], %s9443_s0, %s9443_s0, %s9444_s24  }
  0x3d   :  { %s9445_s27 = smov [#allocation11]  }
  0x3e   :  { %s80_s28 = sshll.u32 %s9445_s27, 4  ;;  %s81_s28 = int_to_ptr.vmem [resolvable:$true] %s80_s28 }
  0x3f   :  { %s9390_s2 = scalar_lea.vmem %s81_s28, 528  ;;  %s9394_s29 = scalar_lea.vmem %s81_s28, 544 }
  0x40   :  { %p9391_p11 = scmp.ne.s32.totalorder %s81_s28, %s9390_s2  ;;  %p9395_p12 = scmp.lt.s32.totalorder %s81_s28, %s81_s28 }
  0x41   :  { %p9396_p13 = scmp.lt.s32.totalorder %s9394_s29, %s9390_s2 }
  0x43   :  { %p9397_p0 = por %p9396_p13, %p9395_p12 }
  0x45   :  { %p9398_p1 = pnand %p9397_p0, %p9391_p11 }
  0x47   :  { %9401 = shalt.err (!%p9398_p1)
}
  0x48   :  { %83 = dma.hbm_to_vmem [thread:$0]  %s9697_s5, 528, %s81_s28, [#allocation12]  }
  0x49   :  { %9422 = dma.done.wait [#allocation3], 256  }
  0x4a   :  { %9423 = vsyncadd [#allocation3], 4294967040 }
  0x4b   :  { %9424 = dma.done.wait [#allocation6], 90112  }
  0x4c   :  { %9425 = vsyncadd [#allocation6], 4294877184 }
  0x4d   :  { %9426 = dma.done.wait [#allocation9], 30720  }
  0x4e   :  { %9427 = vsyncadd [#allocation9], 4294936576 }
  0x4f   :  { %9428 = dma.done.wait [#allocation12], 528  }
  0x50   :  { %9429 = vsyncadd [#allocation12], 4294966768  ;;  %v163_v0 = vld [vmem:[#allocation5 + $0x1c0] sm:$0xff]  ;;  %v164_v2 = vld [vmem:[#allocation5 + $0x1c8] sm:$0xff]  ;;  %vm9447_vm0 = vmmov 0   ;;  %s9449_s4 = smov [#allocation13]  }
  0x51   :  { %v167_v1 = vld [vmem:[#allocation5 + $0x1e0] sm:$0xff]  ;;  %v168_v4 = vld [vmem:[#allocation5 + $0x1e8] sm:$0xff]  ;;  %v104_v53 = vld [vmem:[#allocation2 + $0x8] sm:$0xff]  ;;  %s7401_s5 = sshll.u32 %s9449_s4, 4  ;;  %s7402_s5 = int_to_ptr.vmem [resolvable:$true] %s7401_s5 }
  0x52   :  { %v7470_v3 = vcombine.high %v163_v0, %v167_v1  ;;  %v7469_v5 = vcombine.low %v163_v0, %v167_v1  ;;  %v155_v6 = vld [vmem:[#allocation5 + $0x180] sm:$0xff]  ;;  %v7472_v8 = vcombine.high %v164_v2, %v168_v4  ;;  %v7471_v9 = vcombine.low %v164_v2, %v168_v4  ;;  %v156_v11 = vld [vmem:[#allocation5 + $0x188] sm:$0xff]  ;;  %s9402_s8 = scalar_lea.vmem %s7402_s5, 256  ;;  %p9407_p3 = scmp.lt.s32.totalorder %s7402_s5, %s7402_s5 }
  0x53   :  { %v159_v7 = vld [vmem:[#allocation5 + $0x1a0] sm:$0xff]  ;;  %v160_v12 = vld [vmem:[#allocation5 + $0x1a8] sm:$0xff]  ;;  %v9503_v57 = vpack.c.bf16 %v104_v53, %v104_v53  ;;  %p9403_p2 = scmp.ne.s32.totalorder %s7402_s5, %s9402_s8  ;;  %p9408_p4 = scmp.lt.s32.totalorder %s9402_s8, %s9402_s8 }
  0x54   :  { %v7462_v10 = vcombine.high %v155_v6, %v159_v7  ;;  %v147_v13 = vld [vmem:[#allocation5 + $0x140] sm:$0xff]  ;;  %917 = vmatprep.subr.bf16.mxu0 %v7470_v3  ;;  %v7464_v14 = vcombine.high %v156_v11, %v160_v12  ;;  %v148_v16 = vld [vmem:[#allocation5 + $0x148] sm:$0xff]  ;;  %958 = vmatprep.subr.bf16.mxu1 %v7472_v8  ;;  %v7461_v18 = vcombine.low %v155_v6, %v159_v7 }
  0x55   :  { %v151_v15 = vld [vmem:[#allocation5 + $0x160] sm:$0xff]  ;;  %v152_v17 = vld [vmem:[#allocation5 + $0x168] sm:$0xff]  ;;  %918 = vmatpush1.bf16.msra.mxu0 %v7469_v5  ;;  %959 = vmatpush1.bf16.msra.mxu1 %v7471_v9  ;;  %v7463_v19 = vcombine.low %v156_v11, %v160_v12  ;;  %p9409_p5 = por %p9408_p4, %p9407_p3 }
  0x56   :  { %919 = vmatprep.subr.bf16.mxu0 %v7462_v10  ;;  %v7454_v20 = vcombine.high %v147_v13, %v151_v15  ;;  %960 = vmatprep.subr.bf16.mxu1 %v7464_v14  ;;  %v7456_v21 = vcombine.high %v148_v16, %v152_v17  ;;  %v139_v22 = vld [vmem:[#allocation5 + $0x100] sm:$0xff]  ;;  %v140_v24 = vld [vmem:[#allocation5 + $0x108] sm:$0xff]  ;;  %v7453_v26 = vcombine.low %v147_v13, %v151_v15 }
  0x57   :  { %v143_v23 = vld [vmem:[#allocation5 + $0x120] sm:$0xff]  ;;  %v144_v25 = vld [vmem:[#allocation5 + $0x128] sm:$0xff]  ;;  %v7455_v27 = vcombine.low %v148_v16, %v152_v17  ;;  %949 = vmatprep.mubr.bf16.mxu0 %v9503_v57  ;;  %990 = vmatprep.mubr.bf16.mxu1 %v9503_v57  ;;  %p9410_p6 = pnand %p9409_p5, %p9403_p2 }
  0x58   :  { %v7446_v28 = vcombine.high %v139_v22, %v143_v23  ;;  %v7448_v29 = vcombine.high %v140_v24, %v144_v25  ;;  %v131_v30 = vld [vmem:[#allocation5 + $0xc0] sm:$0xff]  ;;  %v132_v32 = vld [vmem:[#allocation5 + $0xc8] sm:$0xff]  ;;  %v7445_v34 = vcombine.low %v139_v22, %v143_v23  ;;  %v7447_v35 = vcombine.low %v140_v24, %v144_v25 }
  0x59   :  { %920 = vmatpush1.bf16.msra.mxu0 %v7461_v18  ;;  %961 = vmatpush1.bf16.msra.mxu1 %v7463_v19  ;;  %v135_v31 = vld [vmem:[#allocation5 + $0xe0] sm:$0xff]  ;;  %v136_v33 = vld [vmem:[#allocation5 + $0xe8] sm:$0xff] }
  0x5a   :  { %921 = vmatprep.subr.bf16.mxu0 %v7454_v20  ;;  %962 = vmatprep.subr.bf16.mxu1 %v7456_v21  ;;  %v7438_v36 = vcombine.high %v131_v30, %v135_v31  ;;  %v7440_v37 = vcombine.high %v132_v32, %v136_v33  ;;  %v123_v38 = vld [vmem:[#allocation5 + $0x80] sm:$0xff]  ;;  %v124_v40 = vld [vmem:[#allocation5 + $0x88] sm:$0xff]  ;;  %v7437_v42 = vcombine.low %v131_v30, %v135_v31 }
  0x5b   :  { %v127_v39 = vld [vmem:[#allocation5 + $0xa0] sm:$0xff]  ;;  %v128_v41 = vld [vmem:[#allocation5 + $0xa8] sm:$0xff]  ;;  %v7439_v43 = vcombine.low %v132_v32, %v136_v33 }
  0x5c   :  { %v7430_v44 = vcombine.high %v123_v38, %v127_v39  ;;  %v7432_v45 = vcombine.high %v124_v40, %v128_v41  ;;  %v115_v46 = vld [vmem:[#allocation5 + $0x40] sm:$0xff]  ;;  %v116_v48 = vld [vmem:[#allocation5 + $0x48] sm:$0xff]  ;;  %v7429_v50 = vcombine.low %v123_v38, %v127_v39  ;;  %v7431_v51 = vcombine.low %v124_v40, %v128_v41 }
  0x5d   :  { %922 = vmatpush1.bf16.msra.mxu0 %v7453_v26  ;;  %963 = vmatpush1.bf16.msra.mxu1 %v7455_v27  ;;  %v119_v47 = vld [vmem:[#allocation5 + $0x60] sm:$0xff]  ;;  %v120_v49 = vld [vmem:[#allocation5 + $0x68] sm:$0xff] }
  0x5e   :  { %923 = vmatprep.subr.bf16.mxu0 %v7446_v28  ;;  %964 = vmatprep.subr.bf16.mxu1 %v7448_v29  ;;  %v7422_v52 = vcombine.high %v115_v46, %v119_v47  ;;  %v7424_v54 = vcombine.high %v116_v48, %v120_v49  ;;  %v107_v55 = vld [vmem:[#allocation5] sm:$0xff]  ;;  %v108_v58 = vld [vmem:[#allocation5 + $0x8] sm:$0xff]  ;;  %v7421_v60 = vcombine.low %v115_v46, %v119_v47 }
  0x5f   :  { %v111_v56 = vld [vmem:[#allocation5 + $0x20] sm:$0xff]  ;;  %v112_v59 = vld [vmem:[#allocation5 + $0x28] sm:$0xff]  ;;  %v7423_v61 = vcombine.low %v116_v48, %v120_v49 }
  0x60   :  { %v7414_v62 = vcombine.high %v107_v55, %v111_v56  ;;  %v7416_v63 = vcombine.high %v108_v58, %v112_v59  ;;  %v227_v0 = vld [vmem:[#allocation5 + $0x3c0] sm:$0xff]  ;;  %v228_v2 = vld [vmem:[#allocation5 + $0x3c8] sm:$0xff]  ;;  %v7413_v4 = vcombine.low %v107_v55, %v111_v56  ;;  %v7415_v5 = vcombine.low %v108_v58, %v112_v59 }
  0x61   :  { %924 = vmatpush1.bf16.msra.mxu0 %v7445_v34  ;;  %965 = vmatpush1.bf16.msra.mxu1 %v7447_v35  ;;  %v231_v1 = vld [vmem:[#allocation5 + $0x3e0] sm:$0xff]  ;;  %v232_v3 = vld [vmem:[#allocation5 + $0x3e8] sm:$0xff] }
  0x62   :  { %925 = vmatprep.subr.bf16.mxu0 %v7438_v36  ;;  %966 = vmatprep.subr.bf16.mxu1 %v7440_v37  ;;  %v7534_v6 = vcombine.high %v227_v0, %v231_v1  ;;  %v7536_v7 = vcombine.high %v228_v2, %v232_v3  ;;  %v219_v8 = vld [vmem:[#allocation5 + $0x380] sm:$0xff]  ;;  %v220_v10 = vld [vmem:[#allocation5 + $0x388] sm:$0xff]  ;;  %v7533_v12 = vcombine.low %v227_v0, %v231_v1  ;;  %v165_v0 = vld [vmem:[#allocation5 + $0x1d0] sm:$0xff] }
  0x63   :  { %v223_v9 = vld [vmem:[#allocation5 + $0x3a0] sm:$0xff]  ;;  %v224_v11 = vld [vmem:[#allocation5 + $0x3a8] sm:$0xff]  ;;  %v7535_v13 = vcombine.low %v228_v2, %v232_v3  ;;  %v169_v1 = vld [vmem:[#allocation5 + $0x1f0] sm:$0xff] }
  0x64   :  { %v7526_v14 = vcombine.high %v219_v8, %v223_v9  ;;  %v7528_v15 = vcombine.high %v220_v10, %v224_v11  ;;  %v211_v16 = vld [vmem:[#allocation5 + $0x340] sm:$0xff]  ;;  %v212_v18 = vld [vmem:[#allocation5 + $0x348] sm:$0xff]  ;;  %v7525_v20 = vcombine.low %v219_v8, %v223_v9  ;;  %v7527_v21 = vcombine.low %v220_v10, %v224_v11  ;;  %v166_v3 = vld [vmem:[#allocation5 + $0x1d8] sm:$0xff] }
  0x65   :  { %926 = vmatpush1.bf16.msra.mxu0 %v7437_v42  ;;  %967 = vmatpush1.bf16.msra.mxu1 %v7439_v43  ;;  %v215_v17 = vld [vmem:[#allocation5 + $0x360] sm:$0xff]  ;;  %v216_v19 = vld [vmem:[#allocation5 + $0x368] sm:$0xff]  ;;  %v7474_v8 = vcombine.high %v165_v0, %v169_v1  ;;  %v157_v9 = vld [vmem:[#allocation5 + $0x190] sm:$0xff] }
  0x66   :  { %927 = vmatprep.subr.bf16.mxu0 %v7430_v44  ;;  %968 = vmatprep.subr.bf16.mxu1 %v7432_v45  ;;  %v7518_v22 = vcombine.high %v211_v16, %v215_v17  ;;  %v7520_v23 = vcombine.high %v212_v18, %v216_v19  ;;  %v203_v24 = vld [vmem:[#allocation5 + $0x300] sm:$0xff]  ;;  %v204_v26 = vld [vmem:[#allocation5 + $0x308] sm:$0xff]  ;;  %v7517_v28 = vcombine.low %v211_v16, %v215_v17  ;;  %v161_v10 = vld [vmem:[#allocation5 + $0x1b0] sm:$0xff] }
  0x67   :  { %v207_v25 = vld [vmem:[#allocation5 + $0x320] sm:$0xff]  ;;  %v208_v27 = vld [vmem:[#allocation5 + $0x328] sm:$0xff]  ;;  %v7519_v29 = vcombine.low %v212_v18, %v216_v19  ;;  %v7466_v17 = vcombine.high %v157_v9, %v161_v10  ;;  %v149_v18 = vld [vmem:[#allocation5 + $0x150] sm:$0xff] }
  0x68   :  { %v7510_v30 = vcombine.high %v203_v24, %v207_v25  ;;  %v7512_v31 = vcombine.high %v204_v26, %v208_v27  ;;  %v195_v32 = vld [vmem:[#allocation5 + $0x2c0] sm:$0xff]  ;;  %v196_v34 = vld [vmem:[#allocation5 + $0x2c8] sm:$0xff]  ;;  %v7509_v36 = vcombine.low %v203_v24, %v207_v25  ;;  %v7511_v37 = vcombine.low %v204_v26, %v208_v27  ;;  %v153_v19 = vld [vmem:[#allocation5 + $0x170] sm:$0xff] }
  0x69   :  { %928 = vmatpush1.bf16.msra.mxu0 %v7429_v50  ;;  %969 = vmatpush1.bf16.msra.mxu1 %v7431_v51  ;;  %v199_v33 = vld [vmem:[#allocation5 + $0x2e0] sm:$0xff]  ;;  %v200_v35 = vld [vmem:[#allocation5 + $0x2e8] sm:$0xff]  ;;  %v7458_v25 = vcombine.high %v149_v18, %v153_v19  ;;  %v141_v26 = vld [vmem:[#allocation5 + $0x110] sm:$0xff] }
  0x6a   :  { %929 = vmatprep.subr.bf16.mxu0 %v7422_v52  ;;  %970 = vmatprep.subr.bf16.mxu1 %v7424_v54  ;;  %v7502_v38 = vcombine.high %v195_v32, %v199_v33  ;;  %v187_v39 = vld [vmem:[#allocation5 + $0x280] sm:$0xff]  ;;  %v7504_v41 = vcombine.high %v196_v34, %v200_v35  ;;  %v188_v42 = vld [vmem:[#allocation5 + $0x288] sm:$0xff]  ;;  %v7501_v44 = vcombine.low %v195_v32, %v199_v33  ;;  %v145_v27 = vld [vmem:[#allocation5 + $0x130] sm:$0xff] }
  0x6b   :  { %v191_v40 = vld [vmem:[#allocation5 + $0x2a0] sm:$0xff]  ;;  %v192_v43 = vld [vmem:[#allocation5 + $0x2a8] sm:$0xff]  ;;  %v7503_v45 = vcombine.low %v196_v34, %v200_v35  ;;  %v7450_v33 = vcombine.high %v141_v26, %v145_v27  ;;  %v133_v34 = vld [vmem:[#allocation5 + $0xd0] sm:$0xff] }
  0x6c   :  { %v7494_v46 = vcombine.high %v187_v39, %v191_v40  ;;  %v179_v47 = vld [vmem:[#allocation5 + $0x240] sm:$0xff]  ;;  %v7496_v49 = vcombine.high %v188_v42, %v192_v43  ;;  %v180_v50 = vld [vmem:[#allocation5 + $0x248] sm:$0xff]  ;;  %v7493_v52 = vcombine.low %v187_v39, %v191_v40  ;;  %v7495_v53 = vcombine.low %v188_v42, %v192_v43  ;;  %v137_v35 = vld [vmem:[#allocation5 + $0xf0] sm:$0xff] }
  0x6d   :  { %930 = vmatpush1.bf16.msra.mxu0 %v7421_v60  ;;  %971 = vmatpush1.bf16.msra.mxu1 %v7423_v61  ;;  %v183_v48 = vld [vmem:[#allocation5 + $0x260] sm:$0xff]  ;;  %v184_v51 = vld [vmem:[#allocation5 + $0x268] sm:$0xff]  ;;  %v7449_v39 = vcombine.low %v141_v26, %v145_v27  ;;  %v125_v42 = vld [vmem:[#allocation5 + $0x90] sm:$0xff] }
  0x6e   :  { %931 = vmatprep.subr.bf16.mxu0 %v7414_v62  ;;  %972 = vmatprep.subr.bf16.mxu1 %v7416_v63  ;;  %v7486_v54 = vcombine.high %v179_v47, %v183_v48  ;;  %v171_v55 = vld [vmem:[#allocation5 + $0x200] sm:$0xff]  ;;  %v7488_v58 = vcombine.high %v180_v50, %v184_v51  ;;  %v172_v59 = vld [vmem:[#allocation5 + $0x208] sm:$0xff]  ;;  %v7485_v61 = vcombine.low %v179_v47, %v183_v48  ;;  %v117_v47 = vld [vmem:[#allocation5 + $0x50] sm:$0xff] }
  0x6f   :  { %v175_v56 = vld [vmem:[#allocation5 + $0x220] sm:$0xff]  ;;  %v176_v60 = vld [vmem:[#allocation5 + $0x228] sm:$0xff]  ;;  %v7487_v62 = vcombine.low %v180_v50, %v184_v51  ;;  %v121_v48 = vld [vmem:[#allocation5 + $0x70] sm:$0xff] }
  0x70   :  { %v7478_v63 = vcombine.high %v171_v55, %v175_v56  ;;  %v7480_v2 = vcombine.high %v172_v59, %v176_v60  ;;  %v118_v51 = vld [vmem:[#allocation5 + $0x58] sm:$0xff]  ;;  %v209_v26 = vld [vmem:[#allocation5 + $0x330] sm:$0xff] }
  0x71   :  { %932 = vmatpush1.bf16.msra.mxu0 %v7413_v4  ;;  %973 = vmatpush1.bf16.msra.mxu1 %v7415_v5  ;;  %v170_v4 = vld [vmem:[#allocation5 + $0x1f8] sm:$0xff]  ;;  %v7477_v5 = vcombine.low %v171_v55, %v175_v56  ;;  %v109_v55 = vld [vmem:[#allocation5 + $0x10] sm:$0xff] }
  0x72   :  { %933 = vmatprep.subr.bf16.mxu0 %v7534_v6  ;;  %974 = vmatprep.subr.bf16.mxu1 %v7536_v7  ;;  %v103_v6 = vld [vmem:[#allocation2] sm:$0xff]  ;;  %v7479_v7 = vcombine.low %v172_v59, %v176_v60  ;;  %v7476_v11 = vcombine.high %v166_v3, %v170_v4  ;;  %v7475_v16 = vcombine.low %v166_v3, %v170_v4  ;;  %v110_v60 = vld [vmem:[#allocation5 + $0x18] sm:$0xff] }
  0x73   :  { %v113_v56 = vld [vmem:[#allocation5 + $0x30] sm:$0xff]  ;;  %v7426_v59 = vcombine.high %v117_v47, %v121_v48  ;;  %v230_v4 = vld [vmem:[#allocation5 + $0x3d8] sm:$0xff] }
  0x74   :  { %v7418_v3 = vcombine.high %v109_v55, %v113_v56 }
  0x75   :  { %934 = vmatpush2.bf16.msra.mxu0 %v7533_v12  ;;  %975 = vmatpush2.bf16.msra.mxu1 %v7535_v13  ;;  %v158_v12 = vld [vmem:[#allocation5 + $0x198] sm:$0xff]  ;;  %v9507_v13 = vpack.c.bf16 %v103_v6, %v103_v6 }
  0x76   :  { %935 = vmatprep.subr.bf16.mxu0 %v7526_v14  ;;  %976 = vmatprep.subr.bf16.mxu1 %v7528_v15  ;;  %v162_v14 = vld [vmem:[#allocation5 + $0x1b8] sm:$0xff]  ;;  %v7473_v15 = vcombine.low %v165_v0, %v169_v1  ;;  %v229_v0 = vld [vmem:[#allocation5 + $0x3d0] sm:$0xff] }
  0x77   :  { %v7467_v24 = vcombine.low %v158_v12, %v162_v14  ;;  %v233_v1 = vld [vmem:[#allocation5 + $0x3f0] sm:$0xff] }
  0x79   :  { %936 = vmatpush2.bf16.msra.mxu0 %v7525_v20  ;;  %977 = vmatpush2.bf16.msra.mxu1 %v7527_v21  ;;  %v7468_v20 = vcombine.high %v158_v12, %v162_v14  ;;  %v150_v21 = vld [vmem:[#allocation5 + $0x158] sm:$0xff] }
  0x7a   :  { %937 = vmatprep.subr.bf16.mxu0 %v7518_v22  ;;  %978 = vmatprep.subr.bf16.mxu1 %v7520_v23  ;;  %v154_v22 = vld [vmem:[#allocation5 + $0x178] sm:$0xff]  ;;  %v7465_v23 = vcombine.low %v157_v9, %v161_v10  ;;  %v225_v9 = vld [vmem:[#allocation5 + $0x3b0] sm:$0xff] }
  0x7b   :  { %v7459_v32 = vcombine.low %v150_v21, %v154_v22  ;;  %v222_v12 = vld [vmem:[#allocation5 + $0x398] sm:$0xff] }
  0x7c   :  { %v226_v14 = vld [vmem:[#allocation5 + $0x3b8] sm:$0xff] }
  0x7d   :  { %938 = vmatpush2.bf16.msra.mxu0 %v7517_v28  ;;  %979 = vmatpush2.bf16.msra.mxu1 %v7519_v29  ;;  %v7460_v28 = vcombine.high %v150_v21, %v154_v22  ;;  %v142_v29 = vld [vmem:[#allocation5 + $0x118] sm:$0xff]  ;;  %v7531_v27 = vcombine.low %v222_v12, %v226_v14 }
  0x7e   :  { %939 = vmatprep.subr.bf16.mxu0 %v7510_v30  ;;  %980 = vmatprep.subr.bf16.mxu1 %v7512_v31  ;;  %v146_v30 = vld [vmem:[#allocation5 + $0x138] sm:$0xff]  ;;  %v7457_v31 = vcombine.low %v149_v18, %v153_v19  ;;  %v217_v18 = vld [vmem:[#allocation5 + $0x370] sm:$0xff] }
  0x7f   :  { %v7451_v40 = vcombine.low %v142_v29, %v146_v30  ;;  %v214_v21 = vld [vmem:[#allocation5 + $0x358] sm:$0xff] }
  0x80   :  { %v218_v22 = vld [vmem:[#allocation5 + $0x378] sm:$0xff] }
  0x81   :  { %940 = vmatpush2.bf16.msra.mxu0 %v7509_v36  ;;  %981 = vmatpush2.bf16.msra.mxu1 %v7511_v37  ;;  %v7452_v36 = vcombine.high %v142_v29, %v146_v30  ;;  %v134_v37 = vld [vmem:[#allocation5 + $0xd8] sm:$0xff] }
  0x82   :  { %941 = vmatprep.subr.bf16.mxu0 %v7502_v38  ;;  %982 = vmatprep.subr.bf16.mxu1 %v7504_v41  ;;  %v138_v38 = vld [vmem:[#allocation5 + $0xf8] sm:$0xff]  ;;  %v7442_v41 = vcombine.high %v133_v34, %v137_v35 }
  0x83   :  { %v7444_v43 = vcombine.high %v134_v37, %v138_v38  ;;  %v206_v29 = vld [vmem:[#allocation5 + $0x318] sm:$0xff] }
  0x84   :  { %v210_v30 = vld [vmem:[#allocation5 + $0x338] sm:$0xff] }
  0x85   :  { %942 = vmatpush2.bf16.msra.mxu0 %v7501_v44  ;;  %983 = vmatpush2.bf16.msra.mxu1 %v7503_v45  ;;  %v126_v44 = vld [vmem:[#allocation5 + $0x98] sm:$0xff] }
  0x86   :  { %943 = vmatprep.subr.bf16.mxu0 %v7494_v46  ;;  %984 = vmatprep.subr.bf16.mxu1 %v7496_v49  ;;  %v130_v45 = vld [vmem:[#allocation5 + $0xb8] sm:$0xff]  ;;  %v7441_v46 = vcombine.low %v133_v34, %v137_v35  ;;  %v7443_v49 = vcombine.low %v134_v37, %v138_v38  ;;  %v201_v34 = vld [vmem:[#allocation5 + $0x2f0] sm:$0xff]  ;;  %v7523_v35 = vcombine.low %v214_v21, %v218_v22 }
  0x87   :  { %v198_v37 = vld [vmem:[#allocation5 + $0x2d8] sm:$0xff] }
  0x88   :  { %v202_v38 = vld [vmem:[#allocation5 + $0x2f8] sm:$0xff] }
  0x89   :  { %944 = vmatpush2.bf16.msra.mxu0 %v7493_v52  ;;  %985 = vmatpush2.bf16.msra.mxu1 %v7495_v53  ;;  %v122_v52 = vld [vmem:[#allocation5 + $0x78] sm:$0xff]  ;;  %v7436_v53 = vcombine.high %v126_v44, %v130_v45 }
  0x8a   :  { %945 = vmatprep.subr.bf16.mxu0 %v7486_v54  ;;  %986 = vmatprep.subr.bf16.mxu1 %v7488_v58  ;;  %v7435_v58 = vcombine.low %v126_v44, %v130_v45  ;;  %v190_v44 = vld [vmem:[#allocation5 + $0x298] sm:$0xff] }
  0x8b   :  { %v194_v45 = vld [vmem:[#allocation5 + $0x2b8] sm:$0xff] }
  0x8d   :  { %946 = vmatpush2.bf16.msra.mxu0 %v7485_v61  ;;  %987 = vmatpush2.bf16.msra.mxu1 %v7487_v62  ;;  %v114_v61 = vld [vmem:[#allocation5 + $0x38] sm:$0xff]  ;;  %v7428_v62 = vcombine.high %v118_v51, %v122_v52 }
  0x8e   :  { %947 = vmatprep.subr.bf16.mxu0 %v7478_v63  ;;  %988 = vmatprep.subr.bf16.mxu1 %v7480_v2  ;;  %v7425_v63 = vcombine.low %v117_v47, %v121_v48  ;;  %v7427_v2 = vcombine.low %v118_v51, %v122_v52  ;;  %v7420_v6 = vcombine.high %v110_v60, %v114_v61  ;;  %v181_v48 = vld [vmem:[#allocation5 + $0x250] sm:$0xff]  ;;  %v182_v52 = vld [vmem:[#allocation5 + $0x258] sm:$0xff] }
  0x8f   :  { %v7419_v10 = vcombine.low %v110_v60, %v114_v61  ;;  %v174_v61 = vld [vmem:[#allocation5 + $0x218] sm:$0xff] }
  0x91   :  { %948 = vmatpush2.bf16.msra.mxu0 %v7477_v5  ;;  %989 = vmatpush2.bf16.msra.mxu1 %v7479_v7  ;;  %v234_v5 = vld [vmem:[#allocation5 + $0x3f8] sm:$0xff]  ;;  %v7417_v7 = vcombine.low %v109_v55, %v113_v56  ;;  %v173_v56 = vld [vmem:[#allocation5 + $0x210] sm:$0xff] }
  0x92   :  { %999 = vmatprep.subr.bf16.mxu0 %v7474_v8  ;;  %1040 = vmatprep.subr.bf16.mxu1 %v7476_v11  ;;  %v221_v8 = vld [vmem:[#allocation5 + $0x390] sm:$0xff]  ;;  %v7538_v11 = vcombine.high %v229_v0, %v233_v1  ;;  %v7539_v19 = vcombine.low %v230_v4, %v234_v5 }
  0x94   :  { %950 = vmatmul.mubr.bf16.vlgmr.msra.gmra.mxu0 %v9507_v13  ;;  %991 = vmatmul.mubr.bf16.vlgmr.msra.gmra.mxu1 %v9507_v13 }
  0x95   :  { %1000 = vmatpush1.bf16.msra.mxu0 %v7473_v15  ;;  %1041 = vmatpush1.bf16.msra.mxu1 %v7475_v16  ;;  %v7540_v15 = vcombine.high %v230_v4, %v234_v5  ;;  %v7537_v16 = vcombine.low %v229_v0, %v233_v1  ;;  %v8460_v4 = vld [vmem:[#allocation7 + $0xe4] ss:$16 sps:$4 sm:$0xff]  }
  0x96   :  { %1001 = vmatprep.subr.bf16.mxu0 %v7466_v17  ;;  %1042 = vmatprep.subr.bf16.mxu1 %v7468_v20  ;;  %v213_v17 = vld [vmem:[#allocation5 + $0x350] sm:$0xff]  ;;  %v7530_v20 = vcombine.high %v221_v8, %v225_v9 }
  0x97   :  { %1031 = vmatprep.mubr.bf16.mxu0 %v9503_v57  ;;  %1072 = vmatprep.mubr.bf16.mxu1 %v9503_v57  ;;  %v129_v57 = vld [vmem:[#allocation5 + $0xb0] sm:$0xff] }
  0x98   :  { %v7434_v50 = vcombine.high %v125_v42, %v129_v57  ;;  %v7433_v54 = vcombine.low %v125_v42, %v129_v57  ;;  %v193_v42 = vld [vmem:[#allocation5 + $0x2b0] sm:$0xff]  ;;  %v7515_v57 = vcombine.low %v206_v29, %v210_v30 }
  0x99   :  { %1002 = vmatpush1.bf16.msra.mxu0 %v7465_v23  ;;  %1043 = vmatpush1.bf16.msra.mxu1 %v7467_v24  ;;  %v7532_v23 = vcombine.high %v222_v12, %v226_v14  ;;  %v7529_v24 = vcombine.low %v221_v8, %v225_v9  ;;  %v8458_v8 = vld [vmem:[#allocation7 + $0xe0] ss:$16 sps:$4 sm:$0xff]  }
  0x9a   :  { %1003 = vmatprep.subr.bf16.mxu0 %v7458_v25  ;;  %1044 = vmatprep.subr.bf16.mxu1 %v7460_v28  ;;  %v205_v25 = vld [vmem:[#allocation5 + $0x310] sm:$0xff]  ;;  %v7522_v28 = vcombine.high %v213_v17, %v217_v18 }
  0x9b   :  { %v8461_v9 = vld [vmem:[#allocation7 + $0x2e0] ss:$16 sps:$4 sm:$0xff]  }
  0x9c   :  { %v8464_v12 = vld [vmem:[#allocation7 + $0xc0] ss:$16 sps:$4 sm:$0xff]  }
  0x9d   :  { %1004 = vmatpush1.bf16.msra.mxu0 %v7457_v31  ;;  %1045 = vmatpush1.bf16.msra.mxu1 %v7459_v32  ;;  %v7524_v31 = vcombine.high %v214_v21, %v218_v22  ;;  %v7521_v32 = vcombine.low %v213_v17, %v217_v18  ;;  %v8467_v14 = vld [vmem:[#allocation7 + $0x2c0] ss:$16 sps:$4 sm:$0xff]  }
  0x9e   :  { %1005 = vmatprep.subr.bf16.mxu0 %v7450_v33  ;;  %1046 = vmatprep.subr.bf16.mxu1 %v7452_v36  ;;  %v197_v33 = vld [vmem:[#allocation5 + $0x2d0] sm:$0xff]  ;;  %v7514_v36 = vcombine.high %v205_v25, %v209_v26 }
  0x9f   :  { %v7505_v47 = vcombine.low %v197_v33, %v201_v34  ;;  %v8470_v17 = vld [vmem:[#allocation7 + $0xa0] ss:$16 sps:$4 sm:$0xff]  }
  0xa0   :  { %v8473_v18 = vld [vmem:[#allocation7 + $0x2a0] ss:$16 sps:$4 sm:$0xff]  }
  0xa1   :  { %1006 = vmatpush1.bf16.msra.mxu0 %v7449_v39  ;;  %1047 = vmatpush1.bf16.msra.mxu1 %v7451_v40  ;;  %v7516_v39 = vcombine.high %v206_v29, %v210_v30  ;;  %v7513_v40 = vcombine.low %v205_v25, %v209_v26  ;;  %v8476_v21 = vld [vmem:[#allocation7 + $0x80] ss:$16 sps:$4 sm:$0xff]   ;;  %v8490_v26 = vld [vmem:[#allocation7 + $0x44] ss:$16 sps:$4 sm:$0xff]  }
  0xa2   :  { %1007 = vmatprep.subr.bf16.mxu0 %v7442_v41  ;;  %1048 = vmatprep.subr.bf16.mxu1 %v7444_v43  ;;  %v189_v41 = vld [vmem:[#allocation5 + $0x290] sm:$0xff]  ;;  %v7506_v43 = vcombine.high %v197_v33, %v201_v34 }
  0xa3   :  { %v7498_v51 = vcombine.high %v189_v41, %v193_v42  ;;  %v7497_v55 = vcombine.low %v189_v41, %v193_v42  ;;  %v8479_v22 = vld [vmem:[#allocation7 + $0x280] ss:$16 sps:$4 sm:$0xff]   ;;  %v8496_v30 = vld [vmem:[#allocation7 + $0x24] ss:$16 sps:$4 sm:$0xff]  }
  0xa4   :  { %v8485_v25 = vld [vmem:[#allocation7 + $0x260] ss:$16 sps:$4 sm:$0xff]   ;;  %v8502_v34 = vld [vmem:[#allocation7 + $0x4] ss:$16 sps:$4 sm:$0xff]  }
  0xa5   :  { %1008 = vmatpush1.bf16.msra.mxu0 %v7441_v46  ;;  %1049 = vmatpush1.bf16.msra.mxu1 %v7443_v49  ;;  %v7508_v46 = vcombine.high %v198_v37, %v202_v38  ;;  %v185_v49 = vld [vmem:[#allocation5 + $0x270] sm:$0xff] }
  0xa6   :  { %1009 = vmatprep.subr.bf16.mxu0 %v7434_v50  ;;  %1050 = vmatprep.subr.bf16.mxu1 %v7436_v53  ;;  %v7507_v50 = vcombine.low %v198_v37, %v202_v38  ;;  %v186_v53 = vld [vmem:[#allocation5 + $0x278] sm:$0xff]  ;;  %v7490_v60 = vcombine.high %v181_v48, %v185_v49  ;;  %v7489_v0 = vcombine.low %v181_v48, %v185_v49  ;;  %v8491_v29 = vld [vmem:[#allocation7 + $0x240] ss:$16 sps:$4 sm:$0xff]   ;;  %v8508_v38 = vld [vmem:[#allocation7 + $0x1e4] ss:$16 sps:$4 sm:$0xff]  }
  0xa7   :  { %v7491_v1 = vcombine.low %v182_v52, %v186_v53  ;;  %v8497_v33 = vld [vmem:[#allocation7 + $0x220] ss:$16 sps:$4 sm:$0xff]   ;;  %v8514_v42 = vld [vmem:[#allocation7 + $0x1c4] ss:$16 sps:$4 sm:$0xff]  }
  0xa8   :  { %v8503_v37 = vld [vmem:[#allocation7 + $0x200] ss:$16 sps:$4 sm:$0xff]   ;;  %v8526_v49 = vld [vmem:[#allocation7 + $0x184] ss:$16 sps:$4 sm:$0xff]  }
  0xa9   :  { %1010 = vmatpush1.bf16.msra.mxu0 %v7433_v54  ;;  %1051 = vmatpush1.bf16.msra.mxu1 %v7435_v58  ;;  %v7500_v54 = vcombine.high %v190_v44, %v194_v45  ;;  %v177_v58 = vld [vmem:[#allocation5 + $0x230] sm:$0xff] }
  0xaa   :  { %1011 = vmatprep.subr.bf16.mxu0 %v7426_v59  ;;  %1052 = vmatprep.subr.bf16.mxu1 %v7428_v62  ;;  %v7499_v59 = vcombine.low %v190_v44, %v194_v45  ;;  %v178_v62 = vld [vmem:[#allocation5 + $0x238] sm:$0xff]  ;;  %v7481_v5 = vcombine.low %v173_v56, %v177_v58  ;;  %v8509_v41 = vld [vmem:[#allocation7 + $0x3e0] ss:$16 sps:$4 sm:$0xff]   ;;  %v8520_v45 = vld [vmem:[#allocation7 + $0x1a4] ss:$16 sps:$4 sm:$0xff]  }
  0xab   :  { %v8515_v44 = vld [vmem:[#allocation7 + $0x3c0] ss:$16 sps:$4 sm:$0xff]  }
  0xac   :  { %v8521_v48 = vld [vmem:[#allocation7 + $0x3a0] ss:$16 sps:$4 sm:$0xff]  }
  0xad   :  { %1012 = vmatpush1.bf16.msra.mxu0 %v7425_v63  ;;  %1053 = vmatpush1.bf16.msra.mxu1 %v7427_v2  ;;  %v7492_v63 = vcombine.high %v182_v52, %v186_v53  ;;  %v7482_v2 = vcombine.high %v173_v56, %v177_v58  ;;  %v8527_v52 = vld [vmem:[#allocation7 + $0x380] ss:$16 sps:$4 sm:$0xff]   ;;  %v8532_v53 = vld [vmem:[#allocation7 + $0x164] ss:$16 sps:$4 sm:$0xff]  }
  0xae   :  { %1013 = vmatprep.subr.bf16.mxu0 %v7418_v3  ;;  %1054 = vmatprep.subr.bf16.mxu1 %v7420_v6  ;;  %v7484_v3 = vcombine.high %v174_v61, %v178_v62  ;;  %v8463_v6 = vld [vmem:[#allocation7 + $0x2e4] ss:$16 sps:$4 sm:$0xff]   ;;  %v8533_v56 = vld [vmem:[#allocation7 + $0x360] ss:$16 sps:$4 sm:$0xff]  }
  0xaf   :  { %v8538_v58 = vld [vmem:[#allocation7 + $0x144] ss:$16 sps:$4 sm:$0xff]  }
  0xb1   :  { %1014 = vmatpush1.bf16.msra.mxu0 %v7417_v7  ;;  %1055 = vmatpush1.bf16.msra.mxu1 %v7419_v10  ;;  %v7483_v7 = vcombine.low %v174_v61, %v178_v62  ;;  %v8466_v10 = vld [vmem:[#allocation7 + $0xc4] ss:$16 sps:$4 sm:$0xff]   ;;  %v8539_v61 = vld [vmem:[#allocation7 + $0x340] ss:$16 sps:$4 sm:$0xff]  }
  0xb2   :  { %1015 = vmatprep.subr.bf16.mxu0 %v7538_v11  ;;  %1056 = vmatprep.subr.bf16.mxu1 %v7540_v15  ;;  %v8469_v11 = vld [vmem:[#allocation7 + $0x2c4] ss:$16 sps:$4 sm:$0xff]  }
  0xb3   :  { %v8472_v15 = vld [vmem:[#allocation7 + $0xa4] ss:$16 sps:$4 sm:$0xff]  }
  0xb4   :  { %v8544_v62 = vld [vmem:[#allocation7 + $0x124] ss:$16 sps:$4 sm:$0xff]  }
  0xb5   :  { %1016 = vmatpush2.bf16.msra.mxu0 %v7537_v16  ;;  %1057 = vmatpush2.bf16.msra.mxu1 %v7539_v19  ;;  %v8475_v16 = vld [vmem:[#allocation7 + $0x2a4] ss:$16 sps:$4 sm:$0xff]  }
  0xb6   :  { %1017 = vmatprep.subr.bf16.mxu0 %v7530_v20  ;;  %1058 = vmatprep.subr.bf16.mxu1 %v7532_v23  ;;  %v8478_v19 = vld [vmem:[#allocation7 + $0x84] ss:$16 sps:$4 sm:$0xff]  }
  0xb7   :  { %v8481_v20 = vld [vmem:[#allocation7 + $0x284] ss:$16 sps:$4 sm:$0xff]  }
  0xb8   :  { %v8484_v23 = vld [vmem:[#allocation7 + $0x64] ss:$16 sps:$4 sm:$0xff]  }
  0xb9   :  { %1018 = vmatpush2.bf16.msra.mxu0 %v7529_v24  ;;  %1059 = vmatpush2.bf16.msra.mxu1 %v7531_v27  ;;  %v8487_v24 = vld [vmem:[#allocation7 + $0x264] ss:$16 sps:$4 sm:$0xff]  }
  0xba   :  { %1019 = vmatprep.subr.bf16.mxu0 %v7522_v28  ;;  %1060 = vmatprep.subr.bf16.mxu1 %v7524_v31  ;;  %v8493_v27 = vld [vmem:[#allocation7 + $0x244] ss:$16 sps:$4 sm:$0xff]   ;;  %v8488_v28 = vld [vmem:[#allocation7 + $0x40] ss:$16 sps:$4 sm:$0xff]  }
  0xbb   :  { %v8499_v31 = vld [vmem:[#allocation7 + $0x224] ss:$16 sps:$4 sm:$0xff]  }
  0xbd   :  { %1020 = vmatpush2.bf16.msra.mxu0 %v7521_v32  ;;  %1061 = vmatpush2.bf16.msra.mxu1 %v7523_v35  ;;  %v8494_v32 = vld [vmem:[#allocation7 + $0x20] ss:$16 sps:$4 sm:$0xff]   ;;  %v8505_v35 = vld [vmem:[#allocation7 + $0x204] ss:$16 sps:$4 sm:$0xff]  }
  0xbe   :  { %1021 = vmatprep.subr.bf16.mxu0 %v7514_v36  ;;  %1062 = vmatprep.subr.bf16.mxu1 %v7516_v39  ;;  %v8500_v36 = vld [vmem:[#allocation7] ss:$16 sps:$4 sm:$0xff]   ;;  %v8511_v39 = vld [vmem:[#allocation7 + $0x3e4] ss:$16 sps:$4 sm:$0xff]  }
  0xc1   :  { %1022 = vmatpush2.bf16.msra.mxu0 %v7513_v40  ;;  %1063 = vmatpush2.bf16.msra.mxu1 %v7515_v57  ;;  %v8506_v40 = vld [vmem:[#allocation7 + $0x1e0] ss:$16 sps:$4 sm:$0xff]   ;;  %v8517_v57 = vld [vmem:[#allocation7 + $0x3c4] ss:$16 sps:$4 sm:$0xff]  }
  0xc2   :  { %1023 = vmatprep.subr.bf16.mxu0 %v7506_v43  ;;  %1064 = vmatprep.subr.bf16.mxu1 %v7508_v46  ;;  %v8512_v43 = vld [vmem:[#allocation7 + $0x1c0] ss:$16 sps:$4 sm:$0xff]   ;;  %v8523_v46 = vld [vmem:[#allocation7 + $0x3a4] ss:$16 sps:$4 sm:$0xff]  }
  0xc5   :  { %1024 = vmatpush2.bf16.msra.mxu0 %v7505_v47  ;;  %1065 = vmatpush2.bf16.msra.mxu1 %v7507_v50  ;;  %v8518_v47 = vld [vmem:[#allocation7 + $0x1a0] ss:$16 sps:$4 sm:$0xff]   ;;  %v8529_v50 = vld [vmem:[#allocation7 + $0x384] ss:$16 sps:$4 sm:$0xff]  }
  0xc6   :  { %1025 = vmatprep.subr.bf16.mxu0 %v7498_v51  ;;  %1066 = vmatprep.subr.bf16.mxu1 %v7500_v54  ;;  %v8524_v51 = vld [vmem:[#allocation7 + $0x180] ss:$16 sps:$4 sm:$0xff]   ;;  %v8535_v54 = vld [vmem:[#allocation7 + $0x364] ss:$16 sps:$4 sm:$0xff]  }
  0xc9   :  { %1026 = vmatpush2.bf16.msra.mxu0 %v7497_v55  ;;  %1067 = vmatpush2.bf16.msra.mxu1 %v7499_v59  ;;  %v8530_v55 = vld [vmem:[#allocation7 + $0x160] ss:$16 sps:$4 sm:$0xff]   ;;  %v8541_v59 = vld [vmem:[#allocation7 + $0x344] ss:$16 sps:$4 sm:$0xff]  }
  0xca   :  { %1027 = vmatprep.subr.bf16.mxu0 %v7490_v60  ;;  %1068 = vmatprep.subr.bf16.mxu1 %v7492_v63  ;;  %v8536_v60 = vld [vmem:[#allocation7 + $0x140] ss:$16 sps:$4 sm:$0xff]   ;;  %v8547_v63 = vld [vmem:[#allocation7 + $0x324] ss:$16 sps:$4 sm:$0xff]  }
  0xcd   :  { %1028 = vmatpush2.bf16.msra.mxu0 %v7489_v0  ;;  %1069 = vmatpush2.bf16.msra.mxu1 %v7491_v1  ;;  %v8542_v0 = vld [vmem:[#allocation7 + $0x120] ss:$16 sps:$4 sm:$0xff]  }
  0xce   :  { %1029 = vmatprep.subr.bf16.mxu0 %v7482_v2  ;;  %1070 = vmatprep.subr.bf16.mxu1 %v7484_v3  ;;  %v8545_v1 = vld [vmem:[#allocation7 + $0x320] ss:$16 sps:$4 sm:$0xff]   ;;  %v8550_v2 = vld [vmem:[#allocation7 + $0x104] ss:$16 sps:$4 sm:$0xff]  }
  0xcf   :  { %v8553_v3 = vld [vmem:[#allocation7 + $0x304] ss:$16 sps:$4 sm:$0xff]  }
  0xd1   :  { %1030 = vmatpush2.bf16.msra.mxu0 %v7481_v5  ;;  %1071 = vmatpush2.bf16.msra.mxu1 %v7483_v7  ;;  %v8551_v5 = vld [vmem:[#allocation7 + $0x300] ss:$16 sps:$4 sm:$0xff]   ;;  %v8559_v7 = vld [vmem:[#allocation7 + $0x6e4] ss:$16 sps:$4 sm:$0xff]  }
  0xd2   :  { %2655 = vmatprep.subr.bf16.mxu0 %v8460_v4  ;;  %2696 = vmatprep.subr.bf16.mxu1 %v8463_v6  ;;  %v8548_v4 = vld [vmem:[#allocation7 + $0x100] ss:$16 sps:$4 sm:$0xff]   ;;  %v8556_v6 = vld [vmem:[#allocation7 + $0x4e4] ss:$16 sps:$4 sm:$0xff]  }
  0xd4   :  { %1032 = vmatmul.mubr.bf16.vlgmr.msra.gmra.mxu0 %v9507_v13  ;;  %1073 = vmatmul.mubr.bf16.vlgmr.msra.gmra.mxu1 %v9507_v13  ;;  %v8482_v13 = vld [vmem:[#allocation7 + $0x60] ss:$16 sps:$4 sm:$0xff]  }
  0xd5   :  { %2656 = vmatpush1.bf16.msra.mxu0 %v8458_v8  ;;  %2697 = vmatpush1.bf16.msra.mxu1 %v8461_v9  ;;  %v237_v8 = vlaneseq }
  0xd6   :  { %2657 = vmatprep.subr.bf16.mxu0 %v8466_v10  ;;  %2698 = vmatprep.subr.bf16.mxu1 %v8469_v11  ;;  %v9517_v10 = vld [vmem:[#allocation11] sm:$0xff] }
  0xd7   :  { %v9515_v9 = vshrl.u32 %v237_v8, 7  ;;  %v8605_v8 = vld [vmem:[#allocation7 + $0x7e0] ss:$16 sps:$4 sm:$0xff]  }
  0xd9   :  { %2658 = vmatpush1.bf16.msra.mxu0 %v8464_v12  ;;  %2699 = vmatpush1.bf16.msra.mxu1 %v8467_v14  ;;  %v9520_v11 = vsub.s32 0, %v9515_v9  ;;  %v9523_v12 = vsub.s32 2, %v9515_v9  ;;  %v9526_v14 = vsub.s32 1, %v9515_v9 }
  0xda   :  { %2659 = vmatprep.subr.bf16.mxu0 %v8472_v15  ;;  %2700 = vmatprep.subr.bf16.mxu1 %v8475_v16  ;;  %v9529_v15 = vsub.s32 3, %v9515_v9 }
  0xdb   :  { %v240_v16 = vrot.slane %v9517_v10, %v9520_v11 }
  0xdd   :  { %2660 = vmatpush1.bf16.msra.mxu0 %v8470_v17  ;;  %2701 = vmatpush1.bf16.msra.mxu1 %v8473_v18  ;;  %v248_v17 = vrot.slane %v9517_v10, %v9523_v12  ;;  %v244_v18 = vrot.slane %v9517_v10, %v9526_v14 }
  0xde   :  { %2661 = vmatprep.subr.bf16.mxu0 %v8478_v19  ;;  %2702 = vmatprep.subr.bf16.mxu1 %v8481_v20  ;;  %v252_v20 = vrot.slane %v9517_v10, %v9529_v15 }
  0xe1   :  { %2662 = vmatpush1.bf16.msra.mxu0 %v8476_v21  ;;  %2703 = vmatpush1.bf16.msra.mxu1 %v8479_v22 }
  0xe2   :  { %2663 = vmatprep.subr.bf16.mxu0 %v8484_v23  ;;  %2704 = vmatprep.subr.bf16.mxu1 %v8487_v24 }
  0xe5   :  { %2664 = vmatpush1.bf16.msra.mxu0 %v8482_v13  ;;  %2705 = vmatpush1.bf16.msra.mxu1 %v8485_v25 }
  0xe6   :  { %2665 = vmatprep.subr.bf16.mxu0 %v8490_v26  ;;  %2706 = vmatprep.subr.bf16.mxu1 %v8493_v27 }
  0xe9   :  { %2666 = vmatpush1.bf16.msra.mxu0 %v8488_v28  ;;  %2707 = vmatpush1.bf16.msra.mxu1 %v8491_v29 }
  0xea   :  { %2667 = vmatprep.subr.bf16.mxu0 %v8496_v30  ;;  %2708 = vmatprep.subr.bf16.mxu1 %v8499_v31 }
  0xed   :  { %2668 = vmatpush1.bf16.msra.mxu0 %v8494_v32  ;;  %2709 = vmatpush1.bf16.msra.mxu1 %v8497_v33  ;;  %v8554_v32 = vld [vmem:[#allocation7 + $0x4e0] ss:$16 sps:$4 sm:$0xff]  }
  0xee   :  { %2669 = vmatprep.subr.bf16.mxu0 %v8502_v34  ;;  %2710 = vmatprep.subr.bf16.mxu1 %v8505_v35  ;;  %v8557_v35 = vld [vmem:[#allocation7 + $0x6e0] ss:$16 sps:$4 sm:$0xff]  }
  0xf1   :  { %2670 = vmatpush1.bf16.msra.mxu0 %v8500_v36  ;;  %2711 = vmatpush1.bf16.msra.mxu1 %v8503_v37  ;;  %v8562_v36 = vld [vmem:[#allocation7 + $0x4c4] ss:$16 sps:$4 sm:$0xff]  }
  0xf2   :  { %2671 = vmatprep.subr.bf16.mxu0 %v8508_v38  ;;  %2712 = vmatprep.subr.bf16.mxu1 %v8511_v39 }
  0xf5   :  { %2672 = vmatpush2.bf16.msra.mxu0 %v8506_v40  ;;  %2713 = vmatpush2.bf16.msra.mxu1 %v8509_v41 }
  0xf6   :  { %2673 = vmatprep.subr.bf16.mxu0 %v8514_v42  ;;  %2714 = vmatprep.subr.bf16.mxu1 %v8517_v57  ;;  %v8560_v42 = vld [vmem:[#allocation7 + $0x4c0] ss:$16 sps:$4 sm:$0xff]   ;;  %v8565_v57 = vld [vmem:[#allocation7 + $0x6c4] ss:$16 sps:$4 sm:$0xff]  }
  0xf9   :  { %2674 = vmatpush2.bf16.msra.mxu0 %v8512_v43  ;;  %2715 = vmatpush2.bf16.msra.mxu1 %v8515_v44  ;;  %v8563_v43 = vld [vmem:[#allocation7 + $0x6c0] ss:$16 sps:$4 sm:$0xff]   ;;  %v8568_v44 = vld [vmem:[#allocation7 + $0x4a4] ss:$16 sps:$4 sm:$0xff]  }
  0xfa   :  { %2675 = vmatprep.subr.bf16.mxu0 %v8520_v45  ;;  %2716 = vmatprep.subr.bf16.mxu1 %v8523_v46  ;;  %v8571_v45 = vld [vmem:[#allocation7 + $0x6a4] ss:$16 sps:$4 sm:$0xff]   ;;  %v8566_v46 = vld [vmem:[#allocation7 + $0x4a0] ss:$16 sps:$4 sm:$0xff]  }
  0xfd   :  { %2676 = vmatpush2.bf16.msra.mxu0 %v8518_v47  ;;  %2717 = vmatpush2.bf16.msra.mxu1 %v8521_v48  ;;  %v8569_v47 = vld [vmem:[#allocation7 + $0x6a0] ss:$16 sps:$4 sm:$0xff]   ;;  %v8574_v48 = vld [vmem:[#allocation7 + $0x484] ss:$16 sps:$4 sm:$0xff]  }
  0xfe   :  { %2677 = vmatprep.subr.bf16.mxu0 %v8526_v49  ;;  %2718 = vmatprep.subr.bf16.mxu1 %v8529_v50  ;;  %v8572_v49 = vld [vmem:[#allocation7 + $0x480] ss:$16 sps:$4 sm:$0xff]   ;;  %v8577_v50 = vld [vmem:[#allocation7 + $0x684] ss:$16 sps:$4 sm:$0xff]  }
 0x101   :  { %2678 = vmatpush2.bf16.msra.mxu0 %v8524_v51  ;;  %2719 = vmatpush2.bf16.msra.mxu1 %v8527_v52  ;;  %v8575_v51 = vld [vmem:[#allocation7 + $0x680] ss:$16 sps:$4 sm:$0xff]   ;;  %v8580_v52 = vld [vmem:[#allocation7 + $0x464] ss:$16 sps:$4 sm:$0xff]  }
 0x102   :  { %2679 = vmatprep.subr.bf16.mxu0 %v8532_v53  ;;  %2720 = vmatprep.subr.bf16.mxu1 %v8535_v54  ;;  %v8578_v53 = vld [vmem:[#allocation7 + $0x460] ss:$16 sps:$4 sm:$0xff]   ;;  %v8583_v54 = vld [vmem:[#allocation7 + $0x664] ss:$16 sps:$4 sm:$0xff]  }
 0x105   :  { %2680 = vmatpush2.bf16.msra.mxu0 %v8530_v55  ;;  %2721 = vmatpush2.bf16.msra.mxu1 %v8533_v56  ;;  %v8581_v55 = vld [vmem:[#allocation7 + $0x660] ss:$16 sps:$4 sm:$0xff]   ;;  %v8586_v56 = vld [vmem:[#allocation7 + $0x444] ss:$16 sps:$4 sm:$0xff]  }
 0x106   :  { %2681 = vmatprep.subr.bf16.mxu0 %v8538_v58  ;;  %2722 = vmatprep.subr.bf16.mxu1 %v8541_v59  ;;  %v8584_v58 = vld [vmem:[#allocation7 + $0x440] ss:$16 sps:$4 sm:$0xff]   ;;  %v8589_v59 = vld [vmem:[#allocation7 + $0x644] ss:$16 sps:$4 sm:$0xff]  }
 0x109   :  { %2682 = vmatpush2.bf16.msra.mxu0 %v8536_v60  ;;  %2723 = vmatpush2.bf16.msra.mxu1 %v8539_v61  ;;  %v8587_v60 = vld [vmem:[#allocation7 + $0x640] ss:$16 sps:$4 sm:$0xff]   ;;  %v8592_v61 = vld [vmem:[#allocation7 + $0x424] ss:$16 sps:$4 sm:$0xff]  }
 0x10a   :  { %2683 = vmatprep.subr.bf16.mxu0 %v8544_v62  ;;  %2724 = vmatprep.subr.bf16.mxu1 %v8547_v63  ;;  %v8590_v62 = vld [vmem:[#allocation7 + $0x420] ss:$16 sps:$4 sm:$0xff]   ;;  %v8595_v63 = vld [vmem:[#allocation7 + $0x624] ss:$16 sps:$4 sm:$0xff]  }
 0x10d   :  { %2684 = vmatpush2.bf16.msra.mxu0 %v8542_v0  ;;  %2725 = vmatpush2.bf16.msra.mxu1 %v8545_v1  ;;  %v8593_v0 = vld [vmem:[#allocation7 + $0x620] ss:$16 sps:$4 sm:$0xff]   ;;  %v8598_v1 = vld [vmem:[#allocation7 + $0x404] ss:$16 sps:$4 sm:$0xff]  }
 0x10e   :  { %2685 = vmatprep.subr.bf16.mxu0 %v8550_v2  ;;  %2726 = vmatprep.subr.bf16.mxu1 %v8553_v3  ;;  %v8596_v2 = vld [vmem:[#allocation7 + $0x400] ss:$16 sps:$4 sm:$0xff]   ;;  %v8601_v3 = vld [vmem:[#allocation7 + $0x604] ss:$16 sps:$4 sm:$0xff]  }
 0x111   :  { %2686 = vmatpush2.bf16.msra.mxu0 %v8548_v4  ;;  %2727 = vmatpush2.bf16.msra.mxu1 %v8551_v5  ;;  %v8599_v4 = vld [vmem:[#allocation7 + $0x600] ss:$16 sps:$4 sm:$0xff]   ;;  %v8604_v5 = vld [vmem:[#allocation7 + $0x5e4] ss:$16 sps:$4 sm:$0xff]  }
 0x112   :  { %2737 = vmatprep.subr.bf16.mxu0 %v8556_v6  ;;  %2778 = vmatprep.subr.bf16.mxu1 %v8559_v7  ;;  %v8602_v6 = vld [vmem:[#allocation7 + $0x5e0] ss:$16 sps:$4 sm:$0xff]   ;;  %v8607_v7 = vld [vmem:[#allocation7 + $0x7e4] ss:$16 sps:$4 sm:$0xff]  }
 0x154   :  { %v951_v19 = vpop.f32.mrf.mxu0  ;;  %v992_v22 = vpop.f32.mrf.mxu1 }
 0x155   :  { %v952_v21 = vadd.f32 %v951_v19, %v240_v16  ;;  %v993_v23 = vadd.f32 %v992_v22, %v248_v17  ;;  %v8610_v16 = vld [vmem:[#allocation7 + $0x5c4] ss:$16 sps:$4 sm:$0xff]   ;;  %v8608_v17 = vld [vmem:[#allocation7 + $0x5c0] ss:$16 sps:$4 sm:$0xff]  }
 0x156   :  { %v953_v24 = vpop.f32.mrf.mxu0  ;;  %v994_v25 = vpop.f32.mrf.mxu1  ;;  %v8611_v19 = vld [vmem:[#allocation7 + $0x7c0] ss:$16 sps:$4 sm:$0xff]   ;;  %v8619_v22 = vld [vmem:[#allocation7 + $0x7a4] ss:$16 sps:$4 sm:$0xff]  }
 0x157   :  { %v954_v13 = vadd.f32 %v953_v24, %v244_v18  ;;  %v1081_v26 = vmax.f32 %v952_v21, 0.0  ;;  %v1083_v27 = vmax.f32 %v993_v23, 0.0  ;;  %v995_v28 = vadd.f32 %v994_v25, %v252_v20  ;;  %v8613_v18 = vld [vmem:[#allocation7 + $0x7c4] ss:$16 sps:$4 sm:$0xff]   ;;  %v8614_v21 = vld [vmem:[#allocation7 + $0x5a0] ss:$16 sps:$4 sm:$0xff]  }
 0x158   :  { %v955_v29 = vpop.f32.mrf.mxu0  ;;  %v996_v31 = vpop.f32.mrf.mxu1  ;;  %v8616_v20 = vld [vmem:[#allocation7 + $0x5a4] ss:$16 sps:$4 sm:$0xff]   ;;  %v8617_v23 = vld [vmem:[#allocation7 + $0x7a0] ss:$16 sps:$4 sm:$0xff]  }
 0x159   :  { %v1082_v30 = vmax.f32 %v954_v13, 0.0  ;;  %v1084_v33 = vmax.f32 %v995_v28, 0.0  ;;  %v9539_v37 = vpack.c.bf16 %v1083_v27, %v1083_v27  ;;  %v9543_v40 = vpack.c.bf16 %v1081_v26, %v1081_v26  ;;  %v8622_v24 = vld [vmem:[#allocation7 + $0x584] ss:$16 sps:$4 sm:$0xff]   ;;  %v8620_v13 = vld [vmem:[#allocation7 + $0x580] ss:$16 sps:$4 sm:$0xff]  }
 0x15a   :  { %v956_v34 = vpop.f32.mrf.mxu0  ;;  %v997_v39 = vpop.f32.mrf.mxu1  ;;  %v8625_v25 = vld [vmem:[#allocation7 + $0x784] ss:$16 sps:$4 sm:$0xff]   ;;  %v8623_v26 = vld [vmem:[#allocation7 + $0x780] ss:$16 sps:$4 sm:$0xff]  }
 0x15b   :  { %v9541_v38 = vpack.c.bf16 %v1082_v30, %v1082_v30  ;;  %v9545_v41 = vpack.c.bf16 %v1084_v33, %v1084_v33  ;;  %v8628_v27 = vld [vmem:[#allocation7 + $0x564] ss:$16 sps:$4 sm:$0xff]   ;;  %v8626_v28 = vld [vmem:[#allocation7 + $0x560] ss:$16 sps:$4 sm:$0xff]   ;;  %v255_v34 = vsub.s32 4, %v9515_v9  ;;  %v259_v39 = vsub.s32 5, %v9515_v9 }
 0x15c   :  { %v8631_v29 = vld [vmem:[#allocation7 + $0x764] ss:$16 sps:$4 sm:$0xff]   ;;  %v8629_v30 = vld [vmem:[#allocation7 + $0x760] ss:$16 sps:$4 sm:$0xff]  }
 0x15d   :  { %2687 = vmatprep.mubr.bf16.mxu0 %v9541_v38  ;;  %2728 = vmatprep.mubr.bf16.mxu1 %v9545_v41  ;;  %v8634_v31 = vld [vmem:[#allocation7 + $0x544] ss:$16 sps:$4 sm:$0xff]  }
 0x15e   :  { %2688 = vmatmul.mubr.bf16.vlgmr.msra.gmra.mxu0 %v9543_v40  ;;  %2729 = vmatmul.mubr.bf16.vlgmr.msra.gmra.mxu1 %v9539_v37  ;;  %v8637_v33 = vld [vmem:[#allocation7 + $0x744] ss:$16 sps:$4 sm:$0xff]  }
 0x15f   :  { %2738 = vmatpush1.bf16.msra.mxu0 %v8554_v32  ;;  %2779 = vmatpush1.bf16.msra.mxu1 %v8557_v35  ;;  %v8632_v32 = vld [vmem:[#allocation7 + $0x540] ss:$16 sps:$4 sm:$0xff]  }
 0x160   :  { %2739 = vmatprep.subr.bf16.mxu0 %v8562_v36  ;;  %2780 = vmatprep.subr.bf16.mxu1 %v8565_v57  ;;  %v8635_v35 = vld [vmem:[#allocation7 + $0x740] ss:$16 sps:$4 sm:$0xff]   ;;  %v263_v36 = vsub.s32 6, %v9515_v9  ;;  %v8643_v57 = vld [vmem:[#allocation7 + $0x724] ss:$16 sps:$4 sm:$0xff]  }
 0x163   :  { %2740 = vmatpush1.bf16.msra.mxu0 %v8560_v42  ;;  %2781 = vmatpush1.bf16.msra.mxu1 %v8563_v43  ;;  %v8640_v42 = vld [vmem:[#allocation7 + $0x524] ss:$16 sps:$4 sm:$0xff]   ;;  %v267_v43 = vsub.s32 7, %v9515_v9 }
 0x164   :  { %2741 = vmatprep.subr.bf16.mxu0 %v8568_v44  ;;  %2782 = vmatprep.subr.bf16.mxu1 %v8571_v45  ;;  %v256_v44 = vrot.slane %v9517_v10, %v255_v34  ;;  %v8638_v45 = vld [vmem:[#allocation7 + $0x520] ss:$16 sps:$4 sm:$0xff]  }
 0x167   :  { %2742 = vmatpush1.bf16.msra.mxu0 %v8566_v46  ;;  %2783 = vmatpush1.bf16.msra.mxu1 %v8569_v47  ;;  %v264_v46 = vrot.slane %v9517_v10, %v263_v36  ;;  %v260_v47 = vrot.slane %v9517_v10, %v259_v39 }
 0x168   :  { %2743 = vmatprep.subr.bf16.mxu0 %v8574_v48  ;;  %2784 = vmatprep.subr.bf16.mxu1 %v8577_v50  ;;  %v268_v50 = vrot.slane %v9517_v10, %v267_v43 }
 0x16b   :  { %2744 = vmatpush1.bf16.msra.mxu0 %v8572_v49  ;;  %2785 = vmatpush1.bf16.msra.mxu1 %v8575_v51  ;;  %v8641_v49 = vld [vmem:[#allocation7 + $0x720] ss:$16 sps:$4 sm:$0xff]   ;;  %v8646_v51 = vld [vmem:[#allocation7 + $0x504] ss:$16 sps:$4 sm:$0xff]  }
 0x16c   :  { %2745 = vmatprep.subr.bf16.mxu0 %v8580_v52  ;;  %2786 = vmatprep.subr.bf16.mxu1 %v8583_v54  ;;  %v8649_v54 = vld [vmem:[#allocation7 + $0x704] ss:$16 sps:$4 sm:$0xff]  }
 0x16f   :  { %2746 = vmatpush1.bf16.msra.mxu0 %v8578_v53  ;;  %2787 = vmatpush1.bf16.msra.mxu1 %v8581_v55 }
 0x170   :  { %2747 = vmatprep.subr.bf16.mxu0 %v8586_v56  ;;  %2788 = vmatprep.subr.bf16.mxu1 %v8589_v59 }
 0x173   :  { %2748 = vmatpush1.bf16.msra.mxu0 %v8584_v58  ;;  %2789 = vmatpush1.bf16.msra.mxu1 %v8587_v60  ;;  %v8644_v60 = vld [vmem:[#allocation7 + $0x500] ss:$16 sps:$4 sm:$0xff]  }
 0x174   :  { %2749 = vmatprep.subr.bf16.mxu0 %v8592_v61  ;;  %2790 = vmatprep.subr.bf16.mxu1 %v8595_v63 }
 0x177   :  { %2750 = vmatpush1.bf16.msra.mxu0 %v8590_v62  ;;  %2791 = vmatpush1.bf16.msra.mxu1 %v8593_v0 }
 0x178   :  { %2751 = vmatprep.subr.bf16.mxu0 %v8598_v1  ;;  %2792 = vmatprep.subr.bf16.mxu1 %v8601_v3  ;;  %v8647_v1 = vld [vmem:[#allocation7 + $0x700] ss:$16 sps:$4 sm:$0xff]  }
 0x17b   :  { %2752 = vmatpush1.bf16.msra.mxu0 %v8596_v2  ;;  %2793 = vmatpush1.bf16.msra.mxu1 %v8599_v4  ;;  %v8652_v2 = vld [vmem:[#allocation7 + $0xec] ss:$16 sps:$4 sm:$0xff]  }
 0x17c   :  { %2753 = vmatprep.subr.bf16.mxu0 %v8604_v5  ;;  %2794 = vmatprep.subr.bf16.mxu1 %v8607_v7  ;;  %v8655_v4 = vld [vmem:[#allocation7 + $0x2ec] ss:$16 sps:$4 sm:$0xff]  }
 0x17f   :  { %2754 = vmatpush2.bf16.msra.mxu0 %v8602_v6  ;;  %2795 = vmatpush2.bf16.msra.mxu1 %v8605_v8 }
 0x180   :  { %2755 = vmatprep.subr.bf16.mxu0 %v8610_v16  ;;  %2796 = vmatprep.subr.bf16.mxu1 %v8613_v18 }
 0x183   :  { %2756 = vmatpush2.bf16.msra.mxu0 %v8608_v17  ;;  %2797 = vmatpush2.bf16.msra.mxu1 %v8611_v19  ;;  %v8650_v17 = vld [vmem:[#allocation7 + $0xe8] ss:$16 sps:$4 sm:$0xff]  }
 0x184   :  { %2757 = vmatprep.subr.bf16.mxu0 %v8616_v20  ;;  %2798 = vmatprep.subr.bf16.mxu1 %v8619_v22  ;;  %v8653_v20 = vld [vmem:[#allocation7 + $0x2e8] ss:$16 sps:$4 sm:$0xff]   ;;  %v8661_v22 = vld [vmem:[#allocation7 + $0x2cc] ss:$16 sps:$4 sm:$0xff]  }
 0x187   :  { %2758 = vmatpush2.bf16.msra.mxu0 %v8614_v21  ;;  %2799 = vmatpush2.bf16.msra.mxu1 %v8617_v23  ;;  %v8658_v21 = vld [vmem:[#allocation7 + $0xcc] ss:$16 sps:$4 sm:$0xff]   ;;  %v8656_v23 = vld [vmem:[#allocation7 + $0xc8] ss:$16 sps:$4 sm:$0xff]  }
 0x188   :  { %2759 = vmatprep.subr.bf16.mxu0 %v8622_v24  ;;  %2800 = vmatprep.subr.bf16.mxu1 %v8625_v25  ;;  %v8659_v24 = vld [vmem:[#allocation7 + $0x2c8] ss:$16 sps:$4 sm:$0xff]   ;;  %v8667_v25 = vld [vmem:[#allocation7 + $0x2ac] ss:$16 sps:$4 sm:$0xff]  }
 0x18b   :  { %2760 = vmatpush2.bf16.msra.mxu0 %v8620_v13  ;;  %2801 = vmatpush2.bf16.msra.mxu1 %v8623_v26  ;;  %v8664_v13 = vld [vmem:[#allocation7 + $0xac] ss:$16 sps:$4 sm:$0xff]   ;;  %v8662_v26 = vld [vmem:[#allocation7 + $0xa8] ss:$16 sps:$4 sm:$0xff]  }
 0x18c   :  { %2761 = vmatprep.subr.bf16.mxu0 %v8628_v27  ;;  %2802 = vmatprep.subr.bf16.mxu1 %v8631_v29  ;;  %v8665_v27 = vld [vmem:[#allocation7 + $0x2a8] ss:$16 sps:$4 sm:$0xff]   ;;  %v8673_v29 = vld [vmem:[#allocation7 + $0x28c] ss:$16 sps:$4 sm:$0xff]  }
 0x18f   :  { %2762 = vmatpush2.bf16.msra.mxu0 %v8626_v28  ;;  %2803 = vmatpush2.bf16.msra.mxu1 %v8629_v30  ;;  %v8670_v28 = vld [vmem:[#allocation7 + $0x8c] ss:$16 sps:$4 sm:$0xff]   ;;  %v8668_v30 = vld [vmem:[#allocation7 + $0x88] ss:$16 sps:$4 sm:$0xff]  }
 0x190   :  { %2763 = vmatprep.subr.bf16.mxu0 %v8634_v31  ;;  %2804 = vmatprep.subr.bf16.mxu1 %v8637_v33  ;;  %v8676_v31 = vld [vmem:[#allocation7 + $0x6c] ss:$16 sps:$4 sm:$0xff]   ;;  %v8677_v33 = vld [vmem:[#allocation7 + $0x268] ss:$16 sps:$4 sm:$0xff]  }
 0x193   :  { %2764 = vmatpush2.bf16.msra.mxu0 %v8632_v32  ;;  %2805 = vmatpush2.bf16.msra.mxu1 %v8635_v35  ;;  %v8679_v32 = vld [vmem:[#allocation7 + $0x26c] ss:$16 sps:$4 sm:$0xff]  }
 0x194   :  { %v1033_v48 = vpop.f32.mrf.mxu0  ;;  %2765 = vmatprep.subr.bf16.mxu0 %v8640_v42  ;;  %v1074_v53 = vpop.f32.mrf.mxu1  ;;  %2806 = vmatprep.subr.bf16.mxu1 %v8643_v57  ;;  %v8682_v35 = vld [vmem:[#allocation7 + $0x4c] ss:$16 sps:$4 sm:$0xff]   ;;  %v8680_v57 = vld [vmem:[#allocation7 + $0x48] ss:$16 sps:$4 sm:$0xff]  }
 0x195   :  { %v1034_v52 = vadd.f32 %v1033_v48, %v256_v44  ;;  %v1075_v55 = vadd.f32 %v1074_v53, %v264_v46  ;;  %v8685_v42 = vld [vmem:[#allocation7 + $0x24c] ss:$16 sps:$4 sm:$0xff]   ;;  %v8683_v44 = vld [vmem:[#allocation7 + $0x248] ss:$16 sps:$4 sm:$0xff]  }
 0x196   :  { %v1035_v56 = vpop.f32.mrf.mxu0  ;;  %v1076_v59 = vpop.f32.mrf.mxu1  ;;  %v8691_v46 = vld [vmem:[#allocation7 + $0x22c] ss:$16 sps:$4 sm:$0xff]   ;;  %v8689_v48 = vld [vmem:[#allocation7 + $0x228] ss:$16 sps:$4 sm:$0xff]  }
 0x197   :  { %v1036_v58 = vadd.f32 %v1035_v56, %v260_v47  ;;  %2766 = vmatpush2.bf16.msra.mxu0 %v8638_v45  ;;  %v1085_v61 = vmax.f32 %v1034_v52, 0.0  ;;  %v1087_v62 = vmax.f32 %v1075_v55, 0.0  ;;  %v1077_v63 = vadd.f32 %v1076_v59, %v268_v50  ;;  %2807 = vmatpush2.bf16.msra.mxu1 %v8641_v49  ;;  %v8688_v45 = vld [vmem:[#allocation7 + $0x2c] ss:$16 sps:$4 sm:$0xff]   ;;  %v8686_v47 = vld [vmem:[#allocation7 + $0x28] ss:$16 sps:$4 sm:$0xff]  }
 0x198   :  { %v1037_v0 = vpop.f32.mrf.mxu0  ;;  %2767 = vmatprep.subr.bf16.mxu0 %v8646_v51  ;;  %v1078_v3 = vpop.f32.mrf.mxu1  ;;  %2808 = vmatprep.subr.bf16.mxu1 %v8649_v54  ;;  %v8694_v49 = vld [vmem:[#allocation7 + $0xc] ss:$16 sps:$4 sm:$0xff]   ;;  %v8692_v51 = vld [vmem:[#allocation7 + $0x8] ss:$16 sps:$4 sm:$0xff]  }
 0x199   :  { %v1086_v10 = vmax.f32 %v1036_v58, 0.0  ;;  %v1088_v5 = vmax.f32 %v1077_v63, 0.0  ;;  %v9567_v7 = vpack.c.bf16 %v1087_v62, %v1087_v62  ;;  %v9571_v18 = vpack.c.bf16 %v1085_v61, %v1085_v61  ;;  %v8697_v50 = vld [vmem:[#allocation7 + $0x20c] ss:$16 sps:$4 sm:$0xff]   ;;  %v8695_v52 = vld [vmem:[#allocation7 + $0x208] ss:$16 sps:$4 sm:$0xff]  }
 0x19a   :  { %v1038_v6 = vpop.f32.mrf.mxu0  ;;  %v1079_v16 = vpop.f32.mrf.mxu1  ;;  %v8700_v53 = vld [vmem:[#allocation7 + $0x1ec] ss:$16 sps:$4 sm:$0xff]   ;;  %v8698_v55 = vld [vmem:[#allocation7 + $0x1e8] ss:$16 sps:$4 sm:$0xff]  }
 0x19b   :  { %v9569_v8 = vpack.c.bf16 %v1086_v10, %v1086_v10  ;;  %2768 = vmatpush2.bf16.msra.mxu0 %v8644_v60  ;;  %v9573_v19 = vpack.c.bf16 %v1088_v5, %v1088_v5  ;;  %2809 = vmatpush2.bf16.msra.mxu1 %v8647_v1  ;;  %v8703_v54 = vld [vmem:[#allocation7 + $0x3ec] ss:$16 sps:$4 sm:$0xff]   ;;  %v8701_v56 = vld [vmem:[#allocation7 + $0x3e8] ss:$16 sps:$4 sm:$0xff]  }
 0x19c   :  { %2819 = vmatprep.subr.bf16.mxu0 %v8652_v2  ;;  %2860 = vmatprep.subr.bf16.mxu1 %v8655_v4  ;;  %v8706_v58 = vld [vmem:[#allocation7 + $0x1cc] ss:$16 sps:$4 sm:$0xff]   ;;  %v8704_v60 = vld [vmem:[#allocation7 + $0x1c8] ss:$16 sps:$4 sm:$0xff]  }
 0x19d   :  { %2769 = vmatprep.mubr.bf16.mxu0 %v9569_v8  ;;  %2810 = vmatprep.mubr.bf16.mxu1 %v9573_v19  ;;  %v8709_v59 = vld [vmem:[#allocation7 + $0x3cc] ss:$16 sps:$4 sm:$0xff]   ;;  %v8707_v61 = vld [vmem:[#allocation7 + $0x3c8] ss:$16 sps:$4 sm:$0xff]  }
 0x19e   :  { %2770 = vmatmul.mubr.bf16.vlgmr.msra.gmra.mxu0 %v9571_v18  ;;  %2811 = vmatmul.mubr.bf16.vlgmr.msra.gmra.mxu1 %v9567_v7  ;;  %v8712_v62 = vld [vmem:[#allocation7 + $0x1ac] ss:$16 sps:$4 sm:$0xff]   ;;  %v8710_v0 = vld [vmem:[#allocation7 + $0x1a8] ss:$16 sps:$4 sm:$0xff]  }
 0x19f   :  { %2820 = vmatpush1.bf16.msra.mxu0 %v8650_v17  ;;  %2861 = vmatpush1.bf16.msra.mxu1 %v8653_v20  ;;  %v8715_v63 = vld [vmem:[#allocation7 + $0x3ac] ss:$16 sps:$4 sm:$0xff]   ;;  %v8713_v1 = vld [vmem:[#allocation7 + $0x3a8] ss:$16 sps:$4 sm:$0xff]  }
 0x1a0   :  { %2851 = vmatprep.mubr.bf16.mxu0 %v9541_v38  ;;  %2892 = vmatprep.mubr.bf16.mxu1 %v9545_v41  ;;  %v8671_v38 = vld [vmem:[#allocation7 + $0x288] ss:$16 sps:$4 sm:$0xff]   ;;  %v8718_v2 = vld [vmem:[#allocation7 + $0x18c] ss:$16 sps:$4 sm:$0xff]  }
 0x1a1   :  { %2821 = vmatprep.subr.bf16.mxu0 %v8658_v21  ;;  %2862 = vmatprep.subr.bf16.mxu1 %v8661_v22  ;;  %v8674_v41 = vld [vmem:[#allocation7 + $0x68] ss:$16 sps:$4 sm:$0xff]   ;;  %v8721_v10 = vld [vmem:[#allocation7 + $0x38c] ss:$16 sps:$4 sm:$0xff]  }
 0x1a2   :  { %v8716_v3 = vld [vmem:[#allocation7 + $0x188] ss:$16 sps:$4 sm:$0xff]   ;;  %v8724_v5 = vld [vmem:[#allocation7 + $0x16c] ss:$16 sps:$4 sm:$0xff]  }
 0x1a3   :  { %2822 = vmatpush1.bf16.msra.mxu0 %v8656_v23  ;;  %2863 = vmatpush1.bf16.msra.mxu1 %v8659_v24  ;;  %v8719_v4 = vld [vmem:[#allocation7 + $0x388] ss:$16 sps:$4 sm:$0xff]   ;;  %v8727_v6 = vld [vmem:[#allocation7 + $0x36c] ss:$16 sps:$4 sm:$0xff]  }
 0x1a4   :  { %2823 = vmatprep.subr.bf16.mxu0 %v8664_v13  ;;  %2864 = vmatprep.subr.bf16.mxu1 %v8667_v25  ;;  %v8722_v16 = vld [vmem:[#allocation7 + $0x168] ss:$16 sps:$4 sm:$0xff]   ;;  %v8730_v20 = vld [vmem:[#allocation7 + $0x14c] ss:$16 sps:$4 sm:$0xff]  }
 0x1a5   :  { %v8725_v17 = vld [vmem:[#allocation7 + $0x368] ss:$16 sps:$4 sm:$0xff]   ;;  %v8733_v21 = vld [vmem:[#allocation7 + $0x34c] ss:$16 sps:$4 sm:$0xff]  }
 0x1a6   :  { %v8728_v22 = vld [vmem:[#allocation7 + $0x148] ss:$16 sps:$4 sm:$0xff]   ;;  %v8736_v24 = vld [vmem:[#allocation7 + $0x12c] ss:$16 sps:$4 sm:$0xff]  }
 0x1a7   :  { %2824 = vmatpush1.bf16.msra.mxu0 %v8662_v26  ;;  %2865 = vmatpush1.bf16.msra.mxu1 %v8665_v27  ;;  %v8731_v23 = vld [vmem:[#allocation7 + $0x348] ss:$16 sps:$4 sm:$0xff]   ;;  %v8739_v13 = vld [vmem:[#allocation7 + $0x32c] ss:$16 sps:$4 sm:$0xff]  }
 0x1a8   :  { %2825 = vmatprep.subr.bf16.mxu0 %v8670_v28  ;;  %2866 = vmatprep.subr.bf16.mxu1 %v8673_v29  ;;  %v8734_v25 = vld [vmem:[#allocation7 + $0x128] ss:$16 sps:$4 sm:$0xff]   ;;  %v8742_v27 = vld [vmem:[#allocation7 + $0x10c] ss:$16 sps:$4 sm:$0xff]  }
 0x1a9   :  { %v8737_v26 = vld [vmem:[#allocation7 + $0x328] ss:$16 sps:$4 sm:$0xff]   ;;  %v8745_v28 = vld [vmem:[#allocation7 + $0x30c] ss:$16 sps:$4 sm:$0xff]  }
 0x1aa   :  { %v8740_v29 = vld [vmem:[#allocation7 + $0x108] ss:$16 sps:$4 sm:$0xff]  }
 0x1ab   :  { %2826 = vmatpush1.bf16.msra.mxu0 %v8668_v30  ;;  %2867 = vmatpush1.bf16.msra.mxu1 %v8671_v38  ;;  %v8743_v30 = vld [vmem:[#allocation7 + $0x308] ss:$16 sps:$4 sm:$0xff]   ;;  %v8748_v38 = vld [vmem:[#allocation7 + $0x4ec] ss:$16 sps:$4 sm:$0xff]  }
 0x1ac   :  { %2827 = vmatprep.subr.bf16.mxu0 %v8676_v31  ;;  %2868 = vmatprep.subr.bf16.mxu1 %v8679_v32  ;;  %v8751_v31 = vld [vmem:[#allocation7 + $0x6ec] ss:$16 sps:$4 sm:$0xff]   ;;  %v8746_v32 = vld [vmem:[#allocation7 + $0x4e8] ss:$16 sps:$4 sm:$0xff]  }
 0x1af   :  { %2828 = vmatpush1.bf16.msra.mxu0 %v8674_v41  ;;  %2869 = vmatpush1.bf16.msra.mxu1 %v8677_v33  ;;  %v8749_v41 = vld [vmem:[#allocation7 + $0x6e8] ss:$16 sps:$4 sm:$0xff]   ;;  %v8754_v33 = vld [vmem:[#allocation7 + $0x4cc] ss:$16 sps:$4 sm:$0xff]  }
 0x1b0   :  { %2829 = vmatprep.subr.bf16.mxu0 %v8682_v35  ;;  %2870 = vmatprep.subr.bf16.mxu1 %v8685_v42  ;;  %v8757_v35 = vld [vmem:[#allocation7 + $0x6cc] ss:$16 sps:$4 sm:$0xff]   ;;  %v8752_v42 = vld [vmem:[#allocation7 + $0x4c8] ss:$16 sps:$4 sm:$0xff]  }
 0x1b3   :  { %2830 = vmatpush1.bf16.msra.mxu0 %v8680_v57  ;;  %2871 = vmatpush1.bf16.msra.mxu1 %v8683_v44  ;;  %v8755_v57 = vld [vmem:[#allocation7 + $0x6c8] ss:$16 sps:$4 sm:$0xff]   ;;  %v8760_v44 = vld [vmem:[#allocation7 + $0x4ac] ss:$16 sps:$4 sm:$0xff]  }
 0x1b4   :  { %2831 = vmatprep.subr.bf16.mxu0 %v8688_v45  ;;  %2872 = vmatprep.subr.bf16.mxu1 %v8691_v46  ;;  %v8763_v45 = vld [vmem:[#allocation7 + $0x6ac] ss:$16 sps:$4 sm:$0xff]   ;;  %v8758_v46 = vld [vmem:[#allocation7 + $0x4a8] ss:$16 sps:$4 sm:$0xff]  }
 0x1b7   :  { %2832 = vmatpush1.bf16.msra.mxu0 %v8686_v47  ;;  %2873 = vmatpush1.bf16.msra.mxu1 %v8689_v48  ;;  %v8766_v47 = vld [vmem:[#allocation7 + $0x48c] ss:$16 sps:$4 sm:$0xff]   ;;  %v8764_v48 = vld [vmem:[#allocation7 + $0x488] ss:$16 sps:$4 sm:$0xff]  }
 0x1b8   :  { %2833 = vmatprep.subr.bf16.mxu0 %v8694_v49  ;;  %2874 = vmatprep.subr.bf16.mxu1 %v8697_v50  ;;  %v8772_v49 = vld [vmem:[#allocation7 + $0x46c] ss:$16 sps:$4 sm:$0xff]  }
 0x1b9   :  { %v8775_v50 = vld [vmem:[#allocation7 + $0x66c] ss:$16 sps:$4 sm:$0xff]  }
 0x1bb   :  { %2834 = vmatpush1.bf16.msra.mxu0 %v8692_v51  ;;  %2875 = vmatpush1.bf16.msra.mxu1 %v8695_v52  ;;  %v8773_v51 = vld [vmem:[#allocation7 + $0x668] ss:$16 sps:$4 sm:$0xff]   ;;  %v8778_v52 = vld [vmem:[#allocation7 + $0x44c] ss:$16 sps:$4 sm:$0xff]  }
 0x1bc   :  { %2835 = vmatprep.subr.bf16.mxu0 %v8700_v53  ;;  %2876 = vmatprep.subr.bf16.mxu1 %v8703_v54  ;;  %v8781_v53 = vld [vmem:[#allocation7 + $0x64c] ss:$16 sps:$4 sm:$0xff]   ;;  %v8776_v54 = vld [vmem:[#allocation7 + $0x448] ss:$16 sps:$4 sm:$0xff]  }
 0x1bf   :  { %2836 = vmatpush2.bf16.msra.mxu0 %v8698_v55  ;;  %2877 = vmatpush2.bf16.msra.mxu1 %v8701_v56  ;;  %v8779_v55 = vld [vmem:[#allocation7 + $0x648] ss:$16 sps:$4 sm:$0xff]   ;;  %v8784_v56 = vld [vmem:[#allocation7 + $0x42c] ss:$16 sps:$4 sm:$0xff]  }
 0x1c0   :  { %2837 = vmatprep.subr.bf16.mxu0 %v8706_v58  ;;  %2878 = vmatprep.subr.bf16.mxu1 %v8709_v59  ;;  %v8787_v58 = vld [vmem:[#allocation7 + $0x62c] ss:$16 sps:$4 sm:$0xff]   ;;  %v8782_v59 = vld [vmem:[#allocation7 + $0x428] ss:$16 sps:$4 sm:$0xff]  }
 0x1c3   :  { %2838 = vmatpush2.bf16.msra.mxu0 %v8704_v60  ;;  %2879 = vmatpush2.bf16.msra.mxu1 %v8707_v61  ;;  %v8785_v60 = vld [vmem:[#allocation7 + $0x628] ss:$16 sps:$4 sm:$0xff]   ;;  %v8790_v61 = vld [vmem:[#allocation7 + $0x40c] ss:$16 sps:$4 sm:$0xff]  }
 0x1c4   :  { %2839 = vmatprep.subr.bf16.mxu0 %v8712_v62  ;;  %2880 = vmatprep.subr.bf16.mxu1 %v8715_v63  ;;  %v8793_v62 = vld [vmem:[#allocation7 + $0x60c] ss:$16 sps:$4 sm:$0xff]   ;;  %v8788_v63 = vld [vmem:[#allocation7 + $0x408] ss:$16 sps:$4 sm:$0xff]  }
 0x1c7   :  { %2840 = vmatpush2.bf16.msra.mxu0 %v8710_v0  ;;  %2881 = vmatpush2.bf16.msra.mxu1 %v8713_v1  ;;  %v8791_v0 = vld [vmem:[#allocation7 + $0x608] ss:$16 sps:$4 sm:$0xff]   ;;  %v8796_v1 = vld [vmem:[#allocation7 + $0x5ec] ss:$16 sps:$4 sm:$0xff]  }
 0x1c8   :  { %2841 = vmatprep.subr.bf16.mxu0 %v8718_v2  ;;  %2882 = vmatprep.subr.bf16.mxu1 %v8721_v10  ;;  %v8799_v2 = vld [vmem:[#allocation7 + $0x7ec] ss:$16 sps:$4 sm:$0xff]   ;;  %v8794_v10 = vld [vmem:[#allocation7 + $0x5e8] ss:$16 sps:$4 sm:$0xff]  }
 0x1cb   :  { %2842 = vmatpush2.bf16.msra.mxu0 %v8716_v3  ;;  %2883 = vmatpush2.bf16.msra.mxu1 %v8719_v4  ;;  %v8797_v3 = vld [vmem:[#allocation7 + $0x7e8] ss:$16 sps:$4 sm:$0xff]   ;;  %v8802_v4 = vld [vmem:[#allocation7 + $0x5cc] ss:$16 sps:$4 sm:$0xff]  }
 0x1cc   :  { %2843 = vmatprep.subr.bf16.mxu0 %v8724_v5  ;;  %2884 = vmatprep.subr.bf16.mxu1 %v8727_v6  ;;  %v8805_v5 = vld [vmem:[#allocation7 + $0x7cc] ss:$16 sps:$4 sm:$0xff]   ;;  %v8800_v6 = vld [vmem:[#allocation7 + $0x5c8] ss:$16 sps:$4 sm:$0xff]  }
 0x1cf   :  { %2844 = vmatpush2.bf16.msra.mxu0 %v8722_v16  ;;  %2885 = vmatpush2.bf16.msra.mxu1 %v8725_v17  ;;  %v8803_v16 = vld [vmem:[#allocation7 + $0x7c8] ss:$16 sps:$4 sm:$0xff]   ;;  %v8808_v17 = vld [vmem:[#allocation7 + $0x5ac] ss:$16 sps:$4 sm:$0xff]  }
 0x1d0   :  { %2845 = vmatprep.subr.bf16.mxu0 %v8730_v20  ;;  %2886 = vmatprep.subr.bf16.mxu1 %v8733_v21  ;;  %v8811_v20 = vld [vmem:[#allocation7 + $0x7ac] ss:$16 sps:$4 sm:$0xff]   ;;  %v8806_v21 = vld [vmem:[#allocation7 + $0x5a8] ss:$16 sps:$4 sm:$0xff]  }
 0x1d3   :  { %2846 = vmatpush2.bf16.msra.mxu0 %v8728_v22  ;;  %2887 = vmatpush2.bf16.msra.mxu1 %v8731_v23  ;;  %v8809_v22 = vld [vmem:[#allocation7 + $0x7a8] ss:$16 sps:$4 sm:$0xff]   ;;  %v8814_v23 = vld [vmem:[#allocation7 + $0x58c] ss:$16 sps:$4 sm:$0xff]  }
 0x1d4   :  { %2847 = vmatprep.subr.bf16.mxu0 %v8736_v24  ;;  %2888 = vmatprep.subr.bf16.mxu1 %v8739_v13  ;;  %v8817_v24 = vld [vmem:[#allocation7 + $0x78c] ss:$16 sps:$4 sm:$0xff]   ;;  %v8812_v13 = vld [vmem:[#allocation7 + $0x588] ss:$16 sps:$4 sm:$0xff]  }
 0x1d7   :  { %2848 = vmatpush2.bf16.msra.mxu0 %v8734_v25  ;;  %2889 = vmatpush2.bf16.msra.mxu1 %v8737_v26  ;;  %v8815_v25 = vld [vmem:[#allocation7 + $0x788] ss:$16 sps:$4 sm:$0xff]   ;;  %v8820_v26 = vld [vmem:[#allocation7 + $0x56c] ss:$16 sps:$4 sm:$0xff]  }
 0x1d8   :  { %2849 = vmatprep.subr.bf16.mxu0 %v8742_v27  ;;  %2890 = vmatprep.subr.bf16.mxu1 %v8745_v28  ;;  %v8823_v27 = vld [vmem:[#allocation7 + $0x76c] ss:$16 sps:$4 sm:$0xff]   ;;  %v8818_v28 = vld [vmem:[#allocation7 + $0x568] ss:$16 sps:$4 sm:$0xff]  }
 0x1db   :  { %2850 = vmatpush2.bf16.msra.mxu0 %v8740_v29  ;;  %2891 = vmatpush2.bf16.msra.mxu1 %v8743_v30  ;;  %v8821_v29 = vld [vmem:[#allocation7 + $0x768] ss:$16 sps:$4 sm:$0xff]   ;;  %v8826_v30 = vld [vmem:[#allocation7 + $0x54c] ss:$16 sps:$4 sm:$0xff]  }
 0x1dc   :  { %2901 = vmatprep.subr.bf16.mxu0 %v8748_v38  ;;  %2942 = vmatprep.subr.bf16.mxu1 %v8751_v31  ;;  %v8829_v38 = vld [vmem:[#allocation7 + $0x74c] ss:$16 sps:$4 sm:$0xff]   ;;  %v8824_v31 = vld [vmem:[#allocation7 + $0x548] ss:$16 sps:$4 sm:$0xff]  }
 0x1de   :  { %2852 = vmatmul.mubr.bf16.vlgmr.msra.gmra.mxu0 %v9543_v40  ;;  %2893 = vmatmul.mubr.bf16.vlgmr.msra.gmra.mxu1 %v9539_v37  ;;  %v8761_v40 = vld [vmem:[#allocation7 + $0x6a8] ss:$16 sps:$4 sm:$0xff]   ;;  %v8769_v37 = vld [vmem:[#allocation7 + $0x68c] ss:$16 sps:$4 sm:$0xff]  }
 0x1df   :  { %2902 = vmatpush1.bf16.msra.mxu0 %v8746_v32  ;;  %2933 = vmatprep.mubr.bf16.mxu0 %v9569_v8  ;;  %v8767_v8 = vld [vmem:[#allocation7 + $0x688] ss:$16 sps:$4 sm:$0xff]  }
 0x1e0   :  { %2943 = vmatpush1.bf16.msra.mxu1 %v8749_v41  ;;  %2974 = vmatprep.mubr.bf16.mxu1 %v9573_v19  ;;  %v8770_v19 = vld [vmem:[#allocation7 + $0x468] ss:$16 sps:$4 sm:$0xff]   ;;  %v8832_v41 = vld [vmem:[#allocation7 + $0x52c] ss:$16 sps:$4 sm:$0xff]  }
 0x1e1   :  { %2903 = vmatprep.subr.bf16.mxu0 %v8754_v33  ;;  %2944 = vmatprep.subr.bf16.mxu1 %v8757_v35  ;;  %v8827_v32 = vld [vmem:[#allocation7 + $0x748] ss:$16 sps:$4 sm:$0xff]   ;;  %v8835_v33 = vld [vmem:[#allocation7 + $0x72c] ss:$16 sps:$4 sm:$0xff]  }
 0x1e2   :  { %v8830_v35 = vld [vmem:[#allocation7 + $0x528] ss:$16 sps:$4 sm:$0xff]  }
 0x1e3   :  { %2904 = vmatpush1.bf16.msra.mxu0 %v8752_v42  ;;  %v8833_v42 = vld [vmem:[#allocation7 + $0x728] ss:$16 sps:$4 sm:$0xff]  }
 0x1e4   :  { %2945 = vmatpush1.bf16.msra.mxu1 %v8755_v57  ;;  %2905 = vmatprep.subr.bf16.mxu0 %v8760_v44  ;;  %v8838_v57 = vld [vmem:[#allocation7 + $0x50c] ss:$16 sps:$4 sm:$0xff]  }
 0x1e5   :  { %2946 = vmatprep.subr.bf16.mxu1 %v8763_v45  ;;  %v8841_v44 = vld [vmem:[#allocation7 + $0x70c] ss:$16 sps:$4 sm:$0xff]   ;;  %v8836_v45 = vld [vmem:[#allocation7 + $0x508] ss:$16 sps:$4 sm:$0xff]  }
 0x1e7   :  { %2906 = vmatpush1.bf16.msra.mxu0 %v8758_v46  ;;  %v8839_v46 = vld [vmem:[#allocation7 + $0x708] ss:$16 sps:$4 sm:$0xff]  }
 0x1e8   :  { %2947 = vmatpush1.bf16.msra.mxu1 %v8761_v40  ;;  %2907 = vmatprep.subr.bf16.mxu0 %v8766_v47  ;;  %v8844_v40 = vld [vmem:[#allocation8 + $0x74] ss:$8 sps:$4 sm:$0xff]   ;;  %v8842_v47 = vld [vmem:[#allocation8 + $0x70] ss:$8 sps:$4 sm:$0xff]  }
 0x1e9   :  { %2948 = vmatprep.subr.bf16.mxu1 %v8769_v37  ;;  %v8847_v37 = vld [vmem:[#allocation8 + $0x64] ss:$8 sps:$4 sm:$0xff]  }
 0x1eb   :  { %2908 = vmatpush1.bf16.msra.mxu0 %v8764_v48 }
 0x1ec   :  { %2949 = vmatpush1.bf16.msra.mxu1 %v8767_v8  ;;  %2909 = vmatprep.subr.bf16.mxu0 %v8772_v49  ;;  %v8845_v49 = vld [vmem:[#allocation8 + $0x60] ss:$8 sps:$4 sm:$0xff]  }
 0x1ed   :  { %2950 = vmatprep.subr.bf16.mxu1 %v8775_v50 }
 0x1ef   :  { %2910 = vmatpush1.bf16.msra.mxu0 %v8770_v19  ;;  %v8850_v19 = vld [vmem:[#allocation8 + $0x54] ss:$8 sps:$4 sm:$0xff]  }
 0x1f0   :  { %2951 = vmatpush1.bf16.msra.mxu1 %v8773_v51  ;;  %2911 = vmatprep.subr.bf16.mxu0 %v8778_v52 }
 0x1f1   :  { %2952 = vmatprep.subr.bf16.mxu1 %v8781_v53 }
 0x1f3   :  { %2912 = vmatpush1.bf16.msra.mxu0 %v8776_v54  ;;  %v8848_v54 = vld [vmem:[#allocation8 + $0x50] ss:$8 sps:$4 sm:$0xff]  }
 0x1f4   :  { %2953 = vmatpush1.bf16.msra.mxu1 %v8779_v55  ;;  %2913 = vmatprep.subr.bf16.mxu0 %v8784_v56 }
 0x1f5   :  { %2954 = vmatprep.subr.bf16.mxu1 %v8787_v58  ;;  %v8890_v58 = vld [vmem:[#allocation8 + $0x170] ss:$8 sps:$4 sm:$0xff]  }
 0x1f7   :  { %2914 = vmatpush1.bf16.msra.mxu0 %v8782_v59  ;;  %v8895_v59 = vld [vmem:[#allocation8 + $0x164] ss:$8 sps:$4 sm:$0xff]  }
 0x1f8   :  { %2955 = vmatpush1.bf16.msra.mxu1 %v8785_v60  ;;  %2915 = vmatprep.subr.bf16.mxu0 %v8790_v61  ;;  %v8851_v60 = vld [vmem:[#allocation8 + $0x40] ss:$8 sps:$4 sm:$0xff]   ;;  %v8856_v61 = vld [vmem:[#allocation8 + $0x34] ss:$8 sps:$4 sm:$0xff]  }
 0x1f9   :  { %2956 = vmatprep.subr.bf16.mxu1 %v8793_v62  ;;  %v8893_v62 = vld [vmem:[#allocation8 + $0x160] ss:$8 sps:$4 sm:$0xff]  }
 0x1fb   :  { %2916 = vmatpush1.bf16.msra.mxu0 %v8788_v63  ;;  %v8898_v63 = vld [vmem:[#allocation8 + $0x154] ss:$8 sps:$4 sm:$0xff]  }
 0x1fc   :  { %2957 = vmatpush1.bf16.msra.mxu1 %v8791_v0  ;;  %2917 = vmatprep.subr.bf16.mxu0 %v8796_v1  ;;  %v8854_v0 = vld [vmem:[#allocation8 + $0x30] ss:$8 sps:$4 sm:$0xff]   ;;  %v8859_v1 = vld [vmem:[#allocation8 + $0x24] ss:$8 sps:$4 sm:$0xff]  }
 0x1fd   :  { %2958 = vmatprep.subr.bf16.mxu1 %v8799_v2  ;;  %v8896_v2 = vld [vmem:[#allocation8 + $0x150] ss:$8 sps:$4 sm:$0xff]  }
 0x1ff   :  { %2918 = vmatpush2.bf16.msra.mxu0 %v8794_v10  ;;  %v8901_v10 = vld [vmem:[#allocation8 + $0x144] ss:$8 sps:$4 sm:$0xff]  }
 0x200   :  { %2959 = vmatpush2.bf16.msra.mxu1 %v8797_v3  ;;  %2919 = vmatprep.subr.bf16.mxu0 %v8802_v4  ;;  %v8857_v3 = vld [vmem:[#allocation8 + $0x20] ss:$8 sps:$4 sm:$0xff]   ;;  %v8862_v4 = vld [vmem:[#allocation8 + $0x14] ss:$8 sps:$4 sm:$0xff]  }
 0x201   :  { %2960 = vmatprep.subr.bf16.mxu1 %v8805_v5  ;;  %v8899_v5 = vld [vmem:[#allocation8 + $0x140] ss:$8 sps:$4 sm:$0xff]  }
 0x203   :  { %2920 = vmatpush2.bf16.msra.mxu0 %v8800_v6  ;;  %v8904_v6 = vld [vmem:[#allocation8 + $0x134] ss:$8 sps:$4 sm:$0xff]  }
 0x204   :  { %2961 = vmatpush2.bf16.msra.mxu1 %v8803_v16  ;;  %2921 = vmatprep.subr.bf16.mxu0 %v8808_v17  ;;  %v8860_v16 = vld [vmem:[#allocation8 + $0x10] ss:$8 sps:$4 sm:$0xff]   ;;  %v8865_v17 = vld [vmem:[#allocation8 + $0x4] ss:$8 sps:$4 sm:$0xff]  }
 0x205   :  { %2962 = vmatprep.subr.bf16.mxu1 %v8811_v20  ;;  %v8902_v20 = vld [vmem:[#allocation8 + $0x130] ss:$8 sps:$4 sm:$0xff]  }
 0x207   :  { %2922 = vmatpush2.bf16.msra.mxu0 %v8806_v21  ;;  %v8907_v21 = vld [vmem:[#allocation8 + $0x124] ss:$8 sps:$4 sm:$0xff]  }
 0x208   :  { %2963 = vmatpush2.bf16.msra.mxu1 %v8809_v22  ;;  %2923 = vmatprep.subr.bf16.mxu0 %v8814_v23  ;;  %v8863_v22 = vld [vmem:[#allocation8] ss:$8 sps:$4 sm:$0xff]   ;;  %v8868_v23 = vld [vmem:[#allocation8 + $0xf4] ss:$8 sps:$4 sm:$0xff]  }
 0x209   :  { %2964 = vmatprep.subr.bf16.mxu1 %v8817_v24  ;;  %v8905_v24 = vld [vmem:[#allocation8 + $0x120] ss:$8 sps:$4 sm:$0xff]  }
 0x20b   :  { %2924 = vmatpush2.bf16.msra.mxu0 %v8812_v13  ;;  %v8910_v13 = vld [vmem:[#allocation8 + $0x114] ss:$8 sps:$4 sm:$0xff]  }
 0x20c   :  { %2965 = vmatpush2.bf16.msra.mxu1 %v8815_v25  ;;  %2925 = vmatprep.subr.bf16.mxu0 %v8820_v26  ;;  %v8866_v25 = vld [vmem:[#allocation8 + $0xf0] ss:$8 sps:$4 sm:$0xff]   ;;  %v8871_v26 = vld [vmem:[#allocation8 + $0xe4] ss:$8 sps:$4 sm:$0xff]  }
 0x20d   :  { %2966 = vmatprep.subr.bf16.mxu1 %v8823_v27  ;;  %v8908_v27 = vld [vmem:[#allocation8 + $0x110] ss:$8 sps:$4 sm:$0xff]  }
 0x20f   :  { %2926 = vmatpush2.bf16.msra.mxu0 %v8818_v28  ;;  %v8913_v28 = vld [vmem:[#allocation8 + $0x104] ss:$8 sps:$4 sm:$0xff]  }
 0x210   :  { %2967 = vmatpush2.bf16.msra.mxu1 %v8821_v29  ;;  %2927 = vmatprep.subr.bf16.mxu0 %v8826_v30  ;;  %v8869_v29 = vld [vmem:[#allocation8 + $0xe0] ss:$8 sps:$4 sm:$0xff]   ;;  %v8874_v30 = vld [vmem:[#allocation8 + $0xd4] ss:$8 sps:$4 sm:$0xff]  }
 0x211   :  { %2968 = vmatprep.subr.bf16.mxu1 %v8829_v38  ;;  %v8911_v38 = vld [vmem:[#allocation8 + $0x100] ss:$8 sps:$4 sm:$0xff]  }
 0x213   :  { %2928 = vmatpush2.bf16.msra.mxu0 %v8824_v31  ;;  %v8916_v31 = vld [vmem:[#allocation8 + $0x1f4] ss:$8 sps:$4 sm:$0xff]  }
 0x214   :  { %2969 = vmatpush2.bf16.msra.mxu1 %v8827_v32  ;;  %2929 = vmatprep.subr.bf16.mxu0 %v8832_v41  ;;  %v8872_v32 = vld [vmem:[#allocation8 + $0xd0] ss:$8 sps:$4 sm:$0xff]   ;;  %v8877_v41 = vld [vmem:[#allocation8 + $0xc4] ss:$8 sps:$4 sm:$0xff]  }
 0x215   :  { %2970 = vmatprep.subr.bf16.mxu1 %v8835_v33  ;;  %v8914_v33 = vld [vmem:[#allocation8 + $0x1f0] ss:$8 sps:$4 sm:$0xff]  }
 0x217   :  { %2930 = vmatpush2.bf16.msra.mxu0 %v8830_v35  ;;  %v8919_v35 = vld [vmem:[#allocation8 + $0x1e4] ss:$8 sps:$4 sm:$0xff]  }
 0x218   :  { %2971 = vmatpush2.bf16.msra.mxu1 %v8833_v42  ;;  %2931 = vmatprep.subr.bf16.mxu0 %v8838_v57  ;;  %v8875_v42 = vld [vmem:[#allocation8 + $0xc0] ss:$8 sps:$4 sm:$0xff]   ;;  %v8880_v57 = vld [vmem:[#allocation8 + $0xb4] ss:$8 sps:$4 sm:$0xff]  }
 0x219   :  { %2972 = vmatprep.subr.bf16.mxu1 %v8841_v44  ;;  %v8917_v44 = vld [vmem:[#allocation8 + $0x1e0] ss:$8 sps:$4 sm:$0xff]  }
 0x21b   :  { %2932 = vmatpush2.bf16.msra.mxu0 %v8836_v45  ;;  %v8922_v45 = vld [vmem:[#allocation8 + $0x1d4] ss:$8 sps:$4 sm:$0xff]  }
 0x21c   :  { %2973 = vmatpush2.bf16.msra.mxu1 %v8839_v46  ;;  %3387 = vmatprep.subr.bf16.mxu0 %v8844_v40  ;;  %v8878_v46 = vld [vmem:[#allocation8 + $0xb0] ss:$8 sps:$4 sm:$0xff]   ;;  %v8883_v40 = vld [vmem:[#allocation8 + $0xa4] ss:$8 sps:$4 sm:$0xff]  }
 0x21e   :  { %2934 = vmatmul.mubr.bf16.vlgmr.msra.gmra.mxu0 %v9571_v18  ;;  %v9586_v48 = vpop.f32.mrf.mxu0  ;;  %v9589_v8 = vpop.f32.mrf.mxu1  ;;  %v8853_v18 = vld [vmem:[#allocation8 + $0x44] ss:$8 sps:$4 sm:$0xff]  }
 0x21f   :  { %2975 = vmatmul.mubr.bf16.vlgmr.msra.gmra.mxu1 %v9567_v7  ;;  %3388 = vmatpush1.bf16.msra.mxu0 %v8842_v47  ;;  %v8892_v7 = vld [vmem:[#allocation8 + $0x174] ss:$8 sps:$4 sm:$0xff]   ;;  %v8920_v47 = vld [vmem:[#allocation8 + $0x1d0] ss:$8 sps:$4 sm:$0xff]  }
 0x220   :  { %v9591_v50 = vpop.f32.mrf.mxu0  ;;  %3389 = vmatprep.subr.bf16.mxu0 %v8847_v37  ;;  %v9593_v51 = vpop.f32.mrf.mxu1  ;;  %3428 = vmatprep.subr.bf16.mxu1 %v8892_v7  ;;  %v8925_v37 = vld [vmem:[#allocation8 + $0x1c4] ss:$8 sps:$4 sm:$0xff]  }
 0x221   :  { %3429 = vmatpush1.bf16.msra.mxu1 %v8890_v58 }
 0x222   :  { %v2693_v52 = vpop.f32.mrf.mxu0  ;;  %v2734_v53 = vpop.f32.mrf.mxu1  ;;  %3430 = vmatprep.subr.bf16.mxu1 %v8895_v59  ;;  %v8887_v59 = vld [vmem:[#allocation8 + $0x80] ss:$8 sps:$4 sm:$0xff]  }
 0x223   :  { %3390 = vmatpush1.bf16.msra.mxu0 %v8845_v49  ;;  %v8881_v49 = vld [vmem:[#allocation8 + $0xa0] ss:$8 sps:$4 sm:$0xff]   ;;  %v8928_v53 = vld [vmem:[#allocation8 + $0x1b4] ss:$8 sps:$4 sm:$0xff]  }
 0x224   :  { %v2694_v55 = vpop.f32.mrf.mxu0  ;;  %3391 = vmatprep.subr.bf16.mxu0 %v8850_v19  ;;  %v2735_v56 = vpop.f32.mrf.mxu1  ;;  %v8886_v19 = vld [vmem:[#allocation8 + $0x94] ss:$8 sps:$4 sm:$0xff]   ;;  %v8923_v52 = vld [vmem:[#allocation8 + $0x1c0] ss:$8 sps:$4 sm:$0xff]  }
 0x225   :  { %3431 = vmatpush1.bf16.msra.mxu1 %v8893_v62  ;;  %v8884_v55 = vld [vmem:[#allocation8 + $0x90] ss:$8 sps:$4 sm:$0xff]  }
 0x226   :  { %3432 = vmatprep.subr.bf16.mxu1 %v8898_v63  ;;  %v8926_v56 = vld [vmem:[#allocation8 + $0x1b0] ss:$8 sps:$4 sm:$0xff]  }
 0x227   :  { %3392 = vmatpush1.bf16.msra.mxu0 %v8848_v54  ;;  %v9595_v54 = vld [vmem:[#allocation11 + $0x8] sm:$0xf] }
 0x228   :  { %3393 = vmatprep.subr.bf16.mxu0 %v8853_v18  ;;  %v8889_v18 = vld [vmem:[#allocation8 + $0x84] ss:$8 sps:$4 sm:$0xff]   ;;  %v1358_v58 = vrot.slane %v9595_v54, %v9520_v11  ;;  %v1362_v7 = vrot.slane %v9595_v54, %v9526_v14 }
 0x229   :  { %3433 = vmatpush1.bf16.msra.mxu1 %v8896_v2 }
 0x22a   :  { %3434 = vmatprep.subr.bf16.mxu1 %v8901_v10 }
 0x22b   :  { %3394 = vmatpush1.bf16.msra.mxu0 %v8851_v60  ;;  %v2690_v60 = vadd.f32 %v9586_v48, %v1358_v58  ;;  %v8934_v48 = vld [vmem:[#allocation8 + $0x194] ss:$8 sps:$4 sm:$0xff]  }
 0x22c   :  { %3395 = vmatprep.subr.bf16.mxu0 %v8856_v61  ;;  %v2692_v61 = vadd.f32 %v9591_v50, %v1362_v7 }
 0x22d   :  { %3435 = vmatpush1.bf16.msra.mxu1 %v8899_v5  ;;  %v2731_v62 = vadd.f32 %v9589_v8, %v2690_v60 }
 0x22e   :  { %3436 = vmatprep.subr.bf16.mxu1 %v8904_v6 }
 0x22f   :  { %3396 = vmatpush1.bf16.msra.mxu0 %v8854_v0  ;;  %v8931_v0 = vld [vmem:[#allocation8 + $0x1a4] ss:$8 sps:$4 sm:$0xff]  }
 0x230   :  { %3397 = vmatprep.subr.bf16.mxu0 %v8859_v1  ;;  %v2733_v1 = vadd.f32 %v9593_v51, %v2692_v61  ;;  %v8937_v51 = vld [vmem:[#allocation8 + $0x184] ss:$8 sps:$4 sm:$0xff]  }
 0x231   :  { %3437 = vmatpush1.bf16.msra.mxu1 %v8902_v20 }
 0x232   :  { %3438 = vmatprep.subr.bf16.mxu1 %v8907_v21  ;;  %v8932_v21 = vld [vmem:[#allocation8 + $0x190] ss:$8 sps:$4 sm:$0xff]  }
 0x233   :  { %3398 = vmatpush1.bf16.msra.mxu0 %v8857_v3  ;;  %v8929_v3 = vld [vmem:[#allocation8 + $0x1a0] ss:$8 sps:$4 sm:$0xff]  }
 0x234   :  { %3399 = vmatprep.subr.bf16.mxu0 %v8862_v4 }
 0x235   :  { %3439 = vmatpush1.bf16.msra.mxu1 %v8905_v24 }
 0x236   :  { %3440 = vmatprep.subr.bf16.mxu1 %v8910_v13 }
 0x237   :  { %3400 = vmatpush1.bf16.msra.mxu0 %v8860_v16 }
 0x238   :  { %3401 = vmatprep.subr.bf16.mxu0 %v8865_v17 }
 0x239   :  { %3441 = vmatpush1.bf16.msra.mxu1 %v8908_v27 }
 0x23a   :  { %3442 = vmatprep.subr.bf16.mxu1 %v8913_v28 }
 0x23b   :  { %3402 = vmatpush1.bf16.msra.mxu0 %v8863_v22 }
 0x23c   :  { %3403 = vmatprep.subr.bf16.mxu0 %v8868_v23 }
 0x23d   :  { %3443 = vmatpush1.bf16.msra.mxu1 %v8911_v38 }
 0x23e   :  { %3444 = vmatprep.subr.bf16.mxu1 %v8916_v31 }
 0x23f   :  { %3404 = vmatpush2.bf16.msra.mxu0 %v8866_v25  ;;  %v8935_v25 = vld [vmem:[#allocation8 + $0x180] ss:$8 sps:$4 sm:$0xff]  }
 0x240   :  { %3405 = vmatprep.subr.bf16.mxu0 %v8871_v26 }
 0x241   :  { %3445 = vmatpush2.bf16.msra.mxu1 %v8914_v33  ;;  %v8938_v33 = vld [vmem:[#allocation10 + $0x78] sm:$0xff]  }
 0x242   :  { %3446 = vmatprep.subr.bf16.mxu1 %v8919_v35  ;;  %v8939_v35 = vld [vmem:[#allocation10 + $0x38] sm:$0xff]  }
 0x243   :  { %3406 = vmatpush2.bf16.msra.mxu0 %v8869_v29 }
 0x244   :  { %3407 = vmatprep.subr.bf16.mxu0 %v8874_v30 }
 0x245   :  { %3447 = vmatpush2.bf16.msra.mxu1 %v8917_v44  ;;  %v8942_v44 = vld [vmem:[#allocation10 + $0x68] sm:$0xff]  }
 0x246   :  { %3448 = vmatprep.subr.bf16.mxu1 %v8922_v45  ;;  %v8943_v45 = vld [vmem:[#allocation10 + $0x28] sm:$0xff]  }
 0x247   :  { %3408 = vmatpush2.bf16.msra.mxu0 %v8872_v32 }
 0x248   :  { %3409 = vmatprep.subr.bf16.mxu0 %v8877_v41 }
 0x249   :  { %3449 = vmatpush2.bf16.msra.mxu1 %v8920_v47  ;;  %v8946_v47 = vld [vmem:[#allocation10 + $0x58] sm:$0xff]  }
 0x24a   :  { %3450 = vmatprep.subr.bf16.mxu1 %v8925_v37  ;;  %v8947_v37 = vld [vmem:[#allocation10 + $0x18] sm:$0xff]  }
 0x24b   :  { %3410 = vmatpush2.bf16.msra.mxu0 %v8875_v42  ;;  %v8940_v42 = vld [vmem:[#allocation10 + $0x70] sm:$0xff]  }
 0x24c   :  { %3411 = vmatprep.subr.bf16.mxu0 %v8880_v57  ;;  %v8941_v57 = vld [vmem:[#allocation10 + $0x30] sm:$0xff]  }
 0x24d   :  { %3451 = vmatpush2.bf16.msra.mxu1 %v8923_v52  ;;  %v1366_v52 = vrot.slane %v9595_v54, %v9523_v12 }
 0x24e   :  { %3452 = vmatprep.subr.bf16.mxu1 %v8928_v53  ;;  %v1370_v53 = vrot.slane %v9595_v54, %v9529_v15 }
 0x24f   :  { %3412 = vmatpush2.bf16.msra.mxu0 %v8878_v46  ;;  %v8944_v46 = vld [vmem:[#allocation10 + $0x60] sm:$0xff]  }
 0x250   :  { %3413 = vmatprep.subr.bf16.mxu0 %v8883_v40  ;;  %v8945_v40 = vld [vmem:[#allocation10 + $0x20] sm:$0xff]  }
 0x251   :  { %3453 = vmatpush2.bf16.msra.mxu1 %v8926_v56 }
 0x252   :  { %3454 = vmatprep.subr.bf16.mxu1 %v8931_v0 }
 0x253   :  { %3414 = vmatpush2.bf16.msra.mxu0 %v8881_v49  ;;  %v8948_v49 = vld [vmem:[#allocation10 + $0x50] sm:$0xff]  }
 0x254   :  { %3415 = vmatprep.subr.bf16.mxu0 %v8886_v19  ;;  %v8949_v19 = vld [vmem:[#allocation10 + $0x10] sm:$0xff]  }
 0x255   :  { %3455 = vmatpush2.bf16.msra.mxu1 %v8929_v3 }
 0x256   :  { %3456 = vmatprep.subr.bf16.mxu1 %v8934_v48 }
 0x257   :  { %3416 = vmatpush2.bf16.msra.mxu0 %v8884_v55 }
 0x258   :  { %3417 = vmatprep.subr.bf16.mxu0 %v8889_v18 }
 0x259   :  { %3457 = vmatpush2.bf16.msra.mxu1 %v8932_v21 }
 0x25a   :  { %3458 = vmatprep.subr.bf16.mxu1 %v8937_v51  ;;  %v9446_v51 = vmov 0.0  }
 0x25b   :  { %3418 = vmatpush2.bf16.msra.mxu0 %v8887_v59 }
 0x25c   :  { %8360 = vmatprep.subr.bf16.mxu0 %v8938_v33 }
 0x25d   :  { %3459 = vmatpush2.bf16.msra.mxu1 %v8935_v25  ;;  %v8956_v25 = vld [vmem:[#allocation10 + $0xa8] sm:$0xff]  }
 0x25e   :  { %v2771_v63 = vpop.f32.mrf.mxu0  ;;  %v2812_v10 = vpop.f32.mrf.mxu1  ;;  %8400 = vmatprep.subr.bf16.mxu1 %v9446_v51 }
 0x25f   :  { %v2772_v2 = vadd.f32 %v2771_v63, %v2731_v62 }
 0x260   :  { %v2773_v4 = vpop.f32.mrf.mxu0  ;;  %v2814_v16 = vpop.f32.mrf.mxu1 }
 0x261   :  { %v2813_v5 = vadd.f32 %v2812_v10, %v2772_v2  ;;  %v2774_v6 = vadd.f32 %v2773_v4, %v2733_v1 }
 0x262   :  { %v2775_v17 = vpop.f32.mrf.mxu0  ;;  %v2816_v50 = vpop.f32.mrf.mxu1 }
 0x263   :  { %v2815_v20 = vadd.f32 %v2814_v16, %v2774_v6  ;;  %v2983_v22 = vmax.f32 %v2813_v5, 0.0  ;;  %v8951_v50 = vld [vmem:[#allocation10 + $0x8] sm:$0xff]  }
 0x264   :  { %v2776_v8 = vpop.f32.mrf.mxu0  ;;  %v2817_v24 = vpop.f32.mrf.mxu1 }
 0x265   :  { %v2984_v23 = vmax.f32 %v2815_v20, 0.0  ;;  %v2987_v26 = vpack.c.bf16 %v2983_v22, %v2983_v22  ;;  %v8950_v20 = vld [vmem:[#allocation10 + $0x48] sm:$0xff]   ;;  %v8952_v8 = vld [vmem:[#allocation10 + $0x40] sm:$0xff]   ;;  %v8954_v24 = vld [vmem:[#allocation10 + $0xb8] sm:$0xff]  }
 0x267   :  { %v2988_v13 = vpack.c.bf16 %v2984_v23, %v2984_v23  ;;  %v8953_v23 = vld [vmem:[#allocation10] sm:$0xff]  }
 0x269   :  { %3419 = vmatprep.mubr.bf16.mxu0 %v2988_v13  ;;  %v8955_v13 = vld [vmem:[#allocation10 + $0xb0] sm:$0xff]  }
 0x26a   :  { %3420 = vmatmul.mubr.bf16.vlgmr.msra.gmra.mxu0 %v2987_v26  ;;  %v8957_v26 = vld [vmem:[#allocation10 + $0xa0] sm:$0xff]  }
 0x26b   :  { %8361 = vmatpush3.bf16.msra.mxu0 %v8939_v35 }
 0x26c   :  { %8362 = vmatprep.subr.bf16.mxu0 %v8940_v42 }
 0x26f   :  { %8363 = vmatpush3.bf16.msra.mxu0 %v8941_v57 }
 0x270   :  { %8364 = vmatprep.subr.bf16.mxu0 %v8942_v44 }
 0x273   :  { %8365 = vmatpush3.bf16.msra.mxu0 %v8943_v45 }
 0x274   :  { %8366 = vmatprep.subr.bf16.mxu0 %v8944_v46 }
 0x277   :  { %8367 = vmatpush3.bf16.msra.mxu0 %v8945_v40 }
 0x278   :  { %8368 = vmatprep.subr.bf16.mxu0 %v8946_v47  ;;  %v8959_v47 = vld [vmem:[#allocation10 + $0x90] sm:$0xff]  }
 0x27b   :  { %8369 = vmatpush3.bf16.msra.mxu0 %v8947_v37  ;;  %v8960_v37 = vld [vmem:[#allocation10 + $0x88] sm:$0xff]  }
 0x27c   :  { %8370 = vmatprep.subr.bf16.mxu0 %v8948_v49  ;;  %v8961_v49 = vld [vmem:[#allocation10 + $0x80] sm:$0xff]  }
 0x27f   :  { %8371 = vmatpush3.bf16.msra.mxu0 %v8949_v19  ;;  %v8962_v19 = vld [vmem:[#allocation10 + $0xf8] sm:$0xff]  }
 0x280   :  { %8372 = vmatprep.subr.bf16.mxu0 %v8950_v20  ;;  %v8984_v20 = vld [vmem:[#allocation8 + $0x234] ss:$8 sps:$4 sm:$0xff]  }
 0x283   :  { %8373 = vmatpush3.bf16.msra.mxu0 %v8951_v50  ;;  %v8982_v50 = vld [vmem:[#allocation8 + $0x230] ss:$8 sps:$4 sm:$0xff]  }
 0x284   :  { %8374 = vmatprep.subr.bf16.mxu0 %v8952_v8  ;;  %v8990_v8 = vld [vmem:[#allocation8 + $0x214] ss:$8 sps:$4 sm:$0xff]  }
 0x287   :  { %8375 = vmatpush3.bf16.msra.mxu0 %v8953_v23  ;;  %v8988_v23 = vld [vmem:[#allocation8 + $0x210] ss:$8 sps:$4 sm:$0xff]  }
 0x288   :  { %8420 = vmatprep.subr.bf16.mxu0 %v9446_v51 }
 0x29e   :  { %v2853_v27 = vpop.f32.mrf.mxu0  ;;  %v2894_v28 = vpop.f32.mrf.mxu1 }
 0x29f   :  { %v2854_v55 = vadd.f32 %v2853_v27, %v1366_v52  ;;  %v8958_v27 = vld [vmem:[#allocation10 + $0x98] sm:$0xff]   ;;  %v8963_v52 = vld [vmem:[#allocation10 + $0xf0] sm:$0xff]  }
 0x2a0   :  { %v2855_v29 = vpop.f32.mrf.mxu0  ;;  %v2896_v30 = vpop.f32.mrf.mxu1 }
 0x2a1   :  { %v2856_v18 = vadd.f32 %v2855_v29, %v1370_v53  ;;  %v2895_v56 = vadd.f32 %v2894_v28, %v2854_v55  ;;  %v3055_v28 = vld [vmem:[#allocation11 + $0xc] sm:$0x3]  ;;  %v8965_v55 = vld [vmem:[#allocation10 + $0xe0] sm:$0xff]  }
 0x2a2   :  { %v2857_v38 = vpop.f32.mrf.mxu0  ;;  %v2898_v31 = vpop.f32.mrf.mxu1  ;;  %v3060_v29 = vrot.slane %v3055_v28, %v9520_v11  ;;  %v8964_v53 = vld [vmem:[#allocation10 + $0xe8] sm:$0xff]  }
 0x2a3   :  { %v2897_v7 = vadd.f32 %v2896_v30, %v2856_v18  ;;  %v3064_v30 = vrot.slane %v3055_v28, %v9526_v14  ;;  %v8966_v18 = vld [vmem:[#allocation10 + $0xd8] sm:$0xff]  }
 0x2a4   :  { %v2858_v32 = vpop.f32.mrf.mxu0  ;;  %v2899_v41 = vpop.f32.mrf.mxu1 }
 0x2de   :  { %v2935_v58 = vpop.f32.mrf.mxu0 }
 0x2df   :  { %v2936_v59 = vadd.f32 %v2935_v58, %v2895_v56  ;;  %v2976_v60 = vpop.f32.mrf.mxu1  ;;  %v8967_v56 = vld [vmem:[#allocation10 + $0xd0] sm:$0xff]  }
 0x2e0   :  { %v2937_v61 = vpop.f32.mrf.mxu0 }
 0x2e1   :  { %v2977_v62 = vadd.f32 %v2976_v60, %v2936_v59  ;;  %v2938_v63 = vadd.f32 %v2937_v61, %v2897_v7  ;;  %v2978_v0 = vpop.f32.mrf.mxu1  ;;  %v7861_v7 = vld [vmem:[#allocation11 + $0xe] ss:$0 sm:$0xff] }
 0x2e2   :  { %v2939_v1 = vpop.f32.mrf.mxu0 }
 0x2e3   :  { %v2979_v2 = vadd.f32 %v2978_v0, %v2938_v63  ;;  %v2980_v10 = vpop.f32.mrf.mxu1  ;;  %v2985_v3 = vmax.f32 %v2977_v62, 0.0 }
 0x2e4   :  { %v2940_v4 = vpop.f32.mrf.mxu0  ;;  %v8969_v10 = vld [vmem:[#allocation10 + $0xc0] sm:$0xff]  }
 0x2e5   :  { %v2986_v5 = vmax.f32 %v2979_v2, 0.0  ;;  %v2981_v6 = vpop.f32.mrf.mxu1  ;;  %v2989_v54 = vpack.c.bf16 %v2985_v3, %v2985_v3  ;;  %v8968_v2 = vld [vmem:[#allocation10 + $0xc8] sm:$0xff]   ;;  %v8970_v3 = vld [vmem:[#allocation8 + $0x270] ss:$8 sps:$4 sm:$0xff]   ;;  %v8972_v4 = vld [vmem:[#allocation8 + $0x274] ss:$8 sps:$4 sm:$0xff]  }
 0x2e6   :  { %v8973_v6 = vld [vmem:[#allocation8 + $0x260] ss:$8 sps:$4 sm:$0xff]  }
 0x2e7   :  { %v2990_v16 = vpack.c.bf16 %v2986_v5, %v2986_v5  ;;  %v8975_v5 = vld [vmem:[#allocation8 + $0x264] ss:$8 sps:$4 sm:$0xff]  }
 0x2e9   :  { %3460 = vmatprep.mubr.bf16.mxu1 %v2990_v16  ;;  %v8978_v16 = vld [vmem:[#allocation8 + $0x254] ss:$8 sps:$4 sm:$0xff]  }
 0x2ea   :  { %3461 = vmatmul.mubr.bf16.vlgmr.msra.gmra.mxu1 %v2989_v54  ;;  %v8976_v54 = vld [vmem:[#allocation8 + $0x250] ss:$8 sps:$4 sm:$0xff]  }
 0x2eb   :  { %8401 = vmatpush3.bf16.msra.mxu1 %v8954_v24  ;;  %8416 = vmatprep.mubr.msk.bf16.mxu1 %vm9447_vm0, %v9446_v51  ;;  %v7878_v24 = vld [vmem:[#allocation11 + $0xf] ss:$0 sm:$0xff] }
 0x2ec   :  { %8402 = vmatprep.subr.bf16.mxu1 %v9446_v51 }
 0x2ef   :  { %8403 = vmatpush3.bf16.msra.mxu1 %v8955_v13 }
 0x2f0   :  { %8404 = vmatprep.subr.bf16.mxu1 %v9446_v51 }
 0x2f3   :  { %8405 = vmatpush3.bf16.msra.mxu1 %v8956_v25 }
 0x2f4   :  { %8406 = vmatprep.subr.bf16.mxu1 %v9446_v51 }
 0x2f7   :  { %8407 = vmatpush3.bf16.msra.mxu1 %v8957_v26 }
 0x2f8   :  { %8408 = vmatprep.subr.bf16.mxu1 %v9446_v51 }
 0x2fb   :  { %8409 = vmatpush3.bf16.msra.mxu1 %v8958_v27 }
 0x2fc   :  { %8410 = vmatprep.subr.bf16.mxu1 %v9446_v51 }
 0x2ff   :  { %8411 = vmatpush3.bf16.msra.mxu1 %v8959_v47  ;;  %v9018_v47 = vld [vmem:[#allocation7 + $0x860] ss:$16 sps:$4 sm:$0xff]  }
 0x300   :  { %8412 = vmatprep.subr.bf16.mxu1 %v9446_v51 }
 0x303   :  { %8413 = vmatpush3.bf16.msra.mxu1 %v8960_v37  ;;  %v9026_v37 = vld [vmem:[#allocation7 + $0x844] ss:$16 sps:$4 sm:$0xff]  }
 0x304   :  { %8414 = vmatprep.subr.bf16.mxu1 %v9446_v51 }
 0x307   :  { %8415 = vmatpush3.bf16.msra.mxu1 %v8961_v49  ;;  %v9024_v49 = vld [vmem:[#allocation7 + $0x840] ss:$16 sps:$4 sm:$0xff]  }
 0x308   :  { %3984 = vmatprep.subr.bf16.mxu1 %v8972_v4 }
 0x32a   :  { %v3421_v17 = vpop.f32.mrf.mxu0 }
 0x32b   :  { %v3422_v38 = vadd.f32 %v3421_v17, %v3060_v29  ;;  %v8981_v17 = vld [vmem:[#allocation8 + $0x244] ss:$8 sps:$4 sm:$0xff]  }
 0x32c   :  { %v3423_v48 = vpop.f32.mrf.mxu0 }
 0x32d   :  { %v3424_v32 = vadd.f32 %v3423_v48, %v3064_v30  ;;  %v8979_v48 = vld [vmem:[#allocation8 + $0x240] ss:$8 sps:$4 sm:$0xff]   ;;  %v8993_v30 = vld [vmem:[#allocation8 + $0x204] ss:$8 sps:$4 sm:$0xff]  }
 0x32e   :  { %v3425_v21 = vpop.f32.mrf.mxu0 }
 0x32f   :  { %v8987_v21 = vld [vmem:[#allocation8 + $0x224] ss:$8 sps:$4 sm:$0xff]  }
 0x330   :  { %v3426_v22 = vpop.f32.mrf.mxu0 }
 0x331   :  { %v8985_v22 = vld [vmem:[#allocation8 + $0x220] ss:$8 sps:$4 sm:$0xff]  }
 0x3aa   :  { %v3462_v31 = vpop.f32.mrf.mxu1 }
 0x3ab   :  { %v3463_v41 = vadd.f32 %v3462_v31, %v3422_v38  ;;  %v8991_v38 = vld [vmem:[#allocation8 + $0x200] ss:$8 sps:$4 sm:$0xff]   ;;  %v9448_v31 = vmov 0  }
 0x3ac   :  { %v3464_v33 = vpop.f32.mrf.mxu1 }
 0x3ad   :  { %v3465_v35 = vadd.f32 %v3464_v33, %v3424_v32  ;;  %v3469_v42 = vmax.f32 %v3463_v41, 0.0  ;;  %v8994_v32 = vld [vmem:[#allocation7 + $0x8e0] ss:$16 sps:$4 sm:$0xff]   ;;  %v8996_v41 = vld [vmem:[#allocation7 + $0x8e4] ss:$16 sps:$4 sm:$0xff]  }
 0x3ae   :  { %v3466_v57 = vpop.f32.mrf.mxu1  ;;  %v8999_v33 = vld [vmem:[#allocation7 + $0x8ec] ss:$16 sps:$4 sm:$0xff]  }
 0x3af   :  { %v3470_v44 = vmax.f32 %v3465_v35, 0.0  ;;  %v3471_v40 = vpack.c.bf16 %v3469_v42, %v3469_v42  ;;  %v9002_v35 = vld [vmem:[#allocation7 + $0x8c4] ss:$16 sps:$4 sm:$0xff]   ;;  %v9000_v42 = vld [vmem:[#allocation7 + $0x8c0] ss:$16 sps:$4 sm:$0xff]  }
 0x3b0   :  { %v3467_v45 = vpop.f32.mrf.mxu1  ;;  %v9008_v57 = vld [vmem:[#allocation7 + $0x8a4] ss:$16 sps:$4 sm:$0xff]  }
 0x3b1   :  { %v3472_v46 = vpack.c.bf16 %v3470_v44, %v3470_v44  ;;  %v9006_v44 = vld [vmem:[#allocation7 + $0x8a0] ss:$16 sps:$4 sm:$0xff]   ;;  %v9014_v45 = vld [vmem:[#allocation7 + $0x884] ss:$16 sps:$4 sm:$0xff]  }
 0x3b3   :  { %3640 = vmatprep.mubr.bf16.mxu0 %v3472_v46  ;;  %v9012_v46 = vld [vmem:[#allocation7 + $0x880] ss:$16 sps:$4 sm:$0xff]  }
 0x3b4   :  { %3641 = vmatmul.mubr.bf16.vlgmr.msra.gmra.mxu0 %v3471_v40  ;;  %v9020_v40 = vld [vmem:[#allocation7 + $0x864] ss:$16 sps:$4 sm:$0xff]  }
 0x3b5   :  { %8436 = vmatprep.mubr.msk.bf16.mxu0 %vm9447_vm0, %v9446_v51  ;;  %8421 = vmatpush3.bf16.msra.mxu0 %v8962_v19  ;;  %v9032_v19 = vld [vmem:[#allocation7 + $0x824] ss:$16 sps:$4 sm:$0xff]  }
 0x3b6   :  { %8422 = vmatprep.subr.bf16.mxu0 %v9446_v51 }
 0x3b9   :  { %8423 = vmatpush3.bf16.msra.mxu0 %v8963_v52  ;;  %v9030_v52 = vld [vmem:[#allocation7 + $0x820] ss:$16 sps:$4 sm:$0xff]  }
 0x3ba   :  { %8424 = vmatprep.subr.bf16.mxu0 %v9446_v51 }
 0x3bd   :  { %8425 = vmatpush3.bf16.msra.mxu0 %v8964_v53  ;;  %v9038_v53 = vld [vmem:[#allocation7 + $0x804] ss:$16 sps:$4 sm:$0xff]  }
 0x3be   :  { %8426 = vmatprep.subr.bf16.mxu0 %v9446_v51 }
 0x3c1   :  { %8427 = vmatpush3.bf16.msra.mxu0 %v8965_v55  ;;  %v9036_v55 = vld [vmem:[#allocation7 + $0x800] ss:$16 sps:$4 sm:$0xff]  }
 0x3c2   :  { %8428 = vmatprep.subr.bf16.mxu0 %v9446_v51 }
 0x3c5   :  { %8429 = vmatpush3.bf16.msra.mxu0 %v8966_v18  ;;  %v9044_v18 = vld [vmem:[#allocation7 + $0x9e4] ss:$16 sps:$4 sm:$0xff]  }
 0x3c6   :  { %8430 = vmatprep.subr.bf16.mxu0 %v9446_v51 }
 0x3c9   :  { %8431 = vmatpush3.bf16.msra.mxu0 %v8967_v56  ;;  %v9042_v56 = vld [vmem:[#allocation7 + $0x9e0] ss:$16 sps:$4 sm:$0xff]  }
 0x3ca   :  { %8432 = vmatprep.subr.bf16.mxu0 %v9446_v51 }
 0x3cd   :  { %8433 = vmatpush3.bf16.msra.mxu0 %v8968_v2  ;;  %v9072_v2 = vld [vmem:[#allocation7 + $0x940] ss:$16 sps:$4 sm:$0xff]  }
 0x3ce   :  { %8434 = vmatprep.subr.bf16.mxu0 %v9446_v51 }
 0x3d1   :  { %8435 = vmatpush3.bf16.msra.mxu0 %v8969_v10  ;;  %v7887_v10 = vld [vmem:[#allocation11 + $0x10] ss:$0 sm:$0xff] }
 0x3d2   :  { %4435 = vmatprep.subr.bf16.mxu0 %v8996_v41  ;;  %v9059_v41 = vld [vmem:[#allocation7 + $0x9ac] ss:$16 sps:$4 sm:$0xff]  }
 0x474   :  { %v8376_v58 = vpop.f32.mrf.mxu0 }
 0x476   :  { %v8377_v59 = vpop.f32.mrf.mxu0 }
 0x477   :  { %v8378_v60 = vadd.f32 %v8377_v59, %v8376_v58  ;;  %v9050_v58 = vld [vmem:[#allocation7 + $0x9c4] ss:$16 sps:$4 sm:$0xff]  }
 0x478   :  { %v8379_v61 = vpop.f32.mrf.mxu0  ;;  %v9056_v59 = vld [vmem:[#allocation7 + $0x9a4] ss:$16 sps:$4 sm:$0xff]  }
 0x479   :  { %v3643_v62 = vadd.f32 %v8378_v60, %v7861_v7  ;;  %v9048_v7 = vld [vmem:[#allocation7 + $0x9c0] ss:$16 sps:$4 sm:$0xff]   ;;  %v9062_v61 = vld [vmem:[#allocation7 + $0x984] ss:$16 sps:$4 sm:$0xff]  }
 0x47a   :  { %v8380_v63 = vpop.f32.mrf.mxu0  ;;  %v9054_v60 = vld [vmem:[#allocation7 + $0x9a0] ss:$16 sps:$4 sm:$0xff]  }
 0x47b   :  { %v3648_v0 = vmax.f32 %v3643_v62, 0.0  ;;  %v9060_v62 = vld [vmem:[#allocation7 + $0x980] ss:$16 sps:$4 sm:$0xff]   ;;  %v9068_v63 = vld [vmem:[#allocation7 + $0x964] ss:$16 sps:$4 sm:$0xff]  }
 0x47d   :  { %v3649_v1 = vpack.c.bf16 %v3648_v0, %v3648_v0  ;;  %v9066_v0 = vld [vmem:[#allocation7 + $0x960] ss:$16 sps:$4 sm:$0xff]  }
 0x47f   :  { %8417 = vmatmul.mubr.bf16.vlgmr.msra.gmra.mxu1 %v3649_v1  ;;  %v9074_v1 = vld [vmem:[#allocation7 + $0x944] ss:$16 sps:$4 sm:$0xff]  }
 0x480   :  { %3985 = vmatpush1.bf16.msra.mxu1 %v8970_v3  ;;  %4016 = vmatprep.mubr.bf16.mxu1 %v9448_v31  ;;  %v9053_v31 = vld [vmem:[#allocation7 + $0x9cc] ss:$16 sps:$4 sm:$0xff]  }
 0x481   :  { %3986 = vmatprep.subr.bf16.mxu1 %v8975_v5 }
 0x484   :  { %3987 = vmatpush1.bf16.msra.mxu1 %v8973_v6 }
 0x485   :  { %3988 = vmatprep.subr.bf16.mxu1 %v8978_v16 }
 0x488   :  { %3989 = vmatpush1.bf16.msra.mxu1 %v8976_v54  ;;  %v8997_v54 = vld [vmem:[#allocation7 + $0x8e8] ss:$16 sps:$4 sm:$0xff]  }
 0x489   :  { %3990 = vmatprep.subr.bf16.mxu1 %v8981_v17 }
 0x48c   :  { %3991 = vmatpush1.bf16.msra.mxu1 %v8979_v48  ;;  %v9005_v48 = vld [vmem:[#allocation7 + $0x8cc] ss:$16 sps:$4 sm:$0xff]  }
 0x48d   :  { %3992 = vmatprep.subr.bf16.mxu1 %v8984_v20 }
 0x490   :  { %3993 = vmatpush1.bf16.msra.mxu1 %v8982_v50  ;;  %v9003_v50 = vld [vmem:[#allocation7 + $0x8c8] ss:$16 sps:$4 sm:$0xff]  }
 0x491   :  { %3994 = vmatprep.subr.bf16.mxu1 %v8987_v21  ;;  %v9011_v21 = vld [vmem:[#allocation7 + $0x8ac] ss:$16 sps:$4 sm:$0xff]  }
 0x494   :  { %3995 = vmatpush1.bf16.msra.mxu1 %v8985_v22  ;;  %v9009_v22 = vld [vmem:[#allocation7 + $0x8a8] ss:$16 sps:$4 sm:$0xff]  }
 0x495   :  { %3996 = vmatprep.subr.bf16.mxu1 %v8990_v8  ;;  %v9017_v8 = vld [vmem:[#allocation7 + $0x88c] ss:$16 sps:$4 sm:$0xff]  }
 0x498   :  { %3997 = vmatpush1.bf16.msra.mxu1 %v8988_v23  ;;  %v9015_v23 = vld [vmem:[#allocation7 + $0x888] ss:$16 sps:$4 sm:$0xff]  }
 0x499   :  { %3998 = vmatprep.subr.bf16.mxu1 %v8993_v30  ;;  %v9047_v30 = vld [vmem:[#allocation7 + $0x9ec] ss:$16 sps:$4 sm:$0xff]  }
 0x49c   :  { %3999 = vmatpush1.bf16.msra.mxu1 %v8991_v38  ;;  %v9045_v38 = vld [vmem:[#allocation7 + $0x9e8] ss:$16 sps:$4 sm:$0xff]  }
 0x49d   :  { %4476 = vmatprep.subr.bf16.mxu1 %v8999_v33  ;;  %v9057_v33 = vld [vmem:[#allocation7 + $0x9a8] ss:$16 sps:$4 sm:$0xff]  }
 0x53f   :  { %v3755_v51 = vpop.f32.mrf.mxu1 }
 0x540   :  { %v3756_v13 = vadd.f32 %v7878_v24, %v3755_v51  ;;  %v9023_v24 = vld [vmem:[#allocation7 + $0x86c] ss:$16 sps:$4 sm:$0xff]   ;;  %v9021_v51 = vld [vmem:[#allocation7 + $0x868] ss:$16 sps:$4 sm:$0xff]  }
 0x541   :  { %v8418_v25 = vpop.f32.mrf.mxu1 }
 0x542   :  { %v3761_v26 = vmax.f32 %v3756_v13, 0.0  ;;  %v9029_v13 = vld [vmem:[#allocation7 + $0x84c] ss:$16 sps:$4 sm:$0xff]   ;;  %v9027_v25 = vld [vmem:[#allocation7 + $0x848] ss:$16 sps:$4 sm:$0xff]  }
 0x543   :  { %v3758_v27 = vpop.f32.mrf.mxu1 }
 0x544   :  { %v3762_v28 = vpack.c.bf16 %v3761_v26, %v3761_v26  ;;  %v9035_v26 = vld [vmem:[#allocation7 + $0x82c] ss:$16 sps:$4 sm:$0xff]   ;;  %v9033_v27 = vld [vmem:[#allocation7 + $0x828] ss:$16 sps:$4 sm:$0xff]  }
 0x545   :  { %v8419_v29 = vpop.f32.mrf.mxu1 }
 0x546   :  { %8437 = vmatmul.mubr.bf16.vlgmr.msra.gmra.mxu0 %v3762_v28  ;;  %v9041_v28 = vld [vmem:[#allocation7 + $0x80c] ss:$16 sps:$4 sm:$0xff]   ;;  %v9039_v29 = vld [vmem:[#allocation7 + $0x808] ss:$16 sps:$4 sm:$0xff]  }
 0x547   :  { %4436 = vmatpush1.bf16.msra.mxu0 %v8994_v32  ;;  %v9051_v32 = vld [vmem:[#allocation7 + $0x9c8] ss:$16 sps:$4 sm:$0xff]  }
 0x548   :  { %4437 = vmatprep.subr.bf16.mxu0 %v9002_v35  ;;  %v9065_v35 = vld [vmem:[#allocation7 + $0x98c] ss:$16 sps:$4 sm:$0xff]  }
 0x54b   :  { %4438 = vmatpush1.bf16.msra.mxu0 %v9000_v42  ;;  %v9063_v42 = vld [vmem:[#allocation7 + $0x988] ss:$16 sps:$4 sm:$0xff]  }
 0x54c   :  { %4439 = vmatprep.subr.bf16.mxu0 %v9008_v57  ;;  %v9071_v57 = vld [vmem:[#allocation7 + $0x96c] ss:$16 sps:$4 sm:$0xff]  }
 0x54f   :  { %4440 = vmatpush1.bf16.msra.mxu0 %v9006_v44  ;;  %v9069_v44 = vld [vmem:[#allocation7 + $0x968] ss:$16 sps:$4 sm:$0xff]  }
 0x550   :  { %4441 = vmatprep.subr.bf16.mxu0 %v9014_v45  ;;  %v9077_v45 = vld [vmem:[#allocation7 + $0x94c] ss:$16 sps:$4 sm:$0xff]  }
 0x553   :  { %4442 = vmatpush1.bf16.msra.mxu0 %v9012_v46  ;;  %v9075_v46 = vld [vmem:[#allocation7 + $0x948] ss:$16 sps:$4 sm:$0xff]  }
 0x554   :  { %4443 = vmatprep.subr.bf16.mxu0 %v9020_v40  ;;  %v9080_v40 = vld [vmem:[#allocation7 + $0x924] ss:$16 sps:$4 sm:$0xff]  }
 0x557   :  { %4444 = vmatpush1.bf16.msra.mxu0 %v9018_v47  ;;  %v9083_v47 = vld [vmem:[#allocation7 + $0x92c] ss:$16 sps:$4 sm:$0xff]  }
 0x558   :  { %4445 = vmatprep.subr.bf16.mxu0 %v9026_v37  ;;  %v9078_v37 = vld [vmem:[#allocation7 + $0x920] ss:$16 sps:$4 sm:$0xff]  }
 0x55b   :  { %4446 = vmatpush1.bf16.msra.mxu0 %v9024_v49  ;;  %v9081_v49 = vld [vmem:[#allocation7 + $0x928] ss:$16 sps:$4 sm:$0xff]  }
 0x55c   :  { %4447 = vmatprep.subr.bf16.mxu0 %v9032_v19  ;;  %v9086_v19 = vld [vmem:[#allocation7 + $0x904] ss:$16 sps:$4 sm:$0xff]  }
 0x55f   :  { %4448 = vmatpush1.bf16.msra.mxu0 %v9030_v52  ;;  %v9089_v52 = vld [vmem:[#allocation7 + $0x90c] ss:$16 sps:$4 sm:$0xff]  }
 0x560   :  { %4449 = vmatprep.subr.bf16.mxu0 %v9038_v53  ;;  %v9084_v53 = vld [vmem:[#allocation7 + $0x900] ss:$16 sps:$4 sm:$0xff]  }
 0x563   :  { %4450 = vmatpush1.bf16.msra.mxu0 %v9036_v55  ;;  %v9087_v55 = vld [vmem:[#allocation7 + $0x908] ss:$16 sps:$4 sm:$0xff]  }
 0x564   :  { %4451 = vmatprep.subr.bf16.mxu0 %v9044_v18  ;;  %v4581_v18 = vld [vmem:[#allocation5 + $0x5c0] sm:$0xff] }
 0x567   :  { %4452 = vmatpush2.bf16.msra.mxu0 %v9042_v56  ;;  %v4585_v56 = vld [vmem:[#allocation5 + $0x5e0] sm:$0xff] }
 0x568   :  { %4453 = vmatprep.subr.bf16.mxu0 %v9050_v58  ;;  %v4709_v58 = vld [vmem:[#allocation5 + $0x9c0] sm:$0xff] }
 0x56b   :  { %4454 = vmatpush2.bf16.msra.mxu0 %v9048_v7  ;;  %v8032_v7 = vcombine.low %v4581_v18, %v4585_v56 }
 0x56c   :  { %4455 = vmatprep.subr.bf16.mxu0 %v9056_v59  ;;  %v8033_v59 = vcombine.high %v4581_v18, %v4585_v56 }
 0x56f   :  { %4456 = vmatpush2.bf16.msra.mxu0 %v9054_v60  ;;  %v4713_v60 = vld [vmem:[#allocation5 + $0x9e0] sm:$0xff] }
 0x570   :  { %4457 = vmatprep.subr.bf16.mxu0 %v9062_v61  ;;  %v8160_v61 = vcombine.low %v4709_v58, %v4713_v60 }
 0x573   :  { %4458 = vmatpush2.bf16.msra.mxu0 %v9060_v62  ;;  %v8161_v62 = vcombine.high %v4709_v58, %v4713_v60  ;;  %v4537_v60 = vld [vmem:[#allocation5 + $0x460] sm:$0xff] }
 0x574   :  { %4459 = vmatprep.subr.bf16.mxu0 %v9068_v63  ;;  %v3892_v63 = vld [vmem:[#allocation11 + $0x11] sm:$0x3] }
 0x577   :  { %4460 = vmatpush2.bf16.msra.mxu0 %v9066_v0  ;;  %v3897_v0 = vrot.slane %v3892_v63, %v9520_v11 }
 0x578   :  { %4461 = vmatprep.subr.bf16.mxu0 %v9074_v1  ;;  %v3901_v1 = vrot.slane %v3892_v63, %v9526_v14 }
 0x57b   :  { %4462 = vmatpush2.bf16.msra.mxu0 %v9072_v2 }
 0x57c   :  { %4463 = vmatprep.subr.bf16.mxu0 %v9080_v40 }
 0x57f   :  { %4464 = vmatpush2.bf16.msra.mxu0 %v9078_v37 }
 0x580   :  { %4465 = vmatprep.subr.bf16.mxu0 %v9086_v19  ;;  %v4541_v19 = vld [vmem:[#allocation5 + $0x480] sm:$0xff] }
 0x583   :  { %4466 = vmatpush2.bf16.msra.mxu0 %v9084_v53  ;;  %v4669_v53 = vld [vmem:[#allocation5 + $0x880] sm:$0xff] }
 0x584   :  { %6103 = vmatprep.subr.bf16.mxu0 %v8033_v59  ;;  %v4533_v59 = vld [vmem:[#allocation5 + $0x440] sm:$0xff] }
 0x606   :  { %v3868_v3 = vpop.f32.mrf.mxu0 }
 0x607   :  { %v3869_v4 = vadd.f32 %v7887_v10, %v3868_v3 }
 0x608   :  { %v8438_v5 = vpop.f32.mrf.mxu0 }
 0x609   :  { %v3874_v6 = vmax.f32 %v3869_v4, 0.0 }
 0x60a   :  { %v3871_v16 = vpop.f32.mrf.mxu0 }
 0x60b   :  { %v3875_v17 = vpack.c.bf16 %v3874_v6, %v3874_v6  ;;  %v4573_v16 = vld [vmem:[#allocation5 + $0x580] sm:$0xff] }
 0x60c   :  { %v8439_v20 = vpop.f32.mrf.mxu0 }
 0x60d   :  { %4017 = vmatmul.mubr.bf16.vlgmr.msra.gmra.mxu1 %v3875_v17  ;;  %v4577_v17 = vld [vmem:[#allocation5 + $0x5a0] sm:$0xff] }
 0x60e   :  { %4477 = vmatpush1.bf16.msra.mxu1 %v8997_v54  ;;  %v4705_v20 = vld [vmem:[#allocation5 + $0x9a0] sm:$0xff] }
 0x60f   :  { %4478 = vmatprep.subr.bf16.mxu1 %v9005_v48  ;;  %v4701_v48 = vld [vmem:[#allocation5 + $0x980] sm:$0xff] }
 0x612   :  { %4479 = vmatpush1.bf16.msra.mxu1 %v9003_v50 }
 0x613   :  { %4480 = vmatprep.subr.bf16.mxu1 %v9011_v21 }
 0x616   :  { %4481 = vmatpush1.bf16.msra.mxu1 %v9009_v22 }
 0x617   :  { %4482 = vmatprep.subr.bf16.mxu1 %v9017_v8  ;;  %v8025_v8 = vcombine.high %v4573_v16, %v4577_v17 }
 0x61a   :  { %4483 = vmatpush1.bf16.msra.mxu1 %v9015_v23  ;;  %v8153_v23 = vcombine.high %v4701_v48, %v4705_v20 }
 0x61b   :  { %4484 = vmatprep.subr.bf16.mxu1 %v9023_v24  ;;  %v4565_v24 = vld [vmem:[#allocation5 + $0x540] sm:$0xff] }
 0x61e   :  { %4485 = vmatpush1.bf16.msra.mxu1 %v9021_v51  ;;  %v4569_v51 = vld [vmem:[#allocation5 + $0x560] sm:$0xff] }
 0x61f   :  { %4486 = vmatprep.subr.bf16.mxu1 %v9029_v13  ;;  %v4693_v13 = vld [vmem:[#allocation5 + $0x940] sm:$0xff] }
 0x622   :  { %4487 = vmatpush1.bf16.msra.mxu1 %v9027_v25  ;;  %v4697_v25 = vld [vmem:[#allocation5 + $0x960] sm:$0xff] }
 0x623   :  { %4488 = vmatprep.subr.bf16.mxu1 %v9035_v26  ;;  %v8024_v26 = vcombine.low %v4573_v16, %v4577_v17 }
 0x626   :  { %4489 = vmatpush1.bf16.msra.mxu1 %v9033_v27  ;;  %v8152_v27 = vcombine.low %v4701_v48, %v4705_v20  ;;  %v4645_v48 = vld [vmem:[#allocation5 + $0x7c0] sm:$0xff] }
 0x627   :  { %4490 = vmatprep.subr.bf16.mxu1 %v9041_v28  ;;  %v8017_v28 = vcombine.high %v4565_v24, %v4569_v51  ;;  %v4649_v20 = vld [vmem:[#allocation5 + $0x7e0] sm:$0xff] }
 0x62a   :  { %4491 = vmatpush1.bf16.msra.mxu1 %v9039_v29  ;;  %v8145_v29 = vcombine.high %v4693_v13, %v4697_v25 }
 0x62b   :  { %4492 = vmatprep.subr.bf16.mxu1 %v9047_v30  ;;  %v4557_v30 = vld [vmem:[#allocation5 + $0x500] sm:$0xff] }
 0x62e   :  { %4493 = vmatpush2.bf16.msra.mxu1 %v9045_v38  ;;  %v4561_v38 = vld [vmem:[#allocation5 + $0x520] sm:$0xff] }
 0x62f   :  { %4494 = vmatprep.subr.bf16.mxu1 %v9053_v31  ;;  %v4685_v31 = vld [vmem:[#allocation5 + $0x900] sm:$0xff]  ;;  %v8008_v40 = vcombine.low %v4557_v30, %v4561_v38 }
 0x632   :  { %4495 = vmatpush2.bf16.msra.mxu1 %v9051_v32  ;;  %v4689_v32 = vld [vmem:[#allocation5 + $0x920] sm:$0xff] }
 0x633   :  { %4496 = vmatprep.subr.bf16.mxu1 %v9059_v41  ;;  %v8016_v41 = vcombine.low %v4565_v24, %v4569_v51  ;;  %v4637_v51 = vld [vmem:[#allocation5 + $0x780] sm:$0xff] }
 0x636   :  { %4497 = vmatpush2.bf16.msra.mxu1 %v9057_v33  ;;  %v8144_v33 = vcombine.low %v4693_v13, %v4697_v25  ;;  %v4641_v13 = vld [vmem:[#allocation5 + $0x7a0] sm:$0xff] }
 0x637   :  { %4498 = vmatprep.subr.bf16.mxu1 %v9065_v35  ;;  %v8009_v35 = vcombine.high %v4557_v30, %v4561_v38  ;;  %v4765_v25 = vld [vmem:[#allocation5 + $0xb80] sm:$0xff] }
 0x638   :  { %v4629_v38 = vld [vmem:[#allocation5 + $0x740] sm:$0xff] }
 0x63a   :  { %4499 = vmatpush2.bf16.msra.mxu1 %v9063_v42  ;;  %v8137_v42 = vcombine.high %v4685_v31, %v4689_v32 }
 0x63b   :  { %4500 = vmatprep.subr.bf16.mxu1 %v9071_v57  ;;  %v4549_v57 = vld [vmem:[#allocation5 + $0x4c0] sm:$0xff] }
 0x63e   :  { %4501 = vmatpush2.bf16.msra.mxu1 %v9069_v44  ;;  %v4553_v44 = vld [vmem:[#allocation5 + $0x4e0] sm:$0xff] }
 0x63f   :  { %4502 = vmatprep.subr.bf16.mxu1 %v9077_v45  ;;  %v4677_v45 = vld [vmem:[#allocation5 + $0x8c0] sm:$0xff]  ;;  %v8001_v37 = vcombine.high %v4549_v57, %v4553_v44  ;;  %v8000_v18 = vcombine.low %v4549_v57, %v4553_v44 }
 0x640   :  { %v4621_v44 = vld [vmem:[#allocation5 + $0x700] sm:$0xff] }
 0x642   :  { %4503 = vmatpush2.bf16.msra.mxu1 %v9075_v46  ;;  %v4681_v46 = vld [vmem:[#allocation5 + $0x8e0] sm:$0xff] }
 0x643   :  { %4504 = vmatprep.subr.bf16.mxu1 %v9083_v47  ;;  %v8136_v47 = vcombine.low %v4685_v31, %v4689_v32  ;;  %v8128_v56 = vcombine.low %v4677_v45, %v4681_v46  ;;  %v4633_v31 = vld [vmem:[#allocation5 + $0x760] sm:$0xff] }
 0x644   :  { %v4757_v32 = vld [vmem:[#allocation5 + $0xb40] sm:$0xff] }
 0x646   :  { %4505 = vmatpush2.bf16.msra.mxu1 %v9081_v49  ;;  %v8129_v49 = vcombine.high %v4677_v45, %v4681_v46  ;;  %v4625_v45 = vld [vmem:[#allocation5 + $0x720] sm:$0xff] }
 0x647   :  { %4506 = vmatprep.subr.bf16.mxu1 %v9089_v52  ;;  %v4545_v52 = vld [vmem:[#allocation5 + $0x4a0] sm:$0xff] }
 0x648   :  { %v7993_v58 = vcombine.high %v4541_v19, %v4545_v52  ;;  %v7992_v63 = vcombine.low %v4541_v19, %v4545_v52  ;;  %v4749_v46 = vld [vmem:[#allocation5 + $0xb00] sm:$0xff] }
 0x649   :  { %v4613_v52 = vld [vmem:[#allocation5 + $0x6c0] sm:$0xff] }
 0x64a   :  { %4507 = vmatpush2.bf16.msra.mxu1 %v9087_v55  ;;  %v4673_v55 = vld [vmem:[#allocation5 + $0x8a0] sm:$0xff] }
 0x64b   :  { %6144 = vmatprep.subr.bf16.mxu1 %v8161_v62  ;;  %v4665_v62 = vld [vmem:[#allocation5 + $0x860] sm:$0xff] }
 0x6cd   :  { %v4018_v2 = vpop.f32.mrf.mxu1 }
 0x6ce   :  { %v4019_v10 = vadd.f32 %v4018_v2, %v3897_v0  ;;  %v8120_v0 = vcombine.low %v4669_v53, %v4673_v55 }
 0x6cf   :  { %v4020_v3 = vpop.f32.mrf.mxu1 }
 0x6d0   :  { %v4021_v4 = vadd.f32 %v4020_v3, %v3901_v1  ;;  %v4025_v5 = vmax.f32 %v4019_v10, 0.0  ;;  %v7985_v1 = vcombine.high %v4533_v59, %v4537_v60  ;;  %v4525_v10 = vld [vmem:[#allocation5 + $0x400] sm:$0xff] }
 0x6d1   :  { %v4022_v6 = vpop.f32.mrf.mxu1  ;;  %v4529_v3 = vld [vmem:[#allocation5 + $0x420] sm:$0xff] }
 0x6d2   :  { %v4026_v54 = vmax.f32 %v4021_v4, 0.0  ;;  %v4027_v22 = vpack.c.bf16 %v4025_v5, %v4025_v5  ;;  %v4653_v4 = vld [vmem:[#allocation5 + $0x800] sm:$0xff]  ;;  %v7984_v6 = vcombine.low %v4533_v59, %v4537_v60 }
 0x6d3   :  { %v4023_v50 = vpop.f32.mrf.mxu1  ;;  %v4657_v5 = vld [vmem:[#allocation5 + $0x820] sm:$0xff] }
 0x6d4   :  { %v4028_v21 = vpack.c.bf16 %v4026_v54, %v4026_v54  ;;  %v7977_v54 = vcombine.high %v4525_v10, %v4529_v3  ;;  %v8105_v17 = vcombine.high %v4653_v4, %v4657_v5  ;;  %v4773_v50 = vld [vmem:[#allocation5 + $0xbc0] sm:$0xff] }
 0x6d5   :  { %v4605_v60 = vld [vmem:[#allocation5 + $0x680] sm:$0xff] }
 0x6d6   :  { %4467 = vmatprep.mubr.bf16.mxu0 %v4028_v21  ;;  %4508 = vmatprep.mubr.bf16.mxu1 %v4028_v21  ;;  %v4777_v21 = vld [vmem:[#allocation5 + $0xbe0] sm:$0xff] }
 0x6d7   :  { %4468 = vmatmul.mubr.bf16.vlgmr.msra.gmra.mxu0 %v4027_v22  ;;  %4509 = vmatmul.mubr.bf16.vlgmr.msra.gmra.mxu1 %v4027_v22  ;;  %v7976_v22 = vcombine.low %v4525_v10, %v4529_v3  ;;  %v8225_v24 = vcombine.high %v4773_v50, %v4777_v21 }
 0x6d8   :  { %6104 = vmatpush1.bf16.msra.mxu0 %v8032_v7  ;;  %6145 = vmatpush1.bf16.msra.mxu1 %v8160_v61  ;;  %v8121_v7 = vcombine.high %v4669_v53, %v4673_v55  ;;  %v4661_v61 = vld [vmem:[#allocation5 + $0x840] sm:$0xff] }
 0x6d9   :  { %6105 = vmatprep.subr.bf16.mxu0 %v8025_v8  ;;  %6146 = vmatprep.subr.bf16.mxu1 %v8153_v23  ;;  %v8113_v2 = vcombine.high %v4661_v61, %v4665_v62  ;;  %v8112_v16 = vcombine.low %v4661_v61, %v4665_v62  ;;  %v8104_v8 = vcombine.low %v4653_v4, %v4657_v5  ;;  %v4617_v53 = vld [vmem:[#allocation5 + $0x6e0] sm:$0xff] }
 0x6da   :  { %v8097_v23 = vcombine.high %v4645_v48, %v4649_v20  ;;  %v4741_v55 = vld [vmem:[#allocation5 + $0xac0] sm:$0xff] }
 0x6db   :  { %v4609_v61 = vld [vmem:[#allocation5 + $0x6a0] sm:$0xff] }
 0x6dc   :  { %6106 = vmatpush1.bf16.msra.mxu0 %v8024_v26  ;;  %6147 = vmatpush1.bf16.msra.mxu1 %v8152_v27  ;;  %v4769_v26 = vld [vmem:[#allocation5 + $0xba0] sm:$0xff]  ;;  %v8096_v27 = vcombine.low %v4645_v48, %v4649_v20  ;;  %v8056_v3 = vcombine.low %v4605_v60, %v4609_v61 }
 0x6dd   :  { %6107 = vmatprep.subr.bf16.mxu0 %v8017_v28  ;;  %6148 = vmatprep.subr.bf16.mxu1 %v8145_v29  ;;  %v8224_v28 = vcombine.low %v4773_v50, %v4777_v21  ;;  %v8089_v29 = vcombine.high %v4637_v51, %v4641_v13  ;;  %v8217_v30 = vcombine.high %v4765_v25, %v4769_v26  ;;  %v4733_v62 = vld [vmem:[#allocation5 + $0xa80] sm:$0xff] }
 0x6de   :  { %v4597_v5 = vld [vmem:[#allocation5 + $0x640] sm:$0xff] }
 0x6df   :  { %v4589_v21 = vld [vmem:[#allocation5 + $0x600] sm:$0xff] }
 0x6e0   :  { %6108 = vmatpush1.bf16.msra.mxu0 %v8016_v41  ;;  %6149 = vmatpush1.bf16.msra.mxu1 %v8144_v33  ;;  %v4761_v41 = vld [vmem:[#allocation5 + $0xb60] sm:$0xff]  ;;  %v8088_v33 = vcombine.low %v4637_v51, %v4641_v13 }
 0x6e1   :  { %6109 = vmatprep.subr.bf16.mxu0 %v8009_v35  ;;  %6150 = vmatprep.subr.bf16.mxu1 %v8137_v42  ;;  %v8216_v35 = vcombine.low %v4765_v25, %v4769_v26  ;;  %v8081_v42 = vcombine.high %v4629_v38, %v4633_v31  ;;  %v8209_v57 = vcombine.high %v4757_v32, %v4761_v41  ;;  %v4582_v26 = vld [vmem:[#allocation5 + $0x5c8] sm:$0xff] }
 0x6e4   :  { %6110 = vmatpush1.bf16.msra.mxu0 %v8008_v40  ;;  %6151 = vmatpush1.bf16.msra.mxu1 %v8136_v47  ;;  %v4753_v40 = vld [vmem:[#allocation5 + $0xb20] sm:$0xff]  ;;  %v8080_v47 = vcombine.low %v4629_v38, %v4633_v31  ;;  %v4714_v38 = vld [vmem:[#allocation5 + $0x9e8] sm:$0xff] }
 0x6e5   :  { %6111 = vmatprep.subr.bf16.mxu0 %v8001_v37  ;;  %6152 = vmatprep.subr.bf16.mxu1 %v8129_v49  ;;  %v8208_v37 = vcombine.low %v4757_v32, %v4761_v41  ;;  %v8073_v49 = vcombine.high %v4621_v44, %v4625_v45  ;;  %v8201_v19 = vcombine.high %v4749_v46, %v4753_v40  ;;  %v4093_v41 = vld [vmem:[#allocation11 + $0x13] sm:$0xf] }
 0x6e8   :  { %6112 = vmatpush1.bf16.msra.mxu0 %v8000_v18  ;;  %6153 = vmatpush1.bf16.msra.mxu1 %v8128_v56  ;;  %v4745_v18 = vld [vmem:[#allocation5 + $0xae0] sm:$0xff]  ;;  %v8072_v56 = vcombine.low %v4621_v44, %v4625_v45 }
 0x6e9   :  { %6113 = vmatprep.subr.bf16.mxu0 %v7993_v58  ;;  %6154 = vmatprep.subr.bf16.mxu1 %v8121_v7  ;;  %v8200_v58 = vcombine.low %v4749_v46, %v4753_v40  ;;  %v8065_v7 = vcombine.high %v4613_v52, %v4617_v53  ;;  %v8193_v59 = vcombine.high %v4741_v55, %v4745_v18 }
 0x6ec   :  { %6114 = vmatpush1.bf16.msra.mxu0 %v7992_v63  ;;  %6155 = vmatpush1.bf16.msra.mxu1 %v8120_v0  ;;  %v4737_v63 = vld [vmem:[#allocation5 + $0xaa0] sm:$0xff]  ;;  %v8064_v0 = vcombine.low %v4613_v52, %v4617_v53 }
 0x6ed   :  { %6115 = vmatprep.subr.bf16.mxu0 %v7985_v1  ;;  %6156 = vmatprep.subr.bf16.mxu1 %v8113_v2  ;;  %v8192_v1 = vcombine.low %v4741_v55, %v4745_v18  ;;  %v8057_v2 = vcombine.high %v4605_v60, %v4609_v61  ;;  %v8185_v10 = vcombine.high %v4733_v62, %v4737_v63  ;;  %v4578_v61 = vld [vmem:[#allocation5 + $0x5a8] sm:$0xff] }
 0x6ee   :  { %v8184_v4 = vcombine.low %v4733_v62, %v4737_v63  ;;  %v4702_v62 = vld [vmem:[#allocation5 + $0x988] sm:$0xff] }
 0x6ef   :  { %v4706_v63 = vld [vmem:[#allocation5 + $0x9a8] sm:$0xff] }
 0x6f0   :  { %6116 = vmatpush1.bf16.msra.mxu0 %v7984_v6  ;;  %6157 = vmatpush1.bf16.msra.mxu1 %v8112_v16  ;;  %v4601_v6 = vld [vmem:[#allocation5 + $0x660] sm:$0xff] }
 0x6f1   :  { %6117 = vmatprep.subr.bf16.mxu0 %v7977_v54  ;;  %6158 = vmatprep.subr.bf16.mxu1 %v8105_v17  ;;  %v4725_v16 = vld [vmem:[#allocation5 + $0xa40] sm:$0xff]  ;;  %v8049_v54 = vcombine.high %v4597_v5, %v4601_v6  ;;  %v8048_v48 = vcombine.low %v4597_v5, %v4601_v6  ;;  %v8155_v5 = vcombine.high %v4702_v62, %v4706_v63  ;;  %v4570_v6 = vld [vmem:[#allocation5 + $0x568] sm:$0xff] }
 0x6f2   :  { %v4729_v17 = vld [vmem:[#allocation5 + $0xa60] sm:$0xff] }
 0x6f3   :  { %v8176_v20 = vcombine.low %v4725_v16, %v4729_v17  ;;  %v8177_v50 = vcombine.high %v4725_v16, %v4729_v17  ;;  %v4694_v16 = vld [vmem:[#allocation5 + $0x948] sm:$0xff] }
 0x6f4   :  { %6118 = vmatpush1.bf16.msra.mxu0 %v7976_v22  ;;  %6159 = vmatpush1.bf16.msra.mxu1 %v8104_v8  ;;  %v4593_v22 = vld [vmem:[#allocation5 + $0x620] sm:$0xff] }
 0x6f5   :  { %6119 = vmatprep.subr.bf16.mxu0 %v8097_v23  ;;  %6160 = vmatprep.subr.bf16.mxu1 %v8225_v24  ;;  %v4717_v8 = vld [vmem:[#allocation5 + $0xa00] sm:$0xff]  ;;  %v8041_v23 = vcombine.high %v4589_v21, %v4593_v22  ;;  %v8040_v51 = vcombine.low %v4589_v21, %v4593_v22  ;;  %v4558_v21 = vld [vmem:[#allocation5 + $0x508] sm:$0xff] }
 0x6f6   :  { %v4721_v24 = vld [vmem:[#allocation5 + $0xa20] sm:$0xff]  ;;  %v4562_v22 = vld [vmem:[#allocation5 + $0x528] sm:$0xff] }
 0x6f7   :  { %v8168_v13 = vcombine.low %v4717_v8, %v4721_v24  ;;  %v8169_v25 = vcombine.high %v4717_v8, %v4721_v24  ;;  %v4686_v8 = vld [vmem:[#allocation5 + $0x908] sm:$0xff] }
 0x6f8   :  { %6120 = vmatpush2.bf16.msra.mxu0 %v8096_v27  ;;  %6161 = vmatpush2.bf16.msra.mxu1 %v8224_v28  ;;  %v4586_v27 = vld [vmem:[#allocation5 + $0x5e8] sm:$0xff] }
 0x6f9   :  { %6121 = vmatprep.subr.bf16.mxu0 %v8089_v29  ;;  %6162 = vmatprep.subr.bf16.mxu1 %v8217_v30  ;;  %v4710_v28 = vld [vmem:[#allocation5 + $0x9c8] sm:$0xff]  ;;  %v8034_v29 = vcombine.low %v4582_v26, %v4586_v27  ;;  %v8035_v30 = vcombine.high %v4582_v26, %v4586_v27 }
 0x6fa   :  { %v8162_v31 = vcombine.low %v4710_v28, %v4714_v38  ;;  %v8163_v32 = vcombine.high %v4710_v28, %v4714_v38  ;;  %v4550_v26 = vld [vmem:[#allocation5 + $0x4c8] sm:$0xff] }
 0x6fb   :  { %v4554_v27 = vld [vmem:[#allocation5 + $0x4e8] sm:$0xff] }
 0x6fc   :  { %6122 = vmatpush2.bf16.msra.mxu0 %v8088_v33  ;;  %6163 = vmatpush2.bf16.msra.mxu1 %v8216_v35  ;;  %v4098_v33 = vrot.slane %v4093_v41, %v9520_v11  ;;  %v4106_v35 = vrot.slane %v4093_v41, %v9523_v12  ;;  %v4678_v28 = vld [vmem:[#allocation5 + $0x8c8] sm:$0xff] }
 0x6fd   :  { %6123 = vmatprep.subr.bf16.mxu0 %v8081_v42  ;;  %6164 = vmatprep.subr.bf16.mxu1 %v8209_v57  ;;  %v4102_v42 = vrot.slane %v4093_v41, %v9526_v14  ;;  %v4110_v57 = vrot.slane %v4093_v41, %v9529_v15  ;;  %v4542_v41 = vld [vmem:[#allocation5 + $0x488] sm:$0xff] }
 0x700   :  { %6124 = vmatpush2.bf16.msra.mxu0 %v8080_v47  ;;  %6165 = vmatpush2.bf16.msra.mxu1 %v8208_v37 }
 0x701   :  { %6125 = vmatprep.subr.bf16.mxu0 %v8073_v49  ;;  %6166 = vmatprep.subr.bf16.mxu1 %v8201_v19 }
 0x704   :  { %6126 = vmatpush2.bf16.msra.mxu0 %v8072_v56  ;;  %6167 = vmatpush2.bf16.msra.mxu1 %v8200_v58 }
 0x705   :  { %6127 = vmatprep.subr.bf16.mxu0 %v8065_v7  ;;  %6168 = vmatprep.subr.bf16.mxu1 %v8193_v59  ;;  %v4574_v7 = vld [vmem:[#allocation5 + $0x588] sm:$0xff] }
 0x706   :  { %v8026_v17 = vcombine.low %v4574_v7, %v4578_v61 }
 0x708   :  { %6128 = vmatpush2.bf16.msra.mxu0 %v8064_v0  ;;  %6169 = vmatpush2.bf16.msra.mxu1 %v8192_v1 }
 0x709   :  { %6129 = vmatprep.subr.bf16.mxu0 %v8057_v2  ;;  %6170 = vmatprep.subr.bf16.mxu1 %v8185_v10 }
 0x70c   :  { %6130 = vmatpush2.bf16.msra.mxu0 %v8056_v3  ;;  %6171 = vmatpush2.bf16.msra.mxu1 %v8184_v4  ;;  %v4566_v3 = vld [vmem:[#allocation5 + $0x548] sm:$0xff]  ;;  %v8027_v4 = vcombine.high %v4574_v7, %v4578_v61 }
 0x70d   :  { %6131 = vmatprep.subr.bf16.mxu0 %v8049_v54  ;;  %6172 = vmatprep.subr.bf16.mxu1 %v8177_v50  ;;  %v4698_v54 = vld [vmem:[#allocation5 + $0x968] sm:$0xff]  ;;  %v8018_v24 = vcombine.low %v4566_v3, %v4570_v6 }
 0x70e   :  { %v8147_v50 = vcombine.high %v4694_v16, %v4698_v54  ;;  %v4658_v7 = vld [vmem:[#allocation5 + $0x828] sm:$0xff] }
 0x710   :  { %6132 = vmatpush2.bf16.msra.mxu0 %v8048_v48  ;;  %6173 = vmatpush2.bf16.msra.mxu1 %v8176_v20  ;;  %v8154_v48 = vcombine.low %v4702_v62, %v4706_v63  ;;  %v8019_v20 = vcombine.high %v4566_v3, %v4570_v6  ;;  %v4646_v63 = vld [vmem:[#allocation5 + $0x7c8] sm:$0xff] }
 0x711   :  { %6133 = vmatprep.subr.bf16.mxu0 %v8041_v23  ;;  %6174 = vmatprep.subr.bf16.mxu1 %v8169_v25  ;;  %v4690_v23 = vld [vmem:[#allocation5 + $0x928] sm:$0xff] }
 0x712   :  { %v8139_v25 = vcombine.high %v4686_v8, %v4690_v23  ;;  %v8138_v38 = vcombine.low %v4686_v8, %v4690_v23  ;;  %v4650_v3 = vld [vmem:[#allocation5 + $0x7e8] sm:$0xff] }
 0x714   :  { %6134 = vmatpush2.bf16.msra.mxu0 %v8040_v51  ;;  %6175 = vmatpush2.bf16.msra.mxu1 %v8168_v13  ;;  %v8146_v51 = vcombine.low %v4694_v16, %v4698_v54  ;;  %v8011_v13 = vcombine.high %v4558_v21, %v4562_v22  ;;  %v8099_v54 = vcombine.high %v4646_v63, %v4650_v3 }
 0x715   :  { %6185 = vmatprep.subr.bf16.mxu0 %v8035_v30  ;;  %6226 = vmatprep.subr.bf16.mxu1 %v8163_v32  ;;  %v8010_v30 = vcombine.low %v4558_v21, %v4562_v22  ;;  %v4770_v21 = vld [vmem:[#allocation5 + $0xba8] sm:$0xff]  ;;  %v8098_v22 = vcombine.low %v4646_v63, %v4650_v3 }
 0x716   :  { %v4730_v63 = vld [vmem:[#allocation5 + $0xa68] sm:$0xff] }
 0x797   :  { %v4469_v44 = vpop.f32.mrf.mxu0  ;;  %v4510_v45 = vpop.f32.mrf.mxu1 }
 0x798   :  { %v4470_v46 = vadd.f32 %v4469_v44, %v4098_v33  ;;  %v4511_v40 = vadd.f32 %v4510_v45, %v4106_v35  ;;  %v4546_v33 = vld [vmem:[#allocation5 + $0x4a8] sm:$0xff] }
 0x799   :  { %v4471_v47 = vpop.f32.mrf.mxu0  ;;  %v4512_v37 = vpop.f32.mrf.mxu1  ;;  %v4670_v35 = vld [vmem:[#allocation5 + $0x888] sm:$0xff]  ;;  %v7995_v45 = vcombine.high %v4542_v41, %v4546_v33 }
 0x79a   :  { %v4472_v49 = vadd.f32 %v4471_v47, %v4102_v42  ;;  %v4513_v19 = vadd.f32 %v4512_v37, %v4110_v57  ;;  %v4517_v52 = vmax.f32 %v4470_v46, 0.0  ;;  %v4519_v53 = vmax.f32 %v4511_v40, 0.0  ;;  %v4674_v42 = vld [vmem:[#allocation5 + $0x8a8] sm:$0xff] }
 0x79b   :  { %v4473_v55 = vpop.f32.mrf.mxu0  ;;  %v4514_v18 = vpop.f32.mrf.mxu1  ;;  %v8002_v57 = vcombine.low %v4550_v26, %v4554_v27  ;;  %v8123_v46 = vcombine.high %v4670_v35, %v4674_v42  ;;  %v4534_v40 = vld [vmem:[#allocation5 + $0x448] sm:$0xff] }
 0x79c   :  { %v4518_v56 = vmax.f32 %v4472_v49, 0.0  ;;  %v4520_v58 = vmax.f32 %v4513_v19, 0.0  ;;  %v9639_v2 = vpack.c.bf16 %v4517_v52, %v4517_v52  ;;  %v9641_v10 = vpack.c.bf16 %v4519_v53, %v4519_v53  ;;  %v4538_v47 = vld [vmem:[#allocation5 + $0x468] sm:$0xff] }
 0x79d   :  { %v4474_v59 = vpop.f32.mrf.mxu0  ;;  %v4515_v60 = vpop.f32.mrf.mxu1  ;;  %v4662_v37 = vld [vmem:[#allocation5 + $0x848] sm:$0xff]  ;;  %v7994_v19 = vcombine.low %v4542_v41, %v4546_v33  ;;  %v8122_v52 = vcombine.low %v4670_v35, %v4674_v42  ;;  %v7987_v53 = vcombine.high %v4534_v40, %v4538_v47 }
 0x79e   :  { %v9635_v0 = vpack.c.bf16 %v4518_v56, %v4518_v56  ;;  %v9637_v1 = vpack.c.bf16 %v4520_v58, %v4520_v58  ;;  %v4666_v49 = vld [vmem:[#allocation5 + $0x868] sm:$0xff]  ;;  %v7986_v59 = vcombine.low %v4534_v40, %v4538_v47 }
 0x79f   :  { %v8115_v55 = vcombine.high %v4662_v37, %v4666_v49  ;;  %v4526_v18 = vld [vmem:[#allocation5 + $0x408] sm:$0xff]  ;;  %v8114_v60 = vcombine.low %v4662_v37, %v4666_v49 }
 0x7a0   :  { %6135 = vmatprep.mubr.bf16.mxu0 %v9635_v0  ;;  %6176 = vmatprep.mubr.bf16.mxu1 %v9637_v1  ;;  %v4530_v56 = vld [vmem:[#allocation5 + $0x428] sm:$0xff] }
 0x7a1   :  { %6136 = vmatmul.mubr.bf16.vlgmr.msra.gmra.mxu0 %v9639_v2  ;;  %6177 = vmatmul.mubr.bf16.vlgmr.msra.gmra.mxu1 %v9641_v10  ;;  %v4654_v58 = vld [vmem:[#allocation5 + $0x808] sm:$0xff]  ;;  %v7979_v61 = vcombine.high %v4526_v18, %v4530_v56  ;;  %v7978_v6 = vcombine.low %v4526_v18, %v4530_v56 }
 0x7a2   :  { %6186 = vmatpush1.bf16.msra.mxu0 %v8034_v29  ;;  %6227 = vmatpush1.bf16.msra.mxu1 %v8162_v31  ;;  %v4682_v29 = vld [vmem:[#allocation5 + $0x8e8] sm:$0xff]  ;;  %v8003_v31 = vcombine.high %v4550_v26, %v4554_v27  ;;  %v8107_v62 = vcombine.high %v4654_v58, %v4658_v7  ;;  %v8106_v16 = vcombine.low %v4654_v58, %v4658_v7 }
 0x7a3   :  { %6217 = vmatprep.mubr.bf16.mxu0 %v9635_v0  ;;  %6258 = vmatprep.mubr.bf16.mxu1 %v9637_v1  ;;  %v8131_v32 = vcombine.high %v4678_v28, %v4682_v29  ;;  %v8130_v44 = vcombine.low %v4678_v28, %v4682_v29  ;;  %v4762_v26 = vld [vmem:[#allocation5 + $0xb68] sm:$0xff] }
 0x7a4   :  { %6187 = vmatprep.subr.bf16.mxu0 %v8027_v4  ;;  %6228 = vmatprep.subr.bf16.mxu1 %v8155_v5  ;;  %v4774_v4 = vld [vmem:[#allocation5 + $0xbc8] sm:$0xff] }
 0x7a5   :  { %v4778_v5 = vld [vmem:[#allocation5 + $0xbe8] sm:$0xff] }
 0x7a6   :  { %6188 = vmatpush1.bf16.msra.mxu0 %v8026_v17  ;;  %6229 = vmatpush1.bf16.msra.mxu1 %v8154_v48  ;;  %v8227_v17 = vcombine.high %v4774_v4, %v4778_v5  ;;  %v4638_v48 = vld [vmem:[#allocation5 + $0x788] sm:$0xff]  ;;  %v8226_v8 = vcombine.low %v4774_v4, %v4778_v5 }
 0x7a7   :  { %6189 = vmatprep.subr.bf16.mxu0 %v8019_v20  ;;  %6230 = vmatprep.subr.bf16.mxu1 %v8147_v50  ;;  %v4642_v20 = vld [vmem:[#allocation5 + $0x7a8] sm:$0xff] }
 0x7a8   :  { %v4766_v50 = vld [vmem:[#allocation5 + $0xb88] sm:$0xff]  ;;  %v8091_v23 = vcombine.high %v4638_v48, %v4642_v20  ;;  %v8090_v27 = vcombine.low %v4638_v48, %v4642_v20 }
 0x7a9   :  { %v8218_v28 = vcombine.low %v4766_v50, %v4770_v21  ;;  %v4754_v41 = vld [vmem:[#allocation5 + $0xb28] sm:$0xff] }
 0x7aa   :  { %6190 = vmatpush1.bf16.msra.mxu0 %v8018_v24  ;;  %6231 = vmatpush1.bf16.msra.mxu1 %v8146_v51  ;;  %v8219_v24 = vcombine.high %v4766_v50, %v4770_v21  ;;  %v4630_v51 = vld [vmem:[#allocation5 + $0x748] sm:$0xff] }
 0x7ab   :  { %6191 = vmatprep.subr.bf16.mxu0 %v8011_v13  ;;  %6232 = vmatprep.subr.bf16.mxu1 %v8139_v25  ;;  %v4634_v13 = vld [vmem:[#allocation5 + $0x768] sm:$0xff] }
 0x7ac   :  { %v4758_v25 = vld [vmem:[#allocation5 + $0xb48] sm:$0xff]  ;;  %v8083_v29 = vcombine.high %v4630_v51, %v4634_v13  ;;  %v8082_v33 = vcombine.low %v4630_v51, %v4634_v13  ;;  %v4715_v51 = vld [vmem:[#allocation5 + $0x9f0] sm:$0xff] }
 0x7ad   :  { %v8210_v35 = vcombine.low %v4758_v25, %v4762_v26  ;;  %v4746_v40 = vld [vmem:[#allocation5 + $0xae8] sm:$0xff] }
 0x7ae   :  { %6192 = vmatpush1.bf16.msra.mxu0 %v8010_v30  ;;  %6233 = vmatpush1.bf16.msra.mxu1 %v8138_v38  ;;  %v8211_v30 = vcombine.high %v4758_v25, %v4762_v26  ;;  %v4622_v38 = vld [vmem:[#allocation5 + $0x708] sm:$0xff] }
 0x7af   :  { %6193 = vmatprep.subr.bf16.mxu0 %v8003_v31  ;;  %6234 = vmatprep.subr.bf16.mxu1 %v8131_v32  ;;  %v4626_v31 = vld [vmem:[#allocation5 + $0x728] sm:$0xff] }
 0x7b0   :  { %v4750_v32 = vld [vmem:[#allocation5 + $0xb08] sm:$0xff]  ;;  %v8075_v42 = vcombine.high %v4622_v38, %v4626_v31  ;;  %v8074_v47 = vcombine.low %v4622_v38, %v4626_v31  ;;  %v4707_v38 = vld [vmem:[#allocation5 + $0x9b0] sm:$0xff] }
 0x7b1   :  { %v8202_v37 = vcombine.low %v4750_v32, %v4754_v41  ;;  %v4738_v18 = vld [vmem:[#allocation5 + $0xaa8] sm:$0xff] }
 0x7b2   :  { %6194 = vmatpush1.bf16.msra.mxu0 %v8002_v57  ;;  %6235 = vmatpush1.bf16.msra.mxu1 %v8130_v44  ;;  %v8203_v57 = vcombine.high %v4750_v32, %v4754_v41  ;;  %v4614_v44 = vld [vmem:[#allocation5 + $0x6c8] sm:$0xff] }
 0x7b3   :  { %6195 = vmatprep.subr.bf16.mxu0 %v7995_v45  ;;  %6236 = vmatprep.subr.bf16.mxu1 %v8123_v46  ;;  %v4618_v45 = vld [vmem:[#allocation5 + $0x6e8] sm:$0xff] }
 0x7b4   :  { %v4742_v46 = vld [vmem:[#allocation5 + $0xac8] sm:$0xff]  ;;  %v8067_v49 = vcombine.high %v4614_v44, %v4618_v45  ;;  %v8066_v56 = vcombine.low %v4614_v44, %v4618_v45  ;;  %v4699_v44 = vld [vmem:[#allocation5 + $0x970] sm:$0xff] }
 0x7b5   :  { %v8194_v58 = vcombine.low %v4742_v46, %v4746_v40  ;;  %v4722_v48 = vld [vmem:[#allocation5 + $0xa28] sm:$0xff] }
 0x7b6   :  { %6196 = vmatpush1.bf16.msra.mxu0 %v7994_v19  ;;  %6237 = vmatpush1.bf16.msra.mxu1 %v8122_v52  ;;  %v8195_v19 = vcombine.high %v4742_v46, %v4746_v40  ;;  %v4606_v52 = vld [vmem:[#allocation5 + $0x688] sm:$0xff] }
 0x7b7   :  { %6197 = vmatprep.subr.bf16.mxu0 %v7987_v53  ;;  %6238 = vmatprep.subr.bf16.mxu1 %v8115_v55  ;;  %v4610_v53 = vld [vmem:[#allocation5 + $0x6a8] sm:$0xff] }
 0x7b8   :  { %v4734_v55 = vld [vmem:[#allocation5 + $0xa88] sm:$0xff]  ;;  %v8059_v7 = vcombine.high %v4606_v52, %v4610_v53  ;;  %v8058_v3 = vcombine.low %v4606_v52, %v4610_v53  ;;  %v4691_v52 = vld [vmem:[#allocation5 + $0x930] sm:$0xff] }
 0x7b9   :  { %v8186_v4 = vcombine.low %v4734_v55, %v4738_v18 }
 0x7ba   :  { %6198 = vmatpush1.bf16.msra.mxu0 %v7986_v59  ;;  %6239 = vmatpush1.bf16.msra.mxu1 %v8114_v60  ;;  %v8187_v59 = vcombine.high %v4734_v55, %v4738_v18  ;;  %v4598_v60 = vld [vmem:[#allocation5 + $0x648] sm:$0xff] }
 0x7bb   :  { %6199 = vmatprep.subr.bf16.mxu0 %v7979_v61  ;;  %6240 = vmatprep.subr.bf16.mxu1 %v8107_v62  ;;  %v4602_v61 = vld [vmem:[#allocation5 + $0x668] sm:$0xff] }
 0x7bc   :  { %v4726_v62 = vld [vmem:[#allocation5 + $0xa48] sm:$0xff]  ;;  %v8051_v5 = vcombine.high %v4598_v60, %v4602_v61  ;;  %v8050_v20 = vcombine.low %v4598_v60, %v4602_v61  ;;  %v4683_v60 = vld [vmem:[#allocation5 + $0x8f0] sm:$0xff] }
 0x7bd   :  { %v8178_v50 = vcombine.low %v4726_v62, %v4730_v63 }
 0x7be   :  { %6200 = vmatpush1.bf16.msra.mxu0 %v7978_v6  ;;  %6241 = vmatpush1.bf16.msra.mxu1 %v8106_v16  ;;  %v8179_v6 = vcombine.high %v4726_v62, %v4730_v63  ;;  %v4590_v16 = vld [vmem:[#allocation5 + $0x608] sm:$0xff] }
 0x7bf   :  { %6201 = vmatprep.subr.bf16.mxu0 %v8099_v54  ;;  %6242 = vmatprep.subr.bf16.mxu1 %v8227_v17  ;;  %v4594_v54 = vld [vmem:[#allocation5 + $0x628] sm:$0xff] }
 0x7c0   :  { %v4718_v17 = vld [vmem:[#allocation5 + $0xa08] sm:$0xff]  ;;  %v8043_v21 = vcombine.high %v4590_v16, %v4594_v54  ;;  %v8042_v13 = vcombine.low %v4590_v16, %v4594_v54  ;;  %v4675_v16 = vld [vmem:[#allocation5 + $0x8b0] sm:$0xff] }
 0x7c1   :  { %v8170_v25 = vcombine.low %v4718_v17, %v4722_v48 }
 0x7c2   :  { %6202 = vmatpush2.bf16.msra.mxu0 %v8098_v22  ;;  %6243 = vmatpush2.bf16.msra.mxu1 %v8226_v8  ;;  %v8171_v22 = vcombine.high %v4718_v17, %v4722_v48  ;;  %v4583_v8 = vld [vmem:[#allocation5 + $0x5d0] sm:$0xff] }
 0x7c3   :  { %6203 = vmatprep.subr.bf16.mxu0 %v8091_v23  ;;  %6244 = vmatprep.subr.bf16.mxu1 %v8219_v24  ;;  %v4587_v23 = vld [vmem:[#allocation5 + $0x5f0] sm:$0xff] }
 0x7c4   :  { %v4711_v24 = vld [vmem:[#allocation5 + $0x9d0] sm:$0xff]  ;;  %v8037_v26 = vcombine.high %v4583_v8, %v4587_v23  ;;  %v8036_v31 = vcombine.low %v4583_v8, %v4587_v23 }
 0x7c5   :  { %v8164_v32 = vcombine.low %v4711_v24, %v4715_v51  ;;  %v4667_v8 = vld [vmem:[#allocation5 + $0x870] sm:$0xff] }
 0x7c6   :  { %6204 = vmatpush2.bf16.msra.mxu0 %v8090_v27  ;;  %6245 = vmatpush2.bf16.msra.mxu1 %v8218_v28  ;;  %v8165_v27 = vcombine.high %v4711_v24, %v4715_v51  ;;  %v4575_v28 = vld [vmem:[#allocation5 + $0x590] sm:$0xff] }
 0x7c7   :  { %6205 = vmatprep.subr.bf16.mxu0 %v8083_v29  ;;  %6246 = vmatprep.subr.bf16.mxu1 %v8211_v30  ;;  %v4579_v29 = vld [vmem:[#allocation5 + $0x5b0] sm:$0xff] }
 0x7c8   :  { %v4703_v30 = vld [vmem:[#allocation5 + $0x990] sm:$0xff]  ;;  %v8029_v41 = vcombine.high %v4575_v28, %v4579_v29  ;;  %v8028_v45 = vcombine.low %v4575_v28, %v4579_v29 }
 0x7c9   :  { %v8156_v46 = vcombine.low %v4703_v30, %v4707_v38  ;;  %v4659_v28 = vld [vmem:[#allocation5 + $0x830] sm:$0xff] }
 0x7ca   :  { %6206 = vmatpush2.bf16.msra.mxu0 %v8082_v33  ;;  %6247 = vmatpush2.bf16.msra.mxu1 %v8210_v35  ;;  %v8157_v33 = vcombine.high %v4703_v30, %v4707_v38  ;;  %v4567_v35 = vld [vmem:[#allocation5 + $0x550] sm:$0xff] }
 0x7cb   :  { %6207 = vmatprep.subr.bf16.mxu0 %v8075_v42  ;;  %6248 = vmatprep.subr.bf16.mxu1 %v8203_v57  ;;  %v4571_v42 = vld [vmem:[#allocation5 + $0x570] sm:$0xff] }
 0x7cc   :  { %v4695_v57 = vld [vmem:[#allocation5 + $0x950] sm:$0xff]  ;;  %v8021_v40 = vcombine.high %v4567_v35, %v4571_v42  ;;  %v8020_v53 = vcombine.low %v4567_v35, %v4571_v42 }
 0x7cd   :  { %v8148_v55 = vcombine.low %v4695_v57, %v4699_v44  ;;  %v4779_v35 = vld [vmem:[#allocation5 + $0xbf0] sm:$0xff] }
 0x7ce   :  { %6208 = vmatpush2.bf16.msra.mxu0 %v8074_v47  ;;  %6249 = vmatpush2.bf16.msra.mxu1 %v8202_v37  ;;  %v8149_v47 = vcombine.high %v4695_v57, %v4699_v44  ;;  %v4559_v37 = vld [vmem:[#allocation5 + $0x510] sm:$0xff] }
 0x7cf   :  { %6209 = vmatprep.subr.bf16.mxu0 %v8067_v49  ;;  %6250 = vmatprep.subr.bf16.mxu1 %v8195_v19  ;;  %v4563_v49 = vld [vmem:[#allocation5 + $0x530] sm:$0xff] }
 0x7d0   :  { %v4687_v19 = vld [vmem:[#allocation5 + $0x910] sm:$0xff]  ;;  %v8013_v18 = vcombine.high %v4559_v37, %v4563_v49  ;;  %v8012_v61 = vcombine.low %v4559_v37, %v4563_v49 }
 0x7d1   :  { %v8140_v62 = vcombine.low %v4687_v19, %v4691_v52  ;;  %v4771_v37 = vld [vmem:[#allocation5 + $0xbb0] sm:$0xff] }
 0x7d2   :  { %6210 = vmatpush2.bf16.msra.mxu0 %v8066_v56  ;;  %6251 = vmatpush2.bf16.msra.mxu1 %v8194_v58  ;;  %v8141_v56 = vcombine.high %v4687_v19, %v4691_v52  ;;  %v4551_v58 = vld [vmem:[#allocation5 + $0x4d0] sm:$0xff] }
 0x7d3   :  { %6211 = vmatprep.subr.bf16.mxu0 %v8059_v7  ;;  %6252 = vmatprep.subr.bf16.mxu1 %v8187_v59  ;;  %v4555_v7 = vld [vmem:[#allocation5 + $0x4f0] sm:$0xff] }
 0x7d4   :  { %v4679_v59 = vld [vmem:[#allocation5 + $0x8d0] sm:$0xff]  ;;  %v8005_v63 = vcombine.high %v4551_v58, %v4555_v7  ;;  %v8004_v54 = vcombine.low %v4551_v58, %v4555_v7 }
 0x7d5   :  { %v8132_v17 = vcombine.low %v4679_v59, %v4683_v60  ;;  %v4763_v58 = vld [vmem:[#allocation5 + $0xb70] sm:$0xff] }
 0x7d6   :  { %6212 = vmatpush2.bf16.msra.mxu0 %v8058_v3  ;;  %6253 = vmatpush2.bf16.msra.mxu1 %v8186_v4  ;;  %v8133_v3 = vcombine.high %v4679_v59, %v4683_v60  ;;  %v4543_v4 = vld [vmem:[#allocation5 + $0x490] sm:$0xff] }
 0x7d7   :  { %6213 = vmatprep.subr.bf16.mxu0 %v8051_v5  ;;  %6254 = vmatprep.subr.bf16.mxu1 %v8179_v6  ;;  %v4547_v5 = vld [vmem:[#allocation5 + $0x4b0] sm:$0xff] }
 0x7d8   :  { %v4671_v6 = vld [vmem:[#allocation5 + $0x890] sm:$0xff]  ;;  %v7997_v48 = vcombine.high %v4543_v4, %v4547_v5  ;;  %v7996_v23 = vcombine.low %v4543_v4, %v4547_v5 }
 0x7d9   :  { %v8124_v24 = vcombine.low %v4671_v6, %v4675_v16  ;;  %v4755_v4 = vld [vmem:[#allocation5 + $0xb30] sm:$0xff] }
 0x7da   :  { %6214 = vmatpush2.bf16.msra.mxu0 %v8050_v20  ;;  %6255 = vmatpush2.bf16.msra.mxu1 %v8178_v50  ;;  %v8125_v20 = vcombine.high %v4671_v6, %v4675_v16  ;;  %v4535_v50 = vld [vmem:[#allocation5 + $0x450] sm:$0xff] }
 0x7db   :  { %6215 = vmatprep.subr.bf16.mxu0 %v8043_v21  ;;  %6256 = vmatprep.subr.bf16.mxu1 %v8171_v22  ;;  %v4539_v21 = vld [vmem:[#allocation5 + $0x470] sm:$0xff] }
 0x7dc   :  { %v4663_v22 = vld [vmem:[#allocation5 + $0x850] sm:$0xff]  ;;  %v7989_v51 = vcombine.high %v4535_v50, %v4539_v21  ;;  %v7988_v29 = vcombine.low %v4535_v50, %v4539_v21 }
 0x7dd   :  { %v8116_v30 = vcombine.low %v4663_v22, %v4667_v8  ;;  %v4747_v50 = vld [vmem:[#allocation5 + $0xaf0] sm:$0xff] }
 0x7de   :  { %6216 = vmatpush2.bf16.msra.mxu0 %v8042_v13  ;;  %6257 = vmatpush2.bf16.msra.mxu1 %v8170_v25  ;;  %v8117_v13 = vcombine.high %v4663_v22, %v4667_v8  ;;  %v4527_v25 = vld [vmem:[#allocation5 + $0x410] sm:$0xff] }
 0x7df   :  { %6267 = vmatprep.subr.bf16.mxu0 %v8037_v26  ;;  %6308 = vmatprep.subr.bf16.mxu1 %v8165_v27  ;;  %v4531_v26 = vld [vmem:[#allocation5 + $0x430] sm:$0xff] }
 0x7e0   :  { %v4655_v27 = vld [vmem:[#allocation5 + $0x810] sm:$0xff]  ;;  %v7981_v38 = vcombine.high %v4527_v25, %v4531_v26  ;;  %v7980_v42 = vcombine.low %v4527_v25, %v4531_v26 }
 0x7e1   :  { %6218 = vmatmul.mubr.bf16.vlgmr.msra.gmra.mxu0 %v9639_v2  ;;  %6259 = vmatmul.mubr.bf16.vlgmr.msra.gmra.mxu1 %v9641_v10  ;;  %v8108_v57 = vcombine.low %v4655_v27, %v4659_v28  ;;  %v4739_v25 = vld [vmem:[#allocation5 + $0xab0] sm:$0xff] }
 0x7e2   :  { %6268 = vmatpush1.bf16.msra.mxu0 %v8036_v31  ;;  %6299 = vmatprep.mubr.bf16.mxu0 %v9635_v0  ;;  %v8109_v31 = vcombine.high %v4655_v27, %v4659_v28 }
 0x7e3   :  { %6309 = vmatpush1.bf16.msra.mxu1 %v8164_v32  ;;  %6340 = vmatprep.mubr.bf16.mxu1 %v9637_v1  ;;  %v4647_v32 = vld [vmem:[#allocation5 + $0x7d0] sm:$0xff] }
 0x7e4   :  { %6269 = vmatprep.subr.bf16.mxu0 %v8029_v41  ;;  %6310 = vmatprep.subr.bf16.mxu1 %v8157_v33  ;;  %v4651_v41 = vld [vmem:[#allocation5 + $0x7f0] sm:$0xff] }
 0x7e5   :  { %v4775_v33 = vld [vmem:[#allocation5 + $0xbd0] sm:$0xff]  ;;  %v8101_v44 = vcombine.high %v4647_v32, %v4651_v41  ;;  %v8100_v49 = vcombine.low %v4647_v32, %v4651_v41 }
 0x7e6   :  { %6270 = vmatpush1.bf16.msra.mxu0 %v8028_v45  ;;  %v8229_v45 = vcombine.high %v4775_v33, %v4779_v35  ;;  %v8228_v19 = vcombine.low %v4775_v33, %v4779_v35  ;;  %v4731_v32 = vld [vmem:[#allocation5 + $0xa70] sm:$0xff] }
 0x7e7   :  { %6311 = vmatpush1.bf16.msra.mxu1 %v8156_v46  ;;  %6271 = vmatprep.subr.bf16.mxu0 %v8021_v40  ;;  %v4639_v46 = vld [vmem:[#allocation5 + $0x790] sm:$0xff] }
 0x7e8   :  { %6312 = vmatprep.subr.bf16.mxu1 %v8149_v47  ;;  %v4643_v40 = vld [vmem:[#allocation5 + $0x7b0] sm:$0xff] }
 0x7e9   :  { %v4767_v47 = vld [vmem:[#allocation5 + $0xb90] sm:$0xff]  ;;  %v8093_v52 = vcombine.high %v4639_v46, %v4643_v40  ;;  %v8092_v7 = vcombine.low %v4639_v46, %v4643_v40 }
 0x7ea   :  { %6272 = vmatpush1.bf16.msra.mxu0 %v8020_v53  ;;  %v8221_v53 = vcombine.high %v4767_v47, %v4771_v37  ;;  %v8220_v59 = vcombine.low %v4767_v47, %v4771_v37  ;;  %v4723_v46 = vld [vmem:[#allocation5 + $0xa30] sm:$0xff] }
 0x7eb   :  { %6313 = vmatpush1.bf16.msra.mxu1 %v8148_v55  ;;  %6273 = vmatprep.subr.bf16.mxu0 %v8013_v18  ;;  %v4631_v55 = vld [vmem:[#allocation5 + $0x750] sm:$0xff] }
 0x7ec   :  { %6314 = vmatprep.subr.bf16.mxu1 %v8141_v56  ;;  %v4635_v18 = vld [vmem:[#allocation5 + $0x770] sm:$0xff] }
 0x7ed   :  { %v4759_v56 = vld [vmem:[#allocation5 + $0xb50] sm:$0xff]  ;;  %v8085_v60 = vcombine.high %v4631_v55, %v4635_v18  ;;  %v8084_v5 = vcombine.low %v4631_v55, %v4635_v18  ;;  %v4716_v55 = vld [vmem:[#allocation5 + $0x9f8] sm:$0xff] }
 0x7ee   :  { %6274 = vmatpush1.bf16.msra.mxu0 %v8012_v61  ;;  %v8213_v61 = vcombine.high %v4759_v56, %v4763_v58  ;;  %v8212_v6 = vcombine.low %v4759_v56, %v4763_v58 }
 0x7ef   :  { %6315 = vmatpush1.bf16.msra.mxu1 %v8140_v62  ;;  %6275 = vmatprep.subr.bf16.mxu0 %v8005_v63  ;;  %v4623_v62 = vld [vmem:[#allocation5 + $0x710] sm:$0xff] }
 0x7f0   :  { %6316 = vmatprep.subr.bf16.mxu1 %v8133_v3  ;;  %v4627_v63 = vld [vmem:[#allocation5 + $0x730] sm:$0xff] }
 0x7f1   :  { %v4751_v3 = vld [vmem:[#allocation5 + $0xb10] sm:$0xff]  ;;  %v8077_v16 = vcombine.high %v4623_v62, %v4627_v63  ;;  %v8076_v21 = vcombine.low %v4623_v62, %v4627_v63  ;;  %v4704_v62 = vld [vmem:[#allocation5 + $0x998] sm:$0xff] }
 0x7f2   :  { %6276 = vmatpush1.bf16.msra.mxu0 %v8004_v54  ;;  %v8205_v54 = vcombine.high %v4751_v3, %v4755_v4  ;;  %v8204_v22 = vcombine.low %v4751_v3, %v4755_v4  ;;  %v4708_v63 = vld [vmem:[#allocation5 + $0x9b8] sm:$0xff] }
 0x7f3   :  { %6317 = vmatpush1.bf16.msra.mxu1 %v8132_v17  ;;  %6277 = vmatprep.subr.bf16.mxu0 %v7997_v48  ;;  %v4615_v17 = vld [vmem:[#allocation5 + $0x6d0] sm:$0xff] }
 0x7f4   :  { %6318 = vmatprep.subr.bf16.mxu1 %v8125_v20  ;;  %v4619_v48 = vld [vmem:[#allocation5 + $0x6f0] sm:$0xff] }
 0x7f5   :  { %v4743_v20 = vld [vmem:[#allocation5 + $0xad0] sm:$0xff]  ;;  %v8069_v8 = vcombine.high %v4615_v17, %v4619_v48  ;;  %v8068_v26 = vcombine.low %v4615_v17, %v4619_v48  ;;  %v4700_v17 = vld [vmem:[#allocation5 + $0x978] sm:$0xff] }
 0x7f6   :  { %6278 = vmatpush1.bf16.msra.mxu0 %v7996_v23  ;;  %v8197_v23 = vcombine.high %v4743_v20, %v4747_v50  ;;  %v8196_v27 = vcombine.low %v4743_v20, %v4747_v50  ;;  %v8158_v20 = vcombine.low %v4704_v62, %v4708_v63 }
 0x7f7   :  { %6319 = vmatpush1.bf16.msra.mxu1 %v8124_v24  ;;  %6279 = vmatprep.subr.bf16.mxu0 %v7989_v51  ;;  %v4607_v24 = vld [vmem:[#allocation5 + $0x690] sm:$0xff] }
 0x7f8   :  { %6320 = vmatprep.subr.bf16.mxu1 %v8117_v13  ;;  %v4611_v51 = vld [vmem:[#allocation5 + $0x6b0] sm:$0xff] }
 0x7f9   :  { %v4735_v13 = vld [vmem:[#allocation5 + $0xa90] sm:$0xff]  ;;  %v8061_v28 = vcombine.high %v4607_v24, %v4611_v51  ;;  %v8060_v41 = vcombine.low %v4607_v24, %v4611_v51  ;;  %v4692_v24 = vld [vmem:[#allocation5 + $0x938] sm:$0xff] }
 0x7fa   :  { %6280 = vmatpush1.bf16.msra.mxu0 %v7988_v29  ;;  %v8189_v29 = vcombine.high %v4735_v13, %v4739_v25  ;;  %v8188_v33 = vcombine.low %v4735_v13, %v4739_v25 }
 0x7fb   :  { %6321 = vmatpush1.bf16.msra.mxu1 %v8116_v30  ;;  %6281 = vmatprep.subr.bf16.mxu0 %v7981_v38  ;;  %v4599_v30 = vld [vmem:[#allocation5 + $0x650] sm:$0xff] }
 0x7fc   :  { %6322 = vmatprep.subr.bf16.mxu1 %v8109_v31  ;;  %v4603_v38 = vld [vmem:[#allocation5 + $0x670] sm:$0xff] }
 0x7fd   :  { %v4727_v31 = vld [vmem:[#allocation5 + $0xa50] sm:$0xff]  ;;  %v8053_v35 = vcombine.high %v4599_v30, %v4603_v38  ;;  %v8052_v40 = vcombine.low %v4599_v30, %v4603_v38 }
 0x7fe   :  { %6282 = vmatpush1.bf16.msra.mxu0 %v7980_v42  ;;  %v8181_v42 = vcombine.high %v4727_v31, %v4731_v32  ;;  %v8180_v47 = vcombine.low %v4727_v31, %v4731_v32  ;;  %v4544_v32 = vld [vmem:[#allocation5 + $0x498] sm:$0xff] }
 0x7ff   :  { %6323 = vmatpush1.bf16.msra.mxu1 %v8108_v57  ;;  %6283 = vmatprep.subr.bf16.mxu0 %v8101_v44  ;;  %v4591_v57 = vld [vmem:[#allocation5 + $0x610] sm:$0xff] }
 0x800   :  { %6324 = vmatprep.subr.bf16.mxu1 %v8229_v45  ;;  %v4595_v44 = vld [vmem:[#allocation5 + $0x630] sm:$0xff] }
 0x801   :  { %v4719_v45 = vld [vmem:[#allocation5 + $0xa10] sm:$0xff]  ;;  %v8045_v37 = vcombine.high %v4591_v57, %v4595_v44  ;;  %v8044_v18 = vcombine.low %v4591_v57, %v4595_v44 }
 0x802   :  { %6284 = vmatpush2.bf16.msra.mxu0 %v8100_v49  ;;  %v8173_v49 = vcombine.high %v4719_v45, %v4723_v46  ;;  %v8172_v56 = vcombine.low %v4719_v45, %v4723_v46  ;;  %v4536_v46 = vld [vmem:[#allocation5 + $0x458] sm:$0xff] }
 0x803   :  { %6325 = vmatpush2.bf16.msra.mxu1 %v8228_v19  ;;  %6285 = vmatprep.subr.bf16.mxu0 %v8093_v52  ;;  %v4584_v19 = vld [vmem:[#allocation5 + $0x5d8] sm:$0xff] }
 0x804   :  { %6326 = vmatprep.subr.bf16.mxu1 %v8221_v53  ;;  %v4588_v52 = vld [vmem:[#allocation5 + $0x5f8] sm:$0xff] }
 0x805   :  { %v4712_v53 = vld [vmem:[#allocation5 + $0x9d8] sm:$0xff]  ;;  %v8039_v58 = vcombine.high %v4584_v19, %v4588_v52 }
 0x806   :  { %6286 = vmatpush2.bf16.msra.mxu0 %v8092_v7  ;;  %v8167_v7 = vcombine.high %v4712_v53, %v4716_v55  ;;  %v8166_v3 = vcombine.low %v4712_v53, %v4716_v55  ;;  %v4528_v55 = vld [vmem:[#allocation5 + $0x418] sm:$0xff] }
 0x807   :  { %6327 = vmatpush2.bf16.msra.mxu1 %v8220_v59  ;;  %6287 = vmatprep.subr.bf16.mxu0 %v8085_v60  ;;  %v4576_v59 = vld [vmem:[#allocation5 + $0x598] sm:$0xff] }
 0x808   :  { %6328 = vmatprep.subr.bf16.mxu1 %v8213_v61  ;;  %v4580_v60 = vld [vmem:[#allocation5 + $0x5b8] sm:$0xff]  ;;  %v8038_v61 = vcombine.low %v4584_v19, %v4588_v52 }
 0x809   :  { %v8031_v4 = vcombine.high %v4576_v59, %v4580_v60  ;;  %v8030_v48 = vcombine.low %v4576_v59, %v4580_v60 }
 0x80a   :  { %6288 = vmatpush2.bf16.msra.mxu0 %v8084_v5  ;;  %v4568_v5 = vld [vmem:[#allocation5 + $0x558] sm:$0xff] }
 0x80b   :  { %6329 = vmatpush2.bf16.msra.mxu1 %v8212_v6  ;;  %6289 = vmatprep.subr.bf16.mxu0 %v8077_v16  ;;  %v4572_v6 = vld [vmem:[#allocation5 + $0x578] sm:$0xff]  ;;  %v8159_v16 = vcombine.high %v4704_v62, %v4708_v63 }
 0x80c   :  { %6330 = vmatprep.subr.bf16.mxu1 %v8205_v54  ;;  %v4696_v54 = vld [vmem:[#allocation5 + $0x958] sm:$0xff]  ;;  %v8023_v50 = vcombine.high %v4568_v5, %v4572_v6  ;;  %v8022_v51 = vcombine.low %v4568_v5, %v4572_v6 }
 0x80d   :  { %v8150_v13 = vcombine.low %v4696_v54, %v4700_v17  ;;  %v4648_v62 = vld [vmem:[#allocation5 + $0x7d8] sm:$0xff] }
 0x80e   :  { %6290 = vmatpush2.bf16.msra.mxu0 %v8076_v21  ;;  %v8151_v21 = vcombine.high %v4696_v54, %v4700_v17  ;;  %v4652_v63 = vld [vmem:[#allocation5 + $0x7f8] sm:$0xff] }
 0x80f   :  { %6331 = vmatpush2.bf16.msra.mxu1 %v8204_v22  ;;  %6291 = vmatprep.subr.bf16.mxu0 %v8069_v8  ;;  %v4560_v22 = vld [vmem:[#allocation5 + $0x518] sm:$0xff] }
 0x810   :  { %6332 = vmatprep.subr.bf16.mxu1 %v8197_v23  ;;  %v4564_v8 = vld [vmem:[#allocation5 + $0x538] sm:$0xff] }
 0x811   :  { %v4688_v23 = vld [vmem:[#allocation5 + $0x918] sm:$0xff]  ;;  %v8015_v25 = vcombine.high %v4560_v22, %v4564_v8 }
 0x812   :  { %6292 = vmatpush2.bf16.msra.mxu0 %v8068_v26  ;;  %v4552_v26 = vld [vmem:[#allocation5 + $0x4d8] sm:$0xff]  ;;  %v8142_v30 = vcombine.low %v4688_v23, %v4692_v24 }
 0x813   :  { %6333 = vmatpush2.bf16.msra.mxu1 %v8196_v27  ;;  %6293 = vmatprep.subr.bf16.mxu0 %v8061_v28  ;;  %v4556_v27 = vld [vmem:[#allocation5 + $0x4f8] sm:$0xff] }
 0x814   :  { %6334 = vmatprep.subr.bf16.mxu1 %v8189_v29  ;;  %v4680_v28 = vld [vmem:[#allocation5 + $0x8d8] sm:$0xff]  ;;  %v8007_v38 = vcombine.high %v4552_v26, %v4556_v27 }
 0x815   :  { %v4684_v29 = vld [vmem:[#allocation5 + $0x8f8] sm:$0xff] }
 0x816   :  { %6294 = vmatpush2.bf16.msra.mxu0 %v8060_v41  ;;  %v8135_v31 = vcombine.high %v4680_v28, %v4684_v29  ;;  %v4548_v41 = vld [vmem:[#allocation5 + $0x4b8] sm:$0xff]  ;;  %v8134_v57 = vcombine.low %v4680_v28, %v4684_v29 }
 0x817   :  { %6335 = vmatpush2.bf16.msra.mxu1 %v8188_v33  ;;  %6295 = vmatprep.subr.bf16.mxu0 %v8053_v35  ;;  %v4672_v33 = vld [vmem:[#allocation5 + $0x898] sm:$0xff]  ;;  %v7999_v44 = vcombine.high %v4544_v32, %v4548_v41 }
 0x818   :  { %6336 = vmatprep.subr.bf16.mxu1 %v8181_v42  ;;  %v4676_v35 = vld [vmem:[#allocation5 + $0x8b8] sm:$0xff]  ;;  %v8006_v42 = vcombine.low %v4552_v26, %v4556_v27 }
 0x819   :  { %v8127_v45 = vcombine.high %v4672_v33, %v4676_v35  ;;  %v8126_v19 = vcombine.low %v4672_v33, %v4676_v35  ;;  %v4640_v17 = vld [vmem:[#allocation5 + $0x798] sm:$0xff] }
 0x81a   :  { %6296 = vmatpush2.bf16.msra.mxu0 %v8052_v40  ;;  %v4540_v40 = vld [vmem:[#allocation5 + $0x478] sm:$0xff] }
 0x81b   :  { %6337 = vmatpush2.bf16.msra.mxu1 %v8180_v47  ;;  %6297 = vmatprep.subr.bf16.mxu0 %v8045_v37  ;;  %v4664_v47 = vld [vmem:[#allocation5 + $0x858] sm:$0xff]  ;;  %v7991_v52 = vcombine.high %v4536_v46, %v4540_v40 }
 0x81c   :  { %6338 = vmatprep.subr.bf16.mxu1 %v8173_v49  ;;  %v4668_v37 = vld [vmem:[#allocation5 + $0x878] sm:$0xff]  ;;  %v7998_v49 = vcombine.low %v4544_v32, %v4548_v41 }
 0x81d   :  { %v8119_v53 = vcombine.high %v4664_v47, %v4668_v37  ;;  %v8118_v59 = vcombine.low %v4664_v47, %v4668_v37  ;;  %v4624_v29 = vld [vmem:[#allocation5 + $0x718] sm:$0xff] }
 0x81e   :  { %6298 = vmatpush2.bf16.msra.mxu0 %v8044_v18  ;;  %v4532_v18 = vld [vmem:[#allocation5 + $0x438] sm:$0xff] }
 0x81f   :  { %6339 = vmatpush2.bf16.msra.mxu1 %v8172_v56  ;;  %6349 = vmatprep.subr.bf16.mxu0 %v8039_v58  ;;  %v4656_v56 = vld [vmem:[#allocation5 + $0x818] sm:$0xff]  ;;  %v7983_v60 = vcombine.high %v4528_v55, %v4532_v18  ;;  %v7982_v5 = vcombine.low %v4528_v55, %v4532_v18 }
 0x820   :  { %6390 = vmatprep.subr.bf16.mxu1 %v8167_v7  ;;  %v4660_v58 = vld [vmem:[#allocation5 + $0x838] sm:$0xff]  ;;  %v7990_v7 = vcombine.low %v4536_v46, %v4540_v40 }
 0x821   :  { %6300 = vmatmul.mubr.bf16.vlgmr.msra.gmra.mxu0 %v9639_v2  ;;  %v8110_v6 = vcombine.low %v4656_v56, %v4660_v58  ;;  %v4616_v35 = vld [vmem:[#allocation5 + $0x6d8] sm:$0xff] }
 0x822   :  { %6341 = vmatmul.mubr.bf16.vlgmr.msra.gmra.mxu1 %v9641_v10  ;;  %6350 = vmatpush1.bf16.msra.mxu0 %v8038_v61  ;;  %v8111_v61 = vcombine.high %v4656_v56, %v4660_v58  ;;  %v4608_v37 = vld [vmem:[#allocation5 + $0x698] sm:$0xff] }
 0x823   :  { %6381 = vmatprep.mubr.bf16.mxu0 %v9635_v0  ;;  %6391 = vmatpush1.bf16.msra.mxu1 %v8166_v3  ;;  %v8143_v0 = vcombine.high %v4688_v23, %v4692_v24  ;;  %v4776_v3 = vld [vmem:[#allocation5 + $0xbd8] sm:$0xff] }
 0x824   :  { %6422 = vmatprep.mubr.bf16.mxu1 %v9637_v1  ;;  %6351 = vmatprep.subr.bf16.mxu0 %v8031_v4  ;;  %v8014_v1 = vcombine.low %v4560_v22, %v4564_v8  ;;  %v4780_v4 = vld [vmem:[#allocation5 + $0xbf8] sm:$0xff] }
 0x825   :  { %6392 = vmatprep.subr.bf16.mxu1 %v8159_v16  ;;  %v8103_v16 = vcombine.high %v4648_v62, %v4652_v63  ;;  %v8231_v54 = vcombine.high %v4776_v3, %v4780_v4  ;;  %v8230_v22 = vcombine.low %v4776_v3, %v4780_v4  ;;  %v4632_v24 = vld [vmem:[#allocation5 + $0x758] sm:$0xff] }
 0x826   :  { %6352 = vmatpush1.bf16.msra.mxu0 %v8030_v48  ;;  %v4644_v48 = vld [vmem:[#allocation5 + $0x7b8] sm:$0xff] }
 0x827   :  { %6393 = vmatpush1.bf16.msra.mxu1 %v8158_v20  ;;  %6353 = vmatprep.subr.bf16.mxu0 %v8023_v50  ;;  %v4768_v20 = vld [vmem:[#allocation5 + $0xb98] sm:$0xff]  ;;  %v8095_v8 = vcombine.high %v4640_v17, %v4644_v48 }
 0x828   :  { %6394 = vmatprep.subr.bf16.mxu1 %v8151_v21  ;;  %v4772_v50 = vld [vmem:[#allocation5 + $0xbb8] sm:$0xff]  ;;  %v8102_v21 = vcombine.low %v4648_v62, %v4652_v63 }
 0x829   :  { %v8223_v23 = vcombine.high %v4768_v20, %v4772_v50  ;;  %v8222_v26 = vcombine.low %v4768_v20, %v4772_v50  ;;  %v4600_v58 = vld [vmem:[#allocation5 + $0x658] sm:$0xff] }
 0x82a   :  { %6354 = vmatpush1.bf16.msra.mxu0 %v8022_v51  ;;  %v4636_v51 = vld [vmem:[#allocation5 + $0x778] sm:$0xff] }
 0x82b   :  { %6395 = vmatpush1.bf16.msra.mxu1 %v8150_v13  ;;  %6355 = vmatprep.subr.bf16.mxu0 %v8015_v25  ;;  %v4760_v13 = vld [vmem:[#allocation5 + $0xb58] sm:$0xff]  ;;  %v8087_v27 = vcombine.high %v4632_v24, %v4636_v51 }
 0x82c   :  { %6396 = vmatprep.subr.bf16.mxu1 %v8143_v0  ;;  %v4764_v25 = vld [vmem:[#allocation5 + $0xb78] sm:$0xff]  ;;  %v8094_v0 = vcombine.low %v4640_v17, %v4644_v48 }
 0x82d   :  { %v8215_v28 = vcombine.high %v4760_v13, %v4764_v25  ;;  %v8214_v32 = vcombine.low %v4760_v13, %v4764_v25  ;;  %v4592_v4 = vld [vmem:[#allocation5 + $0x618] sm:$0xff] }
 0x82e   :  { %6356 = vmatpush1.bf16.msra.mxu0 %v8014_v1  ;;  %v4628_v1 = vld [vmem:[#allocation5 + $0x738] sm:$0xff] }
 0x82f   :  { %6397 = vmatpush1.bf16.msra.mxu1 %v8142_v30  ;;  %6357 = vmatprep.subr.bf16.mxu0 %v8007_v38  ;;  %v4752_v30 = vld [vmem:[#allocation5 + $0xb18] sm:$0xff]  ;;  %v8079_v41 = vcombine.high %v4624_v29, %v4628_v1 }
 0x830   :  { %6398 = vmatprep.subr.bf16.mxu1 %v8135_v31  ;;  %v4756_v38 = vld [vmem:[#allocation5 + $0xb38] sm:$0xff]  ;;  %v8086_v31 = vcombine.low %v4632_v24, %v4636_v51  ;;  %v9095_v51 = vld [vmem:[#allocation8 + $0x2e4] ss:$8 sps:$4 sm:$0xff]  }
 0x831   :  { %v8207_v33 = vcombine.high %v4752_v30, %v4756_v38  ;;  %v8206_v46 = vcombine.low %v4752_v30, %v4756_v38  ;;  %v9657_v24 = vld [vmem:[#allocation11 + $0x17] sm:$0xff]  ;;  %v9108_v38 = vld [vmem:[#allocation8 + $0x3e0] ss:$8 sps:$4 sm:$0xff]  }
 0x832   :  { %6358 = vmatpush1.bf16.msra.mxu0 %v8006_v42  ;;  %v4620_v42 = vld [vmem:[#allocation5 + $0x6f8] sm:$0xff]  ;;  %v4790_v25 = vrot.slane %v9657_v24, %v9526_v14 }
 0x833   :  { %6399 = vmatpush1.bf16.msra.mxu1 %v8134_v57  ;;  %6359 = vmatprep.subr.bf16.mxu0 %v7999_v44  ;;  %v4744_v57 = vld [vmem:[#allocation5 + $0xad8] sm:$0xff]  ;;  %v8071_v40 = vcombine.high %v4616_v35, %v4620_v42 }
 0x834   :  { %6400 = vmatprep.subr.bf16.mxu1 %v8127_v45  ;;  %v4748_v44 = vld [vmem:[#allocation5 + $0xaf8] sm:$0xff]  ;;  %v8078_v45 = vcombine.low %v4624_v29, %v4628_v1 }
 0x835   :  { %v8199_v47 = vcombine.high %v4744_v57, %v4748_v44  ;;  %v8198_v55 = vcombine.low %v4744_v57, %v4748_v44  ;;  %v9102_v13 = vld [vmem:[#allocation8 + $0x3f0] ss:$8 sps:$4 sm:$0xff]   ;;  %v9098_v30 = vld [vmem:[#allocation8 + $0x2d4] ss:$8 sps:$4 sm:$0xff]  }
 0x836   :  { %6360 = vmatpush1.bf16.msra.mxu0 %v7998_v49  ;;  %v4612_v49 = vld [vmem:[#allocation5 + $0x6b8] sm:$0xff] }
 0x837   :  { %6401 = vmatpush1.bf16.msra.mxu1 %v8126_v19  ;;  %6361 = vmatprep.subr.bf16.mxu0 %v7991_v52  ;;  %v4736_v19 = vld [vmem:[#allocation5 + $0xa98] sm:$0xff]  ;;  %v8063_v18 = vcombine.high %v4608_v37, %v4612_v49 }
 0x838   :  { %6402 = vmatprep.subr.bf16.mxu1 %v8119_v53  ;;  %v4740_v52 = vld [vmem:[#allocation5 + $0xab8] sm:$0xff]  ;;  %v8070_v53 = vcombine.low %v4616_v35, %v4620_v42 }
 0x839   :  { %v8191_v56 = vcombine.high %v4736_v19, %v4740_v52  ;;  %v8190_v62 = vcombine.low %v4736_v19, %v4740_v52  ;;  %v9096_v35 = vld [vmem:[#allocation8 + $0x2d0] ss:$8 sps:$4 sm:$0xff]   ;;  %v9128_v19 = vld [vmem:[#allocation8 + $0x3b4] ss:$8 sps:$4 sm:$0xff]  }
 0x83a   :  { %6362 = vmatpush1.bf16.msra.mxu0 %v7990_v7  ;;  %v4604_v7 = vld [vmem:[#allocation5 + $0x678] sm:$0xff] }
 0x83b   :  { %6403 = vmatpush1.bf16.msra.mxu1 %v8118_v59  ;;  %6363 = vmatprep.subr.bf16.mxu0 %v7983_v60  ;;  %v4728_v59 = vld [vmem:[#allocation5 + $0xa58] sm:$0xff]  ;;  %v8055_v63 = vcombine.high %v4600_v58, %v4604_v7 }
 0x83c   :  { %6404 = vmatprep.subr.bf16.mxu1 %v8111_v61  ;;  %v4732_v60 = vld [vmem:[#allocation5 + $0xa78] sm:$0xff]  ;;  %v8062_v61 = vcombine.low %v4608_v37, %v4612_v49  ;;  %v9120_v49 = vld [vmem:[#allocation8 + $0x3c0] ss:$8 sps:$4 sm:$0xff]  }
 0x83d   :  { %v8183_v3 = vcombine.high %v4728_v59, %v4732_v60  ;;  %v8182_v17 = vcombine.low %v4728_v59, %v4732_v60  ;;  %v9114_v44 = vld [vmem:[#allocation8 + $0x3d0] ss:$8 sps:$4 sm:$0xff]   ;;  %v9107_v37 = vld [vmem:[#allocation8 + $0x2b4] ss:$8 sps:$4 sm:$0xff]  }
 0x83e   :  { %6364 = vmatpush1.bf16.msra.mxu0 %v7982_v5  ;;  %v4596_v5 = vld [vmem:[#allocation5 + $0x638] sm:$0xff] }
 0x83f   :  { %6405 = vmatpush1.bf16.msra.mxu1 %v8110_v6  ;;  %6365 = vmatprep.subr.bf16.mxu0 %v8103_v16  ;;  %v4720_v6 = vld [vmem:[#allocation5 + $0xa18] sm:$0xff]  ;;  %v8047_v48 = vcombine.high %v4592_v4, %v4596_v5  ;;  %v8046_v50 = vcombine.low %v4592_v4, %v4596_v5  ;;  %v9144_v5 = vld [vmem:[#allocation8 + $0x380] ss:$8 sps:$4 sm:$0xff]  }
 0x840   :  { %6406 = vmatprep.subr.bf16.mxu1 %v8231_v54  ;;  %v4724_v16 = vld [vmem:[#allocation5 + $0xa38] sm:$0xff]  ;;  %v8054_v54 = vcombine.low %v4600_v58, %v4604_v7  ;;  %v9132_v7 = vld [vmem:[#allocation8 + $0x3a0] ss:$8 sps:$4 sm:$0xff]  }
 0x841   :  { %v8175_v20 = vcombine.high %v4720_v6, %v4724_v16  ;;  %v9105_v52 = vld [vmem:[#allocation8 + $0x2b0] ss:$8 sps:$4 sm:$0xff]   ;;  %v9119_v58 = vld [vmem:[#allocation8 + $0x294] ss:$8 sps:$4 sm:$0xff]  }
 0x842   :  { %6366 = vmatpush2.bf16.msra.mxu0 %v8102_v21  ;;  %v8174_v21 = vcombine.low %v4720_v6, %v4724_v16  ;;  %v9140_v59 = vld [vmem:[#allocation8 + $0x394] ss:$8 sps:$4 sm:$0xff]   ;;  %v9117_v60 = vld [vmem:[#allocation8 + $0x290] ss:$8 sps:$4 sm:$0xff]  }
 0x843   :  { %6407 = vmatpush2.bf16.msra.mxu1 %v8230_v22  ;;  %6367 = vmatprep.subr.bf16.mxu0 %v8095_v8  ;;  %v9092_v22 = vld [vmem:[#allocation8 + $0x2f4] ss:$8 sps:$4 sm:$0xff]   ;;  %v9129_v16 = vld [vmem:[#allocation8 + $0x370] ss:$8 sps:$4 sm:$0xff]  }
 0x844   :  { %6408 = vmatprep.subr.bf16.mxu1 %v8223_v23  ;;  %v9104_v8 = vld [vmem:[#allocation8 + $0x3f4] ss:$8 sps:$4 sm:$0xff]   ;;  %v9090_v23 = vld [vmem:[#allocation8 + $0x2f0] ss:$8 sps:$4 sm:$0xff]  }
 0x845   :  { %v9131_v4 = vld [vmem:[#allocation8 + $0x374] ss:$8 sps:$4 sm:$0xff]  }
 0x846   :  { %6368 = vmatpush2.bf16.msra.mxu0 %v8094_v0  ;;  %v9110_v0 = vld [vmem:[#allocation8 + $0x3e4] ss:$8 sps:$4 sm:$0xff]   ;;  %v9152_v6 = vld [vmem:[#allocation8 + $0x474] ss:$8 sps:$4 sm:$0xff]  }
 0x847   :  { %6409 = vmatpush2.bf16.msra.mxu1 %v8222_v26  ;;  %6369 = vmatprep.subr.bf16.mxu0 %v8087_v27 }
 0x848   :  { %6410 = vmatprep.subr.bf16.mxu1 %v8215_v28  ;;  %v9093_v28 = vld [vmem:[#allocation8 + $0x2e0] ss:$8 sps:$4 sm:$0xff]  }
 0x84a   :  { %6370 = vmatpush2.bf16.msra.mxu0 %v8086_v31 }
 0x84b   :  { %6411 = vmatpush2.bf16.msra.mxu1 %v8214_v32  ;;  %6371 = vmatprep.subr.bf16.mxu0 %v8079_v41  ;;  %v9116_v32 = vld [vmem:[#allocation8 + $0x3d4] ss:$8 sps:$4 sm:$0xff]  }
 0x84c   :  { %6412 = vmatprep.subr.bf16.mxu1 %v8207_v33 }
 0x84e   :  { %6372 = vmatpush2.bf16.msra.mxu0 %v8078_v45 }
 0x84f   :  { %6413 = vmatpush2.bf16.msra.mxu1 %v8206_v46  ;;  %6373 = vmatprep.subr.bf16.mxu0 %v8071_v40  ;;  %v9122_v46 = vld [vmem:[#allocation8 + $0x3c4] ss:$8 sps:$4 sm:$0xff]  }
 0x850   :  { %6414 = vmatprep.subr.bf16.mxu1 %v8199_v47  ;;  %v9099_v47 = vld [vmem:[#allocation8 + $0x2c0] ss:$8 sps:$4 sm:$0xff]  }
 0x852   :  { %6374 = vmatpush2.bf16.msra.mxu0 %v8070_v53  ;;  %v9113_v53 = vld [vmem:[#allocation8 + $0x2a4] ss:$8 sps:$4 sm:$0xff]  }
 0x853   :  { %6415 = vmatpush2.bf16.msra.mxu1 %v8198_v55  ;;  %6375 = vmatprep.subr.bf16.mxu0 %v8063_v18  ;;  %v9126_v55 = vld [vmem:[#allocation8 + $0x3b0] ss:$8 sps:$4 sm:$0xff]   ;;  %v9134_v18 = vld [vmem:[#allocation8 + $0x3a4] ss:$8 sps:$4 sm:$0xff]  }
 0x854   :  { %6416 = vmatprep.subr.bf16.mxu1 %v8191_v56  ;;  %v9111_v56 = vld [vmem:[#allocation8 + $0x2a0] ss:$8 sps:$4 sm:$0xff]  }
 0x856   :  { %6376 = vmatpush2.bf16.msra.mxu0 %v8062_v61  ;;  %v9125_v61 = vld [vmem:[#allocation8 + $0x284] ss:$8 sps:$4 sm:$0xff]  }
 0x857   :  { %6417 = vmatpush2.bf16.msra.mxu1 %v8190_v62  ;;  %6377 = vmatprep.subr.bf16.mxu0 %v8055_v63  ;;  %v9138_v62 = vld [vmem:[#allocation8 + $0x390] ss:$8 sps:$4 sm:$0xff]   ;;  %v9146_v63 = vld [vmem:[#allocation8 + $0x384] ss:$8 sps:$4 sm:$0xff]  }
 0x858   :  { %6418 = vmatprep.subr.bf16.mxu1 %v8183_v3  ;;  %v9123_v3 = vld [vmem:[#allocation8 + $0x280] ss:$8 sps:$4 sm:$0xff]  }
 0x85a   :  { %6378 = vmatpush2.bf16.msra.mxu0 %v8054_v54  ;;  %v9137_v54 = vld [vmem:[#allocation8 + $0x364] ss:$8 sps:$4 sm:$0xff]  }
 0x85b   :  { %6419 = vmatpush2.bf16.msra.mxu1 %v8182_v17  ;;  %6379 = vmatprep.subr.bf16.mxu0 %v8047_v48  ;;  %v9150_v17 = vld [vmem:[#allocation8 + $0x470] ss:$8 sps:$4 sm:$0xff]   ;;  %v9158_v48 = vld [vmem:[#allocation8 + $0x464] ss:$8 sps:$4 sm:$0xff]  }
 0x85c   :  { %6420 = vmatprep.subr.bf16.mxu1 %v8175_v20  ;;  %v9135_v20 = vld [vmem:[#allocation8 + $0x360] ss:$8 sps:$4 sm:$0xff]  }
 0x85e   :  { %6380 = vmatpush2.bf16.msra.mxu0 %v8046_v50  ;;  %v9143_v50 = vld [vmem:[#allocation8 + $0x354] ss:$8 sps:$4 sm:$0xff]  }
 0x85f   :  { %6421 = vmatpush2.bf16.msra.mxu1 %v8174_v21  ;;  %7227 = vmatprep.subr.bf16.mxu0 %v9092_v22  ;;  %v9156_v21 = vld [vmem:[#allocation8 + $0x460] ss:$8 sps:$4 sm:$0xff]   ;;  %v9164_v22 = vld [vmem:[#allocation8 + $0x454] ss:$8 sps:$4 sm:$0xff]  }
 0x860   :  { %7268 = vmatprep.subr.bf16.mxu1 %v9104_v8  ;;  %v9141_v8 = vld [vmem:[#allocation8 + $0x350] ss:$8 sps:$4 sm:$0xff]  }
 0x861   :  { %6382 = vmatmul.mubr.bf16.vlgmr.msra.gmra.mxu0 %v9639_v2  ;;  %v9662_v26 = vpop.f32.mrf.mxu0  ;;  %v9664_v27 = vpop.f32.mrf.mxu1 }
 0x862   :  { %6423 = vmatmul.mubr.bf16.vlgmr.msra.gmra.mxu1 %v9641_v10  ;;  %7228 = vmatpush1.bf16.msra.mxu0 %v9090_v23  ;;  %v9101_v10 = vld [vmem:[#allocation8 + $0x2c4] ss:$8 sps:$4 sm:$0xff]  }
 0x863   :  { %v6139_v29 = vpop.f32.mrf.mxu0  ;;  %v6180_v1 = vpop.f32.mrf.mxu1  ;;  %7229 = vmatprep.subr.bf16.mxu0 %v9095_v51  ;;  %7269 = vmatpush1.bf16.msra.mxu1 %v9102_v13  ;;  %v9149_v23 = vld [vmem:[#allocation8 + $0x344] ss:$8 sps:$4 sm:$0xff]   ;;  %v9162_v51 = vld [vmem:[#allocation8 + $0x450] ss:$8 sps:$4 sm:$0xff]  }
 0x864   :  { %v6140_v31 = vadd.f32 %v6139_v29, %v4790_v25  ;;  %7270 = vmatprep.subr.bf16.mxu1 %v9110_v0  ;;  %v9170_v13 = vld [vmem:[#allocation8 + $0x444] ss:$8 sps:$4 sm:$0xff]   ;;  %v9147_v25 = vld [vmem:[#allocation8 + $0x340] ss:$8 sps:$4 sm:$0xff]   ;;  %v9155_v0 = vld [vmem:[#allocation8 + $0x334] ss:$8 sps:$4 sm:$0xff]  }
 0x865   :  { %v6141_v41 = vpop.f32.mrf.mxu0  ;;  %v6182_v33 = vpop.f32.mrf.mxu1  ;;  %v9176_v29 = vld [vmem:[#allocation8 + $0x434] ss:$8 sps:$4 sm:$0xff]  }
 0x866   :  { %v6181_v2 = vadd.f32 %v6180_v1, %v6140_v31  ;;  %7230 = vmatpush1.bf16.msra.mxu0 %v9093_v28  ;;  %v9168_v28 = vld [vmem:[#allocation8 + $0x440] ss:$8 sps:$4 sm:$0xff]   ;;  %v9153_v1 = vld [vmem:[#allocation8 + $0x330] ss:$8 sps:$4 sm:$0xff]  }
 0x867   :  { %v6142_v42 = vpop.f32.mrf.mxu0  ;;  %v6183_v57 = vpop.f32.mrf.mxu1  ;;  %7231 = vmatprep.subr.bf16.mxu0 %v9098_v30  ;;  %7271 = vmatpush1.bf16.msra.mxu1 %v9108_v38  ;;  %v4786_v30 = vrot.slane %v9657_v24, %v9520_v11  ;;  %v9161_v38 = vld [vmem:[#allocation8 + $0x324] ss:$8 sps:$4 sm:$0xff]   ;;  %v9174_v31 = vld [vmem:[#allocation8 + $0x430] ss:$8 sps:$4 sm:$0xff]   ;;  %v9159_v41 = vld [vmem:[#allocation8 + $0x320] ss:$8 sps:$4 sm:$0xff]  }
 0x868   :  { %v6432_v45 = vmax.f32 %v6181_v2, 0.0  ;;  %7272 = vmatprep.subr.bf16.mxu1 %v9116_v32  ;;  %v9179_v32 = vld [vmem:[#allocation8 + $0x424] ss:$8 sps:$4 sm:$0xff]   ;;  %v9167_v2 = vld [vmem:[#allocation8 + $0x314] ss:$8 sps:$4 sm:$0xff]  }
 0x869   :  { %v6138_v33 = vadd.f32 %v9662_v26, %v4786_v30  ;;  %v9182_v42 = vld [vmem:[#allocation8 + $0x414] ss:$8 sps:$4 sm:$0xff]   ;;  %v9165_v57 = vld [vmem:[#allocation8 + $0x310] ss:$8 sps:$4 sm:$0xff]   ;;  %v9183_v26 = vld [vmem:[#allocation8 + $0x400] ss:$8 sps:$4 sm:$0xff]  }
 0x86a   :  { %v6440_v40 = vpack.c.bf16 %v6432_v45, %v6432_v45  ;;  %7232 = vmatpush1.bf16.msra.mxu0 %v9096_v35  ;;  %v9177_v35 = vld [vmem:[#allocation8 + $0x420] ss:$8 sps:$4 sm:$0xff]   ;;  %v9180_v45 = vld [vmem:[#allocation8 + $0x410] ss:$8 sps:$4 sm:$0xff]  }
 0x86b   :  { %7233 = vmatprep.subr.bf16.mxu0 %v9101_v10  ;;  %7273 = vmatpush1.bf16.msra.mxu1 %v9114_v44  ;;  %v6179_v10 = vadd.f32 %v9664_v27, %v6138_v33  ;;  %v9173_v44 = vld [vmem:[#allocation8 + $0x304] ss:$8 sps:$4 sm:$0xff]   ;;  %v9186_v27 = vld [vmem:[#allocation8 + $0x4f0] ss:$8 sps:$4 sm:$0xff]  }
 0x86c   :  { %7259 = vmatprep.mubr.bf16.mxu0 %v6440_v40  ;;  %7274 = vmatprep.subr.bf16.mxu1 %v9122_v46  ;;  %v9185_v46 = vld [vmem:[#allocation8 + $0x404] ss:$8 sps:$4 sm:$0xff]   ;;  %v9171_v40 = vld [vmem:[#allocation8 + $0x300] ss:$8 sps:$4 sm:$0xff]   ;;  %v9204_v30 = vld [vmem:[#allocation8 + $0x490] ss:$8 sps:$4 sm:$0xff]  }
 0x86d   :  { %v9246_v33 = vld [vmem:[#allocation8 + $0x5b0] ss:$8 sps:$4 sm:$0xff]  }
 0x86e   :  { %7234 = vmatpush1.bf16.msra.mxu0 %v9099_v47  ;;  %v6431_v47 = vmax.f32 %v6179_v10, 0.0  ;;  %v9215_v10 = vld [vmem:[#allocation8 + $0x564] ss:$8 sps:$4 sm:$0xff]  }
 0x86f   :  { %7235 = vmatprep.subr.bf16.mxu0 %v9107_v37  ;;  %7275 = vmatpush1.bf16.msra.mxu1 %v9120_v49  ;;  %v9188_v37 = vld [vmem:[#allocation8 + $0x4f4] ss:$8 sps:$4 sm:$0xff]  }
 0x870   :  { %7276 = vmatprep.subr.bf16.mxu1 %v9128_v19  ;;  %v9236_v49 = vld [vmem:[#allocation8 + $0x5f4] ss:$8 sps:$4 sm:$0xff]   ;;  %v4794_v19 = vrot.slane %v9657_v24, %v9523_v12 }
 0x872   :  { %7236 = vmatpush1.bf16.msra.mxu0 %v9105_v52  ;;  %v6439_v52 = vpack.c.bf16 %v6431_v47, %v6431_v47  ;;  %v9257_v47 = vld [vmem:[#allocation8 + $0x584] ss:$8 sps:$4 sm:$0xff]  }
 0x873   :  { %7237 = vmatprep.subr.bf16.mxu0 %v9113_v53  ;;  %7277 = vmatpush1.bf16.msra.mxu1 %v9126_v55  ;;  %v9191_v53 = vld [vmem:[#allocation8 + $0x4e4] ss:$8 sps:$4 sm:$0xff]   ;;  %v4798_v55 = vrot.slane %v9657_v24, %v9529_v15 }
 0x874   :  { %7278 = vmatprep.subr.bf16.mxu1 %v9134_v18 }
 0x876   :  { %7238 = vmatpush1.bf16.msra.mxu0 %v9111_v56 }
 0x877   :  { %7239 = vmatprep.subr.bf16.mxu0 %v9119_v58  ;;  %7279 = vmatpush1.bf16.msra.mxu1 %v9132_v7  ;;  %v9189_v7 = vld [vmem:[#allocation8 + $0x4e0] ss:$8 sps:$4 sm:$0xff]  }
 0x878   :  { %7280 = vmatprep.subr.bf16.mxu1 %v9140_v59 }
 0x87a   :  { %7240 = vmatpush1.bf16.msra.mxu0 %v9117_v60 }
 0x87b   :  { %7241 = vmatprep.subr.bf16.mxu0 %v9125_v61  ;;  %7281 = vmatpush1.bf16.msra.mxu1 %v9138_v62  ;;  %v9194_v61 = vld [vmem:[#allocation8 + $0x4d4] ss:$8 sps:$4 sm:$0xff]  }
 0x87c   :  { %7282 = vmatprep.subr.bf16.mxu1 %v9146_v63 }
 0x87e   :  { %7242 = vmatpush1.bf16.msra.mxu0 %v9123_v3 }
 0x87f   :  { %7243 = vmatprep.subr.bf16.mxu0 %v9131_v4  ;;  %7283 = vmatpush1.bf16.msra.mxu1 %v9144_v5  ;;  %v9192_v5 = vld [vmem:[#allocation8 + $0x4d0] ss:$8 sps:$4 sm:$0xff]  }
 0x880   :  { %7284 = vmatprep.subr.bf16.mxu1 %v9152_v6 }
 0x882   :  { %7244 = vmatpush2.bf16.msra.mxu0 %v9129_v16 }
 0x883   :  { %7245 = vmatprep.subr.bf16.mxu0 %v9137_v54  ;;  %7285 = vmatpush2.bf16.msra.mxu1 %v9150_v17  ;;  %v9197_v54 = vld [vmem:[#allocation8 + $0x4c4] ss:$8 sps:$4 sm:$0xff]  }
 0x884   :  { %7286 = vmatprep.subr.bf16.mxu1 %v9158_v48 }
 0x886   :  { %7246 = vmatpush2.bf16.msra.mxu0 %v9135_v20  ;;  %v9195_v20 = vld [vmem:[#allocation8 + $0x4c0] ss:$8 sps:$4 sm:$0xff]  }
 0x887   :  { %7247 = vmatprep.subr.bf16.mxu0 %v9143_v50  ;;  %7287 = vmatpush2.bf16.msra.mxu1 %v9156_v21  ;;  %v9234_v50 = vld [vmem:[#allocation8 + $0x5f0] ss:$8 sps:$4 sm:$0xff]  }
 0x888   :  { %7288 = vmatprep.subr.bf16.mxu1 %v9164_v22  ;;  %v9200_v22 = vld [vmem:[#allocation8 + $0x4b4] ss:$8 sps:$4 sm:$0xff]  }
 0x88a   :  { %7248 = vmatpush2.bf16.msra.mxu0 %v9141_v8  ;;  %v9239_v8 = vld [vmem:[#allocation8 + $0x5e4] ss:$8 sps:$4 sm:$0xff]  }
 0x88b   :  { %7249 = vmatprep.subr.bf16.mxu0 %v9149_v23  ;;  %7289 = vmatpush2.bf16.msra.mxu1 %v9162_v51  ;;  %v9198_v23 = vld [vmem:[#allocation8 + $0x4b0] ss:$8 sps:$4 sm:$0xff]   ;;  %v9237_v51 = vld [vmem:[#allocation8 + $0x5e0] ss:$8 sps:$4 sm:$0xff]  }
 0x88c   :  { %7290 = vmatprep.subr.bf16.mxu1 %v9170_v13  ;;  %v9203_v13 = vld [vmem:[#allocation8 + $0x4a4] ss:$8 sps:$4 sm:$0xff]  }
 0x88e   :  { %7250 = vmatpush2.bf16.msra.mxu0 %v9147_v25  ;;  %v9242_v25 = vld [vmem:[#allocation8 + $0x5d4] ss:$8 sps:$4 sm:$0xff]  }
 0x88f   :  { %7251 = vmatprep.subr.bf16.mxu0 %v9155_v0  ;;  %7291 = vmatpush2.bf16.msra.mxu1 %v9168_v28  ;;  %v9201_v0 = vld [vmem:[#allocation8 + $0x4a0] ss:$8 sps:$4 sm:$0xff]   ;;  %v9240_v28 = vld [vmem:[#allocation8 + $0x5d0] ss:$8 sps:$4 sm:$0xff]  }
 0x890   :  { %7292 = vmatprep.subr.bf16.mxu1 %v9176_v29  ;;  %v9206_v29 = vld [vmem:[#allocation8 + $0x494] ss:$8 sps:$4 sm:$0xff]  }
 0x892   :  { %7252 = vmatpush2.bf16.msra.mxu0 %v9153_v1  ;;  %v9245_v1 = vld [vmem:[#allocation8 + $0x5c4] ss:$8 sps:$4 sm:$0xff]  }
 0x893   :  { %7253 = vmatprep.subr.bf16.mxu0 %v9161_v38  ;;  %7293 = vmatpush2.bf16.msra.mxu1 %v9174_v31  ;;  %v9243_v38 = vld [vmem:[#allocation8 + $0x5c0] ss:$8 sps:$4 sm:$0xff]   ;;  %v9209_v31 = vld [vmem:[#allocation8 + $0x484] ss:$8 sps:$4 sm:$0xff]  }
 0x894   :  { %7294 = vmatprep.subr.bf16.mxu1 %v9179_v32  ;;  %v9248_v32 = vld [vmem:[#allocation8 + $0x5b4] ss:$8 sps:$4 sm:$0xff]  }
 0x896   :  { %7254 = vmatpush2.bf16.msra.mxu0 %v9159_v41  ;;  %v9207_v41 = vld [vmem:[#allocation8 + $0x480] ss:$8 sps:$4 sm:$0xff]  }
 0x897   :  { %7255 = vmatprep.subr.bf16.mxu0 %v9167_v2  ;;  %7295 = vmatpush2.bf16.msra.mxu1 %v9177_v35  ;;  %v9212_v2 = vld [vmem:[#allocation8 + $0x574] ss:$8 sps:$4 sm:$0xff]   ;;  %v9251_v35 = vld [vmem:[#allocation8 + $0x5a4] ss:$8 sps:$4 sm:$0xff]  }
 0x898   :  { %7296 = vmatprep.subr.bf16.mxu1 %v9182_v42  ;;  %v9210_v42 = vld [vmem:[#allocation8 + $0x570] ss:$8 sps:$4 sm:$0xff]  }
 0x89a   :  { %7256 = vmatpush2.bf16.msra.mxu0 %v9165_v57  ;;  %v9249_v57 = vld [vmem:[#allocation8 + $0x5a0] ss:$8 sps:$4 sm:$0xff]  }
 0x89b   :  { %7257 = vmatprep.subr.bf16.mxu0 %v9173_v44  ;;  %7297 = vmatpush2.bf16.msra.mxu1 %v9180_v45  ;;  %v9254_v44 = vld [vmem:[#allocation8 + $0x594] ss:$8 sps:$4 sm:$0xff]   ;;  %v9213_v45 = vld [vmem:[#allocation8 + $0x560] ss:$8 sps:$4 sm:$0xff]  }
 0x89c   :  { %7298 = vmatprep.subr.bf16.mxu1 %v9185_v46  ;;  %v9252_v46 = vld [vmem:[#allocation8 + $0x590] ss:$8 sps:$4 sm:$0xff]  }
 0x89e   :  { %7258 = vmatpush2.bf16.msra.mxu0 %v9171_v40  ;;  %v9218_v40 = vld [vmem:[#allocation8 + $0x554] ss:$8 sps:$4 sm:$0xff]  }
 0x89f   :  { %7299 = vmatpush2.bf16.msra.mxu1 %v9183_v26  ;;  %7309 = vmatprep.subr.bf16.mxu0 %v9188_v37  ;;  %v9216_v26 = vld [vmem:[#allocation8 + $0x550] ss:$8 sps:$4 sm:$0xff]   ;;  %v9255_v37 = vld [vmem:[#allocation8 + $0x580] ss:$8 sps:$4 sm:$0xff]  }
 0x8a0   :  { %7350 = vmatprep.subr.bf16.mxu1 %v9236_v49  ;;  %v9221_v49 = vld [vmem:[#allocation8 + $0x544] ss:$8 sps:$4 sm:$0xff]  }
 0x8a1   :  { %v6219_v18 = vpop.f32.mrf.mxu0  ;;  %v6260_v56 = vpop.f32.mrf.mxu1  ;;  %7260 = vmatmul.mubr.bf16.vlgmr.msra.gmra.mxu0 %v6439_v52  ;;  %v9258_v52 = vld [vmem:[#allocation8 + $0x670] ss:$8 sps:$4 sm:$0xff]  }
 0x8a2   :  { %v6220_v58 = vadd.f32 %v6219_v18, %v4794_v19  ;;  %7310 = vmatpush1.bf16.msra.mxu0 %v9186_v27  ;;  %v9260_v19 = vld [vmem:[#allocation8 + $0x674] ss:$8 sps:$4 sm:$0xff]   ;;  %v9219_v27 = vld [vmem:[#allocation8 + $0x540] ss:$8 sps:$4 sm:$0xff]   ;;  %v9222_v18 = vld [vmem:[#allocation8 + $0x530] ss:$8 sps:$4 sm:$0xff]  }
 0x8a3   :  { %v6221_v59 = vpop.f32.mrf.mxu0  ;;  %v6262_v60 = vpop.f32.mrf.mxu1  ;;  %7311 = vmatprep.subr.bf16.mxu0 %v9191_v53  ;;  %v9224_v53 = vld [vmem:[#allocation8 + $0x534] ss:$8 sps:$4 sm:$0xff]  }
 0x8a4   :  { %v6261_v12 = vadd.f32 %v6260_v56, %v6220_v58  ;;  %v6222_v62 = vadd.f32 %v6221_v59, %v4798_v55  ;;  %v9263_v55 = vld [vmem:[#allocation8 + $0x664] ss:$8 sps:$4 sm:$0xff]   ;;  %v9261_v56 = vld [vmem:[#allocation8 + $0x660] ss:$8 sps:$4 sm:$0xff]  }
 0x8a5   :  { %v6223_v63 = vpop.f32.mrf.mxu0  ;;  %v6264_v3 = vpop.f32.mrf.mxu1  ;;  %v9227_v58 = vld [vmem:[#allocation8 + $0x524] ss:$8 sps:$4 sm:$0xff]   ;;  %v9225_v59 = vld [vmem:[#allocation8 + $0x520] ss:$8 sps:$4 sm:$0xff]  }
 0x8a6   :  { %v6263_v4 = vadd.f32 %v6262_v60, %v6222_v62  ;;  %7312 = vmatpush1.bf16.msra.mxu0 %v9189_v7  ;;  %v6433_v6 = vmax.f32 %v6261_v12, 0.0  ;;  %v9266_v7 = vld [vmem:[#allocation8 + $0x654] ss:$8 sps:$4 sm:$0xff]   ;;  %v9264_v60 = vld [vmem:[#allocation8 + $0x650] ss:$8 sps:$4 sm:$0xff]  }
 0x8a7   :  { %v6224_v15 = vpop.f32.mrf.mxu0  ;;  %v6265_v16 = vpop.f32.mrf.mxu1  ;;  %7313 = vmatprep.subr.bf16.mxu0 %v9194_v61  ;;  %v9230_v61 = vld [vmem:[#allocation8 + $0x514] ss:$8 sps:$4 sm:$0xff]   ;;  %v9269_v12 = vld [vmem:[#allocation8 + $0x644] ss:$8 sps:$4 sm:$0xff]   ;;  %v9228_v62 = vld [vmem:[#allocation8 + $0x510] ss:$8 sps:$4 sm:$0xff]  }
 0x8a8   :  { %v6434_v17 = vmax.f32 %v6263_v4, 0.0  ;;  %v6441_v21 = vpack.c.bf16 %v6433_v6, %v6433_v6  ;;  %v9267_v63 = vld [vmem:[#allocation8 + $0x640] ss:$8 sps:$4 sm:$0xff]   ;;  %v9233_v3 = vld [vmem:[#allocation8 + $0x504] ss:$8 sps:$4 sm:$0xff]   ;;  %v4802_v16 = vrot.slane %v9657_v24, %v255_v34 }
 0x8a9   :  { %v9272_v4 = vld [vmem:[#allocation8 + $0x634] ss:$8 sps:$4 sm:$0xff]   ;;  %v9270_v6 = vld [vmem:[#allocation8 + $0x630] ss:$8 sps:$4 sm:$0xff]   ;;  %v9275_v15 = vld [vmem:[#allocation8 + $0x624] ss:$8 sps:$4 sm:$0xff]  }
 0x8aa   :  { %v6442_v48 = vpack.c.bf16 %v6434_v17, %v6434_v17  ;;  %7314 = vmatpush1.bf16.msra.mxu0 %v9192_v5  ;;  %v9231_v5 = vld [vmem:[#allocation8 + $0x500] ss:$8 sps:$4 sm:$0xff]   ;;  %v9278_v17 = vld [vmem:[#allocation8 + $0x614] ss:$8 sps:$4 sm:$0xff]  }
 0x8ab   :  { %7315 = vmatprep.subr.bf16.mxu0 %v9197_v54  ;;  %v9273_v54 = vld [vmem:[#allocation8 + $0x620] ss:$8 sps:$4 sm:$0xff]  }
 0x8ac   :  { %7300 = vmatprep.mubr.bf16.mxu1 %v6442_v48  ;;  %v4806_v48 = vrot.slane %v9657_v24, %v259_v39 }
 0x8ad   :  { %7301 = vmatmul.mubr.bf16.vlgmr.msra.gmra.mxu1 %v6441_v21 }
 0x8ae   :  { %7316 = vmatpush1.bf16.msra.mxu0 %v9195_v20  ;;  %7351 = vmatpush1.bf16.msra.mxu1 %v9234_v50 }
 0x8af   :  { %7317 = vmatprep.subr.bf16.mxu0 %v9200_v22  ;;  %7352 = vmatprep.subr.bf16.mxu1 %v9239_v8  ;;  %v9276_v22 = vld [vmem:[#allocation8 + $0x610] ss:$8 sps:$4 sm:$0xff]  }
 0x8b2   :  { %7318 = vmatpush1.bf16.msra.mxu0 %v9198_v23  ;;  %7353 = vmatpush1.bf16.msra.mxu1 %v9237_v51  ;;  %v9281_v23 = vld [vmem:[#allocation8 + $0x604] ss:$8 sps:$4 sm:$0xff]  }
 0x8b3   :  { %7319 = vmatprep.subr.bf16.mxu0 %v9203_v13  ;;  %7354 = vmatprep.subr.bf16.mxu1 %v9242_v25 }
 0x8b6   :  { %7320 = vmatpush1.bf16.msra.mxu0 %v9201_v0  ;;  %7355 = vmatpush1.bf16.msra.mxu1 %v9240_v28 }
 0x8b7   :  { %7321 = vmatprep.subr.bf16.mxu0 %v9206_v29  ;;  %7356 = vmatprep.subr.bf16.mxu1 %v9245_v1  ;;  %v9279_v29 = vld [vmem:[#allocation8 + $0x600] ss:$8 sps:$4 sm:$0xff]  }
 0x8ba   :  { %7322 = vmatpush1.bf16.msra.mxu0 %v9204_v30  ;;  %7357 = vmatpush1.bf16.msra.mxu1 %v9243_v38 }
 0x8bb   :  { %7323 = vmatprep.subr.bf16.mxu0 %v9209_v31  ;;  %7358 = vmatprep.subr.bf16.mxu1 %v9248_v32 }
 0x8be   :  { %7324 = vmatpush1.bf16.msra.mxu0 %v9207_v41  ;;  %7359 = vmatpush1.bf16.msra.mxu1 %v9246_v33  ;;  %v4810_v41 = vrot.slane %v9657_v24, %v263_v36  ;;  %v4814_v33 = vrot.slane %v9657_v24, %v267_v43  ;;  %v6575_v24 = vld [vmem:[#allocation11 + $0x1f] sm:$0x3] }
 0x8bf   :  { %7325 = vmatprep.subr.bf16.mxu0 %v9212_v2  ;;  %7360 = vmatprep.subr.bf16.mxu1 %v9251_v35 }
 0x8c2   :  { %7326 = vmatpush2.bf16.msra.mxu0 %v9210_v42  ;;  %7361 = vmatpush1.bf16.msra.mxu1 %v9249_v57 }
 0x8c3   :  { %7327 = vmatprep.subr.bf16.mxu0 %v9215_v10  ;;  %7362 = vmatprep.subr.bf16.mxu1 %v9254_v44 }
 0x8c6   :  { %7328 = vmatpush2.bf16.msra.mxu0 %v9213_v45  ;;  %7363 = vmatpush1.bf16.msra.mxu1 %v9252_v46 }
 0x8c7   :  { %7329 = vmatprep.subr.bf16.mxu0 %v9218_v40  ;;  %7364 = vmatprep.subr.bf16.mxu1 %v9257_v47 }
 0x8ca   :  { %7330 = vmatpush2.bf16.msra.mxu0 %v9216_v26  ;;  %7365 = vmatpush1.bf16.msra.mxu1 %v9255_v37 }
 0x8cb   :  { %7331 = vmatprep.subr.bf16.mxu0 %v9221_v49  ;;  %7366 = vmatprep.subr.bf16.mxu1 %v9260_v19 }
 0x8ce   :  { %7332 = vmatpush2.bf16.msra.mxu0 %v9219_v27  ;;  %7367 = vmatpush2.bf16.msra.mxu1 %v9258_v52 }
 0x8cf   :  { %7333 = vmatprep.subr.bf16.mxu0 %v9224_v53  ;;  %7368 = vmatprep.subr.bf16.mxu1 %v9263_v55  ;;  %v6580_v55 = vrot.slane %v6575_v24, %v9520_v11 }
 0x8d2   :  { %7334 = vmatpush2.bf16.msra.mxu0 %v9222_v18  ;;  %7369 = vmatpush2.bf16.msra.mxu1 %v9261_v56  ;;  %v6584_v18 = vrot.slane %v6575_v24, %v9526_v14 }
 0x8d3   :  { %7335 = vmatprep.subr.bf16.mxu0 %v9227_v58  ;;  %7370 = vmatprep.subr.bf16.mxu1 %v9266_v7 }
 0x8d6   :  { %7336 = vmatpush2.bf16.msra.mxu0 %v9225_v59  ;;  %7371 = vmatpush2.bf16.msra.mxu1 %v9264_v60 }
 0x8d7   :  { %7337 = vmatprep.subr.bf16.mxu0 %v9230_v61  ;;  %7372 = vmatprep.subr.bf16.mxu1 %v9269_v12 }
 0x8da   :  { %7338 = vmatpush2.bf16.msra.mxu0 %v9228_v62  ;;  %7373 = vmatpush2.bf16.msra.mxu1 %v9267_v63 }
 0x8db   :  { %7339 = vmatprep.subr.bf16.mxu0 %v9233_v3  ;;  %7374 = vmatprep.subr.bf16.mxu1 %v9272_v4 }
 0x8de   :  { %7340 = vmatpush2.bf16.msra.mxu0 %v9231_v5  ;;  %7375 = vmatpush2.bf16.msra.mxu1 %v9270_v6 }
 0x8df   :  { %7376 = vmatprep.subr.bf16.mxu1 %v9275_v15 }
 0x8e1   :  { %v6301_v20 = vpop.f32.mrf.mxu0 }
 0x8e2   :  { %v6302_v50 = vadd.f32 %v6301_v20, %v4802_v16  ;;  %v6342_v21 = vpop.f32.mrf.mxu1  ;;  %7377 = vmatpush2.bf16.msra.mxu1 %v9273_v54 }
 0x8e3   :  { %v6303_v8 = vpop.f32.mrf.mxu0  ;;  %7378 = vmatprep.subr.bf16.mxu1 %v9278_v17 }
 0x8e4   :  { %v6343_v51 = vadd.f32 %v6342_v21, %v6302_v50  ;;  %v6304_v13 = vadd.f32 %v6303_v8, %v4806_v48  ;;  %v6344_v34 = vpop.f32.mrf.mxu1 }
 0x8e5   :  { %v6305_v25 = vpop.f32.mrf.mxu0 }
 0x8e6   :  { %v6345_v0 = vadd.f32 %v6344_v34, %v6304_v13  ;;  %v6346_v28 = vpop.f32.mrf.mxu1  ;;  %7379 = vmatpush2.bf16.msra.mxu1 %v9276_v22  ;;  %v6435_v1 = vmax.f32 %v6343_v51, 0.0 }
 0x8e7   :  { %v6306_v30 = vpop.f32.mrf.mxu0  ;;  %7380 = vmatprep.subr.bf16.mxu1 %v9281_v23 }
 0x8e8   :  { %v6436_v39 = vmax.f32 %v6345_v0, 0.0  ;;  %v6347_v38 = vpop.f32.mrf.mxu1  ;;  %v6443_v32 = vpack.c.bf16 %v6435_v1, %v6435_v1 }
 0x8ea   :  { %v6444_v31 = vpack.c.bf16 %v6436_v39, %v6436_v39  ;;  %7381 = vmatpush2.bf16.msra.mxu1 %v9279_v29 }
 0x8ec   :  { %7341 = vmatprep.mubr.bf16.mxu0 %v6444_v31 }
 0x8ed   :  { %7342 = vmatmul.mubr.bf16.vlgmr.msra.gmra.mxu0 %v6443_v32 }
 0x921   :  { %v6383_v2 = vpop.f32.mrf.mxu0 }
 0x922   :  { %v6384_v35 = vadd.f32 %v6383_v2, %v4810_v41  ;;  %v6424_v42 = vpop.f32.mrf.mxu1 }
 0x923   :  { %v6385_v57 = vpop.f32.mrf.mxu0 }
 0x924   :  { %v6425_v10 = vadd.f32 %v6424_v42, %v6384_v35  ;;  %v6386_v44 = vadd.f32 %v6385_v57, %v4814_v33  ;;  %v6426_v45 = vpop.f32.mrf.mxu1 }
 0x925   :  { %v6387_v46 = vpop.f32.mrf.mxu0 }
 0x926   :  { %v6427_v40 = vadd.f32 %v6426_v45, %v6386_v44  ;;  %v6428_v47 = vpop.f32.mrf.mxu1  ;;  %v6437_v26 = vmax.f32 %v6425_v10, 0.0 }
 0x927   :  { %v6388_v37 = vpop.f32.mrf.mxu0 }
 0x928   :  { %v6438_v49 = vmax.f32 %v6427_v40, 0.0  ;;  %v6429_v19 = vpop.f32.mrf.mxu1  ;;  %v6445_v36 = vpack.c.bf16 %v6437_v26, %v6437_v26 }
 0x92a   :  { %v6446_v27 = vpack.c.bf16 %v6438_v49, %v6438_v49 }
 0x92c   :  { %7382 = vmatprep.mubr.bf16.mxu1 %v6446_v27 }
 0x92d   :  { %7383 = vmatmul.mubr.bf16.vlgmr.msra.gmra.mxu1 %v6445_v36 }
 0x961   :  { %v7261_v9 = vpop.f32.mrf.mxu0 }
 0x962   :  { %v7262_v56 = vadd.f32 %v7261_v9, %v6580_v55 }
 0x963   :  { %v7263_v43 = vpop.f32.mrf.mxu0 }
 0x964   :  { %v7264_v7 = vadd.f32 %v7263_v43, %v6584_v18 }
 0x965   :  { %v7265_v52 = vpop.f32.mrf.mxu0 }
 0x967   :  { %v7266_v53 = vpop.f32.mrf.mxu0 }
 0x96d   :  { %v7302_v58 = vpop.f32.mrf.mxu1 }
 0x96e   :  { %v7303_v59 = vadd.f32 %v7302_v58, %v7262_v56 }
 0x96f   :  { %v7304_v60 = vpop.f32.mrf.mxu1 }
 0x970   :  { %v7305_v61 = vadd.f32 %v7304_v60, %v7264_v7 }
 0x971   :  { %v7306_v12 = vpop.f32.mrf.mxu1 }
 0x973   :  { %v7307_v62 = vpop.f32.mrf.mxu1 }
 0x9ad   :  { %v7343_v63 = vpop.f32.mrf.mxu0 }
 0x9ae   :  { %v7344_v6 = vadd.f32 %v7343_v63, %v7303_v59 }
 0x9af   :  { %v7345_v3 = vpop.f32.mrf.mxu0 }
 0x9b0   :  { %v7346_v16 = vadd.f32 %v7345_v3, %v7305_v61 }
 0x9b1   :  { %v7347_v4 = vpop.f32.mrf.mxu0 }
 0x9b3   :  { %v7348_v5 = vpop.f32.mrf.mxu0 }
 0x9ed   :  { %v7384_v15 = vpop.f32.mrf.mxu1 }
 0x9ee   :  { %v7385_v54 = vadd.f32 %v7384_v15, %v7344_v6 }
 0x9ef   :  { %v7386_v17 = vpop.f32.mrf.mxu1 }
 0x9f0   :  { %v7391_v11 = vmax.f32 %v7385_v54, 0.0  ;;  %v7387_v14 = vadd.f32 %v7386_v17, %v7346_v16 }
 0x9f1   :  { %v7388_v48 = vpop.f32.mrf.mxu1 }
 0x9f2   :  { %7393 = vst [vmem:[#allocation13] sm:$0xff] %v7391_v11  ;;  %v7392_v20 = vmax.f32 %v7387_v14, 0.0 }
 0x9f3   :  { %v7389_v50 = vpop.f32.mrf.mxu1 }
 0x9f4   :  { %7394 = vst [vmem:[#allocation13 + $0x8] sm:$0xff] %v7392_v20 }
 0x9f5   :  { %9413 = shalt.err (!%p9410_p6)
}
 0x9f6   :  { %7404 = dma.vmem_to_hbm [thread:$0]  %s7402_s5, 256, %s9698_s6, [#allocation4]  }
 0x9f7   :  { %9430 = dma.done.wait [#allocation4], 256  }
 0x9f8   :  { %9431 = vsyncadd [#allocation4], 4294967040 }
 0x9f9   :  { %7408 = vsyncpa [#allocation3], 1 }
 0x9fa   :  { %7409 = vsyncpa [#allocation6], 1 }
 0x9fb   :  { %7410 = vsyncpa [#allocation9], 1 }
 0x9fc   :  { %7411 = vsyncpa [#allocation12], 1 }
 0x9fd   :  { %7412 = vsyncpa [#allocation4], 1 }

</bundles_post_ra>
